<compile_context>
chip_gen: v7x
topology: tpu7x:2x2x1
jax: 0.10.0
libtpu: 0.0.40
codegen_flags: <defaults>
</compile_context>

<pallas_src>
import numpy as np

import jax
import jax.numpy as jnp
from jax import lax
from jax.experimental import pallas as pl
from jax.experimental.pallas import tpu as pltpu


def _round_up(x, m):
    return (x + m - 1) // m * m


def _build_masks(H, W):
    """Ring / interior masks over the flattened padded image, shape (5, Hp*Wp) f32.
    Rows: [row0, row_last, col0, col_last, interior]."""
    Hp, Wp = H + 2, W + 2
    npix = Hp * Wp
    idx = np.arange(npix)
    hp = idx // Wp
    wp = idx % Wp
    m = np.stack(
        [
            (hp == 0),
            (hp == Hp - 1),
            (wp == 0),
            (wp == Wp - 1),
            (hp >= 1) & (hp <= H) & (wp >= 1) & (wp <= W),
        ]
    ).astype(np.float32)
    return jnp.asarray(m)


def _make_fused_kernel(H, W, cin, cmid, cout, margin):
    """Builds the fused 3-layer kernel. Activations are values of shape [C, Hp*Wp];
    a VMEM scratch buffer (ext_ref) holds the current padded activation with a
    zeroed halo so shifted windows can be read with plain static slices."""
    Hp, Wp = H + 2, W + 2
    npix = Hp * Wp

    def kernel(x_ref, w1_ref, b1_ref, w2_ref, b2_ref, w3_ref, b3_ref,
               m_ref, o_ref, ext_ref):
        # Zero the halo buffer (margins must be finite/zero; data region is
        # overwritten before every use).
        ext_ref[...] = jnp.zeros_like(ext_ref)

        row0 = m_ref[0:1, :]
        row_last = m_ref[1:2, :]
        col0 = m_ref[2:3, :]
        col_last = m_ref[3:4, :]
        interior = m_ref[4:5, :]

        def store_ext(a, c):
            # aligned store: margin is a multiple of 128
            ext_ref[0:c, margin:margin + npix] = a

        def shifted(c0, c1, s):
            # value[:, j] = padded_activation[:, j + s]   (halo reads give 0)
            start = margin + s
            return ext_ref[c0:c1, start:start + npix]

        def reflect_pad(a, c):
            # Overwrite the 1-pixel ring with reflection values (rows first,
            # then columns so the corners pick up the row-updated values).
            store_ext(a, c)
            a = a * (1.0 - row0) + shifted(0, c, 2 * Wp) * row0
            a = a * (1.0 - row_last) + shifted(0, c, -2 * Wp) * row_last
            store_ext(a, c)
            a = a * (1.0 - col0) + shifted(0, c, 2) * col0
            a = a * (1.0 - col_last) + shifted(0, c, -2) * col_last
            store_ext(a, c)

        def zero_pad(a, c):
            store_ext(a * interior, c)

        def conv3x3(w_ref, b_ref, c_in, c_out, relu):
            # VPU broadcast-FMA conv: acc[co, :] += w[co, ci, kh, kw] * x[ci, :+d]
            acc = jnp.zeros((c_out, npix), jnp.float32) + b_ref[...]  # bias
            for kh in range(3):
                for kw in range(3):
                    d = (kh - 1) * Wp + (kw - 1)
                    base = (kh * 3 + kw) * c_in
                    for ci in range(c_in):
                        w_col = w_ref[:, base + ci:base + ci + 1]      # [c_out, 1]
                        acc = acc + w_col * shifted(ci, ci + 1, d)     # [c_out, npix]
            if relu:
                acc = jnp.maximum(acc, 0.0)
            return acc

        # Layer 1: reflection pad (in-kernel) + conv + ReLU
        reflect_pad(x_ref[...], cin)
        y = conv3x3(w1_ref, b1_ref, cin, cmid, True)
        # Layer 2: zero pad (in-kernel) + conv + ReLU
        zero_pad(y, cmid)
        y = conv3x3(w2_ref, b2_ref, cmid, cmid, True)
        # Layer 3: reflection pad (in-kernel) + conv
        reflect_pad(y, cmid)
        y = conv3x3(w3_ref, b3_ref, cmid, cout, False)

        o_ref[...] = y.astype(o_ref.dtype)

    return kernel


def simple_cnn_generator_forward(x_nchw, params):
    """x_nchw: [B, Cin, H, W] float32 -> [B, Cout, H, W]."""
    (w1, b1), (w2, b2), (w3, b3) = params
    B, Cin, H, W = x_nchw.shape
    Cmid = w1.shape[0]
    Cout = w3.shape[0]
    Hp, Wp = H + 2, W + 2
    npix = Hp * Wp
    margin = 128
    ext_w = margin + _round_up(npix + 2 * Wp, 128)     # halo buffer lane width
    cbuf = _round_up(max(Cin, Cmid, Cout), 8)

    # Layout-only zero pad of the raw input (padding *semantics* are in-kernel).
    x_flat = jnp.pad(x_nchw, ((0, 0), (0, 0), (1, 1), (1, 1))).reshape(B, Cin, npix)

    def pack_w(w):  # [Co, Ci, 3, 3] -> [Co, 9*Ci], column index = (kh*3+kw)*Ci + ci
        co, ci = w.shape[0], w.shape[1]
        return jnp.transpose(w, (0, 2, 3, 1)).reshape(co, 9 * ci)

    masks = _build_masks(H, W)
    kernel = _make_fused_kernel(H, W, Cin, Cmid, Cout, margin)

    out_flat = pl.pallas_call(
        kernel,
        out_shape=jax.ShapeDtypeStruct((B, Cout, npix), x_nchw.dtype),
        grid_spec=pltpu.PrefetchScalarGridSpec(
            num_scalar_prefetch=0,
            grid=(B,),
            in_specs=[
                pl.BlockSpec((None, Cin, npix), lambda b: (b, 0, 0)),
                pl.BlockSpec((Cmid, 9 * Cin), lambda b: (0, 0)),
                pl.BlockSpec((Cmid, 1), lambda b: (0, 0)),
                pl.BlockSpec((Cmid, 9 * Cmid), lambda b: (0, 0)),
                pl.BlockSpec((Cmid, 1), lambda b: (0, 0)),
                pl.BlockSpec((Cout, 9 * Cmid), lambda b: (0, 0)),
                pl.BlockSpec((Cout, 1), lambda b: (0, 0)),
                pl.BlockSpec((5, npix), lambda b: (0, 0)),
            ],
            out_specs=pl.BlockSpec((None, Cout, npix), lambda b: (b, 0, 0)),
            scratch_shapes=[pltpu.VMEM((cbuf, ext_w), jnp.float32)],
        ),
        compiler_params=pltpu.CompilerParams(
            dimension_semantics=("parallel",),
        ),
    )(
        x_flat,
        pack_w(w1), b1.reshape(-1, 1),
        pack_w(w2), b2.reshape(-1, 1),
        pack_w(w3), b3.reshape(-1, 1),
        masks,
    )

    # Extract interior of the padded-flat output -> NCHW.
    return out_flat.reshape(B, Cout, Hp, Wp)[:, :, 1:H + 1, 1:W + 1]


def init_params(key, input_nc, output_nc):
    """PyTorch-style init; weights stored [Cout, Cin, 3, 3]."""
    ngf = input_nc
    ks = jax.random.split(key, 6)

    def conv_init(kw, kb, cin, cout):
        fan_in = cin * 9
        bound = 1.0 / jnp.sqrt(fan_in)
        w = jax.random.uniform(kw, (cout, cin, 3, 3), jnp.float32, -bound, bound)
        b = jax.random.uniform(kb, (cout,), jnp.float32, -bound, bound)
        return w, b

    w1, b1 = conv_init(ks[0], ks[1], input_nc, ngf)
    w2, b2 = conv_init(ks[2], ks[3], ngf, ngf)
    w3, b3 = conv_init(ks[4], ks[5], ngf, output_nc)
    return (w1, b1), (w2, b2), (w3, b3)


def _reference_forward(x_nchw, params):
    """Pure-JAX reference (lax.conv) for correctness check."""
    (w1, b1), (w2, b2), (w3, b3) = params
    dn = lax.conv_dimension_numbers(x_nchw.shape, w1.shape, ("NCHW", "OIHW", "NCHW"))

    def conv(x, w, b, pad_mode):
        if pad_mode == "reflect":
            x = jnp.pad(x, ((0, 0), (0, 0), (1, 1), (1, 1)), mode="reflect")
            pads = [(0, 0), (0, 0)]
        else:
            pads = [(1, 1), (1, 1)]
        y = lax.conv_general_dilated(x, w, (1, 1), pads, dimension_numbers=dn)
        return y + b[None, :, None, None]

    y = jax.nn.relu(conv(x_nchw, w1, b1, "reflect"))
    y = jax.nn.relu(conv(y, w2, b2, "zeros"))
    y = conv(y, w3, b3, "reflect")
    return y


if __name__ == "__main__":
    B, Cin, H, W = 2, 4, 16, 16
    Cout = 4  # output_nc

    key = jax.random.PRNGKey(0)
    kx, kp = jax.random.split(key)
    x = jax.random.normal(kx, (B, Cin, H, W), dtype=jnp.float32)
    params = init_params(kp, Cin, Cout)

    fwd = jax.jit(simple_cnn_generator_forward)
    out = jax.block_until_ready(fwd(x, params))

    ref = jax.block_until_ready(_reference_forward(x, params))
    assert out.shape == (B, Cout, H, W), out.shape
    err = float(jnp.max(jnp.abs(out - ref)))
    assert err < 1e-4, err

    print("KERNEL_OK")
</pallas_src>

<mosaic_0001>
module attributes {stable_mosaic.version = 11 : i64} {
  func.func @kernel(%arg0: i32, %arg1: memref<1x4x324xf32, #tpu.memory_space<vmem>>, %arg2: memref<4x36xf32, #tpu.memory_space<vmem>>, %arg3: memref<4x1xf32, #tpu.memory_space<vmem>>, %arg4: memref<4x36xf32, #tpu.memory_space<vmem>>, %arg5: memref<4x1xf32, #tpu.memory_space<vmem>>, %arg6: memref<4x36xf32, #tpu.memory_space<vmem>>, %arg7: memref<4x1xf32, #tpu.memory_space<vmem>>, %arg8: memref<5x324xf32, #tpu.memory_space<vmem>>, %arg9: memref<1x4x324xf32, #tpu.memory_space<vmem>>, %arg10: memref<8x512xf32, #tpu.memory_space<vmem>>) attributes {dimension_semantics = [#tpu.dimension_semantics<parallel>], iteration_bounds = array<i64: 2>, scalar_prefetch = 0 : i64, scratch_operands = 1 : i64, tpu.core_type = #tpu.core_type<tc>, window_params = [{transform_indices = @transform_0, window_bounds = array<i64: 1, 4, 324>}, {pipeline_mode = #tpu.pipeline_mode<synchronous>, transform_indices = @transform_1, window_bounds = array<i64: 4, 36>}, {pipeline_mode = #tpu.pipeline_mode<synchronous>, transform_indices = @transform_2, window_bounds = array<i64: 4, 1>}, {pipeline_mode = #tpu.pipeline_mode<synchronous>, transform_indices = @transform_3, window_bounds = array<i64: 4, 36>}, {pipeline_mode = #tpu.pipeline_mode<synchronous>, transform_indices = @transform_4, window_bounds = array<i64: 4, 1>}, {pipeline_mode = #tpu.pipeline_mode<synchronous>, transform_indices = @transform_5, window_bounds = array<i64: 4, 36>}, {pipeline_mode = #tpu.pipeline_mode<synchronous>, transform_indices = @transform_6, window_bounds = array<i64: 4, 1>}, {pipeline_mode = #tpu.pipeline_mode<synchronous>, transform_indices = @transform_7, window_bounds = array<i64: 5, 324>}, {transform_indices = @transform_8, window_bounds = array<i64: 1, 4, 324>}]} {
    %cst = arith.constant 0.000000e+00 : f32
    %0 = vector.broadcast %cst : f32 to vector<8x512xf32>
    %c0 = arith.constant 0 : index
    %c0_0 = arith.constant 0 : index
    %1 = vector.load %arg10[%c0, %c0_0] : memref<8x512xf32, #tpu.memory_space<vmem>>, vector<8x512xf32>
    tpu.vector_store %arg10[%c0, %c0_0], %0 {strides = array<i32>} : memref<8x512xf32, #tpu.memory_space<vmem>>, vector<8x512xf32>,
    %c0_1 = arith.constant 0 : index
    %c0_2 = arith.constant 0 : index
    %2 = vector.load %arg8[%c0_1, %c0_2] : memref<5x324xf32, #tpu.memory_space<vmem>>, vector<1x324xf32>
    %c1 = arith.constant 1 : index
    %c0_3 = arith.constant 0 : index
    %3 = vector.load %arg8[%c1, %c0_3] : memref<5x324xf32, #tpu.memory_space<vmem>>, vector<1x324xf32>
    %c2 = arith.constant 2 : index
    %c0_4 = arith.constant 0 : index
    %4 = vector.load %arg8[%c2, %c0_4] : memref<5x324xf32, #tpu.memory_space<vmem>>, vector<1x324xf32>
    %c3 = arith.constant 3 : index
    %c0_5 = arith.constant 0 : index
    %5 = vector.load %arg8[%c3, %c0_5] : memref<5x324xf32, #tpu.memory_space<vmem>>, vector<1x324xf32>
    %c4 = arith.constant 4 : index
    %c0_6 = arith.constant 0 : index
    %6 = vector.load %arg8[%c4, %c0_6] : memref<5x324xf32, #tpu.memory_space<vmem>>, vector<1x324xf32>
    %c0_7 = arith.constant 0 : index
    %c0_8 = arith.constant 0 : index
    %c0_9 = arith.constant 0 : index
    %7 = vector.load %arg1[%c0_7, %c0_8, %c0_9] : memref<1x4x324xf32, #tpu.memory_space<vmem>>, vector<1x4x324xf32>
    %8 = vector.shape_cast %7 : vector<1x4x324xf32> to vector<4x324xf32>
    %c0_10 = arith.constant 0 : index
    %c128 = arith.constant 128 : index
    %9 = vector.load %arg10[%c0_10, %c128] : memref<8x512xf32, #tpu.memory_space<vmem>>, vector<4x324xf32>
    tpu.vector_store %arg10[%c0_10, %c128], %8 {strides = array<i32>} : memref<8x512xf32, #tpu.memory_space<vmem>>, vector<4x324xf32>,
    %cst_11 = arith.constant 1.000000e+00 : f32
    %10 = vector.broadcast %cst_11 : f32 to vector<1x324xf32>
    %11 = arith.subf %10, %2 : vector<1x324xf32>
    %12 = vector.broadcast %11 : vector<1x324xf32> to vector<4x324xf32>
    %13 = arith.mulf %8, %12 : vector<4x324xf32>
    %c0_12 = arith.constant 0 : index
    %c164 = arith.constant 164 : index
    %14 = vector.load %arg10[%c0_12, %c164] : memref<8x512xf32, #tpu.memory_space<vmem>>, vector<4x324xf32>
    %15 = vector.broadcast %2 : vector<1x324xf32> to vector<4x324xf32>
    %16 = arith.mulf %14, %15 : vector<4x324xf32>
    %17 = arith.addf %13, %16 : vector<4x324xf32>
    %cst_13 = arith.constant 1.000000e+00 : f32
    %18 = vector.broadcast %cst_13 : f32 to vector<1x324xf32>
    %19 = arith.subf %18, %3 : vector<1x324xf32>
    %20 = vector.broadcast %19 : vector<1x324xf32> to vector<4x324xf32>
    %21 = arith.mulf %17, %20 : vector<4x324xf32>
    %c0_14 = arith.constant 0 : index
    %c92 = arith.constant 92 : index
    %22 = vector.load %arg10[%c0_14, %c92] : memref<8x512xf32, #tpu.memory_space<vmem>>, vector<4x324xf32>
    %23 = vector.broadcast %3 : vector<1x324xf32> to vector<4x324xf32>
    %24 = arith.mulf %22, %23 : vector<4x324xf32>
    %25 = arith.addf %21, %24 : vector<4x324xf32>
    %c0_15 = arith.constant 0 : index
    %c128_16 = arith.constant 128 : index
    %26 = vector.load %arg10[%c0_15, %c128_16] : memref<8x512xf32, #tpu.memory_space<vmem>>, vector<4x324xf32>
    tpu.vector_store %arg10[%c0_15, %c128_16], %25 {strides = array<i32>} : memref<8x512xf32, #tpu.memory_space<vmem>>, vector<4x324xf32>,
    %cst_17 = arith.constant 1.000000e+00 : f32
    %27 = vector.broadcast %cst_17 : f32 to vector<1x324xf32>
    %28 = arith.subf %27, %4 : vector<1x324xf32>
    %29 = vector.broadcast %28 : vector<1x324xf32> to vector<4x324xf32>
    %30 = arith.mulf %25, %29 : vector<4x324xf32>
    %c0_18 = arith.constant 0 : index
    %c130 = arith.constant 130 : index
    %31 = vector.load %arg10[%c0_18, %c130] : memref<8x512xf32, #tpu.memory_space<vmem>>, vector<4x324xf32>
    %32 = vector.broadcast %4 : vector<1x324xf32> to vector<4x324xf32>
    %33 = arith.mulf %31, %32 : vector<4x324xf32>
    %34 = arith.addf %30, %33 : vector<4x324xf32>
    %cst_19 = arith.constant 1.000000e+00 : f32
    %35 = vector.broadcast %cst_19 : f32 to vector<1x324xf32>
    %36 = arith.subf %35, %5 : vector<1x324xf32>
    %37 = vector.broadcast %36 : vector<1x324xf32> to vector<4x324xf32>
    %38 = arith.mulf %34, %37 : vector<4x324xf32>
    %c0_20 = arith.constant 0 : index
    %c126 = arith.constant 126 : index
    %39 = vector.load %arg10[%c0_20, %c126] : memref<8x512xf32, #tpu.memory_space<vmem>>, vector<4x324xf32>
    %40 = vector.broadcast %5 : vector<1x324xf32> to vector<4x324xf32>
    %41 = arith.mulf %39, %40 : vector<4x324xf32>
    %42 = arith.addf %38, %41 : vector<4x324xf32>
    %c0_21 = arith.constant 0 : index
    %c128_22 = arith.constant 128 : index
    %43 = vector.load %arg10[%c0_21, %c128_22] : memref<8x512xf32, #tpu.memory_space<vmem>>, vector<4x324xf32>
    tpu.vector_store %arg10[%c0_21, %c128_22], %42 {strides = array<i32>} : memref<8x512xf32, #tpu.memory_space<vmem>>, vector<4x324xf32>,
    %cst_23 = arith.constant 0.000000e+00 : f32
    %44 = vector.broadcast %cst_23 : f32 to vector<4x324xf32>
    %c0_24 = arith.constant 0 : index
    %c0_25 = arith.constant 0 : index
    %45 = vector.load %arg3[%c0_24, %c0_25] : memref<4x1xf32, #tpu.memory_space<vmem>>, vector<4x1xf32>
    %46 = vector.broadcast %45 : vector<4x1xf32> to vector<4x324xf32>
    %47 = arith.addf %44, %46 : vector<4x324xf32>
    %c0_26 = arith.constant 0 : index
    %c0_27 = arith.constant 0 : index
    %48 = vector.load %arg2[%c0_26, %c0_27] : memref<4x36xf32, #tpu.memory_space<vmem>>, vector<4x1xf32>
    %c0_28 = arith.constant 0 : index
    %c109 = arith.constant 109 : index
    %49 = vector.load %arg10[%c0_28, %c109] : memref<8x512xf32, #tpu.memory_space<vmem>>, vector<1x324xf32>
    %50 = vector.broadcast %48 : vector<4x1xf32> to vector<4x324xf32>
    %51 = vector.broadcast %49 : vector<1x324xf32> to vector<4x324xf32>
    %52 = arith.mulf %50, %51 : vector<4x324xf32>
    %53 = arith.addf %47, %52 : vector<4x324xf32>
    %c0_29 = arith.constant 0 : index
    %c1_30 = arith.constant 1 : index
    %54 = vector.load %arg2[%c0_29, %c1_30] : memref<4x36xf32, #tpu.memory_space<vmem>>, vector<4x1xf32>
    %c1_31 = arith.constant 1 : index
    %c109_32 = arith.constant 109 : index
    %55 = vector.load %arg10[%c1_31, %c109_32] : memref<8x512xf32, #tpu.memory_space<vmem>>, vector<1x324xf32>
    %56 = vector.broadcast %54 : vector<4x1xf32> to vector<4x324xf32>
    %57 = vector.broadcast %55 : vector<1x324xf32> to vector<4x324xf32>
    %58 = arith.mulf %56, %57 : vector<4x324xf32>
    %59 = arith.addf %53, %58 : vector<4x324xf32>
    %c0_33 = arith.constant 0 : index
    %c2_34 = arith.constant 2 : index
    %60 = vector.load %arg2[%c0_33, %c2_34] : memref<4x36xf32, #tpu.memory_space<vmem>>, vector<4x1xf32>
    %c2_35 = arith.constant 2 : index
    %c109_36 = arith.constant 109 : index
    %61 = vector.load %arg10[%c2_35, %c109_36] : memref<8x512xf32, #tpu.memory_space<vmem>>, vector<1x324xf32>
    %62 = vector.broadcast %60 : vector<4x1xf32> to vector<4x324xf32>
    %63 = vector.broadcast %61 : vector<1x324xf32> to vector<4x324xf32>
    %64 = arith.mulf %62, %63 : vector<4x324xf32>
    %65 = arith.addf %59, %64 : vector<4x324xf32>
    %c0_37 = arith.constant 0 : index
    %c3_38 = arith.constant 3 : index
    %66 = vector.load %arg2[%c0_37, %c3_38] : memref<4x36xf32, #tpu.memory_space<vmem>>, vector<4x1xf32>
    %c3_39 = arith.constant 3 : index
    %c109_40 = arith.constant 109 : index
    %67 = vector.load %arg10[%c3_39, %c109_40] : memref<8x512xf32, #tpu.memory_space<vmem>>, vector<1x324xf32>
    %68 = vector.broadcast %66 : vector<4x1xf32> to vector<4x324xf32>
    %69 = vector.broadcast %67 : vector<1x324xf32> to vector<4x324xf32>
    %70 = arith.mulf %68, %69 : vector<4x324xf32>
    %71 = arith.addf %65, %70 : vector<4x324xf32>
    %c0_41 = arith.constant 0 : index
    %c4_42 = arith.constant 4 : index
    %72 = vector.load %arg2[%c0_41, %c4_42] : memref<4x36xf32, #tpu.memory_space<vmem>>, vector<4x1xf32>
    %c0_43 = arith.constant 0 : index
    %c110 = arith.constant 110 : index
    %73 = vector.load %arg10[%c0_43, %c110] : memref<8x512xf32, #tpu.memory_space<vmem>>, vector<1x324xf32>
    %74 = vector.broadcast %72 : vector<4x1xf32> to vector<4x324xf32>
    %75 = vector.broadcast %73 : vector<1x324xf32> to vector<4x324xf32>
    %76 = arith.mulf %74, %75 : vector<4x324xf32>
    %77 = arith.addf %71, %76 : vector<4x324xf32>
    %c0_44 = arith.constant 0 : index
    %c5 = arith.constant 5 : index
    %78 = vector.load %arg2[%c0_44, %c5] : memref<4x36xf32, #tpu.memory_space<vmem>>, vector<4x1xf32>
    %c1_45 = arith.constant 1 : index
    %c110_46 = arith.constant 110 : index
    %79 = vector.load %arg10[%c1_45, %c110_46] : memref<8x512xf32, #tpu.memory_space<vmem>>, vector<1x324xf32>
    %80 = vector.broadcast %78 : vector<4x1xf32> to vector<4x324xf32>
    %81 = vector.broadcast %79 : vector<1x324xf32> to vector<4x324xf32>
    %82 = arith.mulf %80, %81 : vector<4x324xf32>
    %83 = arith.addf %77, %82 : vector<4x324xf32>
    %c0_47 = arith.constant 0 : index
    %c6 = arith.constant 6 : index
    %84 = vector.load %arg2[%c0_47, %c6] : memref<4x36xf32, #tpu.memory_space<vmem>>, vector<4x1xf32>
    %c2_48 = arith.constant 2 : index
    %c110_49 = arith.constant 110 : index
    %85 = vector.load %arg10[%c2_48, %c110_49] : memref<8x512xf32, #tpu.memory_space<vmem>>, vector<1x324xf32>
    %86 = vector.broadcast %84 : vector<4x1xf32> to vector<4x324xf32>
    %87 = vector.broadcast %85 : vector<1x324xf32> to vector<4x324xf32>
    %88 = arith.mulf %86, %87 : vector<4x324xf32>
    %89 = arith.addf %83, %88 : vector<4x324xf32>
    %c0_50 = arith.constant 0 : index
    %c7 = arith.constant 7 : index
    %90 = vector.load %arg2[%c0_50, %c7] : memref<4x36xf32, #tpu.memory_space<vmem>>, vector<4x1xf32>
    %c3_51 = arith.constant 3 : index
    %c110_52 = arith.constant 110 : index
    %91 = vector.load %arg10[%c3_51, %c110_52] : memref<8x512xf32, #tpu.memory_space<vmem>>, vector<1x324xf32>
    %92 = vector.broadcast %90 : vector<4x1xf32> to vector<4x324xf32>
    %93 = vector.broadcast %91 : vector<1x324xf32> to vector<4x324xf32>
    %94 = arith.mulf %92, %93 : vector<4x324xf32>
    %95 = arith.addf %89, %94 : vector<4x324xf32>
    %c0_53 = arith.constant 0 : index
    %c8 = arith.constant 8 : index
    %96 = vector.load %arg2[%c0_53, %c8] : memref<4x36xf32, #tpu.memory_space<vmem>>, vector<4x1xf32>
    %c0_54 = arith.constant 0 : index
    %c111 = arith.constant 111 : index
    %97 = vector.load %arg10[%c0_54, %c111] : memref<8x512xf32, #tpu.memory_space<vmem>>, vector<1x324xf32>
    %98 = vector.broadcast %96 : vector<4x1xf32> to vector<4x324xf32>
    %99 = vector.broadcast %97 : vector<1x324xf32> to vector<4x324xf32>
    %100 = arith.mulf %98, %99 : vector<4x324xf32>
    %101 = arith.addf %95, %100 : vector<4x324xf32>
    %c0_55 = arith.constant 0 : index
    %c9 = arith.constant 9 : index
    %102 = vector.load %arg2[%c0_55, %c9] : memref<4x36xf32, #tpu.memory_space<vmem>>, vector<4x1xf32>
    %c1_56 = arith.constant 1 : index
    %c111_57 = arith.constant 111 : index
    %103 = vector.load %arg10[%c1_56, %c111_57] : memref<8x512xf32, #tpu.memory_space<vmem>>, vector<1x324xf32>
    %104 = vector.broadcast %102 : vector<4x1xf32> to vector<4x324xf32>
    %105 = vector.broadcast %103 : vector<1x324xf32> to vector<4x324xf32>
    %106 = arith.mulf %104, %105 : vector<4x324xf32>
    %107 = arith.addf %101, %106 : vector<4x324xf32>
    %c0_58 = arith.constant 0 : index
    %c10 = arith.constant 10 : index
    %108 = vector.load %arg2[%c0_58, %c10] : memref<4x36xf32, #tpu.memory_space<vmem>>, vector<4x1xf32>
    %c2_59 = arith.constant 2 : index
    %c111_60 = arith.constant 111 : index
    %109 = vector.load %arg10[%c2_59, %c111_60] : memref<8x512xf32, #tpu.memory_space<vmem>>, vector<1x324xf32>
    %110 = vector.broadcast %108 : vector<4x1xf32> to vector<4x324xf32>
    %111 = vector.broadcast %109 : vector<1x324xf32> to vector<4x324xf32>
    %112 = arith.mulf %110, %111 : vector<4x324xf32>
    %113 = arith.addf %107, %112 : vector<4x324xf32>
    %c0_61 = arith.constant 0 : index
    %c11 = arith.constant 11 : index
    %114 = vector.load %arg2[%c0_61, %c11] : memref<4x36xf32, #tpu.memory_space<vmem>>, vector<4x1xf32>
    %c3_62 = arith.constant 3 : index
    %c111_63 = arith.constant 111 : index
    %115 = vector.load %arg10[%c3_62, %c111_63] : memref<8x512xf32, #tpu.memory_space<vmem>>, vector<1x324xf32>
    %116 = vector.broadcast %114 : vector<4x1xf32> to vector<4x324xf32>
    %117 = vector.broadcast %115 : vector<1x324xf32> to vector<4x324xf32>
    %118 = arith.mulf %116, %117 : vector<4x324xf32>
    %119 = arith.addf %113, %118 : vector<4x324xf32>
    %c0_64 = arith.constant 0 : index
    %c12 = arith.constant 12 : index
    %120 = vector.load %arg2[%c0_64, %c12] : memref<4x36xf32, #tpu.memory_space<vmem>>, vector<4x1xf32>
    %c0_65 = arith.constant 0 : index
    %c127 = arith.constant 127 : index
    %121 = vector.load %arg10[%c0_65, %c127] : memref<8x512xf32, #tpu.memory_space<vmem>>, vector<1x324xf32>
    %122 = vector.broadcast %120 : vector<4x1xf32> to vector<4x324xf32>
    %123 = vector.broadcast %121 : vector<1x324xf32> to vector<4x324xf32>
    %124 = arith.mulf %122, %123 : vector<4x324xf32>
    %125 = arith.addf %119, %124 : vector<4x324xf32>
    %c0_66 = arith.constant 0 : index
    %c13 = arith.constant 13 : index
    %126 = vector.load %arg2[%c0_66, %c13] : memref<4x36xf32, #tpu.memory_space<vmem>>, vector<4x1xf32>
    %c1_67 = arith.constant 1 : index
    %c127_68 = arith.constant 127 : index
    %127 = vector.load %arg10[%c1_67, %c127_68] : memref<8x512xf32, #tpu.memory_space<vmem>>, vector<1x324xf32>
    %128 = vector.broadcast %126 : vector<4x1xf32> to vector<4x324xf32>
    %129 = vector.broadcast %127 : vector<1x324xf32> to vector<4x324xf32>
    %130 = arith.mulf %128, %129 : vector<4x324xf32>
    %131 = arith.addf %125, %130 : vector<4x324xf32>
    %c0_69 = arith.constant 0 : index
    %c14 = arith.constant 14 : index
    %132 = vector.load %arg2[%c0_69, %c14] : memref<4x36xf32, #tpu.memory_space<vmem>>, vector<4x1xf32>
    %c2_70 = arith.constant 2 : index
    %c127_71 = arith.constant 127 : index
    %133 = vector.load %arg10[%c2_70, %c127_71] : memref<8x512xf32, #tpu.memory_space<vmem>>, vector<1x324xf32>
    %134 = vector.broadcast %132 : vector<4x1xf32> to vector<4x324xf32>
    %135 = vector.broadcast %133 : vector<1x324xf32> to vector<4x324xf32>
    %136 = arith.mulf %134, %135 : vector<4x324xf32>
    %137 = arith.addf %131, %136 : vector<4x324xf32>
    %c0_72 = arith.constant 0 : index
    %c15 = arith.constant 15 : index
    %138 = vector.load %arg2[%c0_72, %c15] : memref<4x36xf32, #tpu.memory_space<vmem>>, vector<4x1xf32>
    %c3_73 = arith.constant 3 : index
    %c127_74 = arith.constant 127 : index
    %139 = vector.load %arg10[%c3_73, %c127_74] : memref<8x512xf32, #tpu.memory_space<vmem>>, vector<1x324xf32>
    %140 = vector.broadcast %138 : vector<4x1xf32> to vector<4x324xf32>
    %141 = vector.broadcast %139 : vector<1x324xf32> to vector<4x324xf32>
    %142 = arith.mulf %140, %141 : vector<4x324xf32>
    %143 = arith.addf %137, %142 : vector<4x324xf32>
    %c0_75 = arith.constant 0 : index
    %c16 = arith.constant 16 : index
    %144 = vector.load %arg2[%c0_75, %c16] : memref<4x36xf32, #tpu.memory_space<vmem>>, vector<4x1xf32>
    %c0_76 = arith.constant 0 : index
    %c128_77 = arith.constant 128 : index
    %145 = vector.load %arg10[%c0_76, %c128_77] : memref<8x512xf32, #tpu.memory_space<vmem>>, vector<1x324xf32>
    %146 = vector.broadcast %144 : vector<4x1xf32> to vector<4x324xf32>
    %147 = vector.broadcast %145 : vector<1x324xf32> to vector<4x324xf32>
    %148 = arith.mulf %146, %147 : vector<4x324xf32>
    %149 = arith.addf %143, %148 : vector<4x324xf32>
    %c0_78 = arith.constant 0 : index
    %c17 = arith.constant 17 : index
    %150 = vector.load %arg2[%c0_78, %c17] : memref<4x36xf32, #tpu.memory_space<vmem>>, vector<4x1xf32>
    %c1_79 = arith.constant 1 : index
    %c128_80 = arith.constant 128 : index
    %151 = vector.load %arg10[%c1_79, %c128_80] : memref<8x512xf32, #tpu.memory_space<vmem>>, vector<1x324xf32>
    %152 = vector.broadcast %150 : vector<4x1xf32> to vector<4x324xf32>
    %153 = vector.broadcast %151 : vector<1x324xf32> to vector<4x324xf32>
    %154 = arith.mulf %152, %153 : vector<4x324xf32>
    %155 = arith.addf %149, %154 : vector<4x324xf32>
    %c0_81 = arith.constant 0 : index
    %c18 = arith.constant 18 : index
    %156 = vector.load %arg2[%c0_81, %c18] : memref<4x36xf32, #tpu.memory_space<vmem>>, vector<4x1xf32>
    %c2_82 = arith.constant 2 : index
    %c128_83 = arith.constant 128 : index
    %157 = vector.load %arg10[%c2_82, %c128_83] : memref<8x512xf32, #tpu.memory_space<vmem>>, vector<1x324xf32>
    %158 = vector.broadcast %156 : vector<4x1xf32> to vector<4x324xf32>
    %159 = vector.broadcast %157 : vector<1x324xf32> to vector<4x324xf32>
    %160 = arith.mulf %158, %159 : vector<4x324xf32>
    %161 = arith.addf %155, %160 : vector<4x324xf32>
    %c0_84 = arith.constant 0 : index
    %c19 = arith.constant 19 : index
    %162 = vector.load %arg2[%c0_84, %c19] : memref<4x36xf32, #tpu.memory_space<vmem>>, vector<4x1xf32>
    %c3_85 = arith.constant 3 : index
    %c128_86 = arith.constant 128 : index
    %163 = vector.load %arg10[%c3_85, %c128_86] : memref<8x512xf32, #tpu.memory_space<vmem>>, vector<1x324xf32>
    %164 = vector.broadcast %162 : vector<4x1xf32> to vector<4x324xf32>
    %165 = vector.broadcast %163 : vector<1x324xf32> to vector<4x324xf32>
    %166 = arith.mulf %164, %165 : vector<4x324xf32>
    %167 = arith.addf %161, %166 : vector<4x324xf32>
    %c0_87 = arith.constant 0 : index
    %c20 = arith.constant 20 : index
    %168 = vector.load %arg2[%c0_87, %c20] : memref<4x36xf32, #tpu.memory_space<vmem>>, vector<4x1xf32>
    %c0_88 = arith.constant 0 : index
    %c129 = arith.constant 129 : index
    %169 = vector.load %arg10[%c0_88, %c129] : memref<8x512xf32, #tpu.memory_space<vmem>>, vector<1x324xf32>
    %170 = vector.broadcast %168 : vector<4x1xf32> to vector<4x324xf32>
    %171 = vector.broadcast %169 : vector<1x324xf32> to vector<4x324xf32>
    %172 = arith.mulf %170, %171 : vector<4x324xf32>
    %173 = arith.addf %167, %172 : vector<4x324xf32>
    %c0_89 = arith.constant 0 : index
    %c21 = arith.constant 21 : index
    %174 = vector.load %arg2[%c0_89, %c21] : memref<4x36xf32, #tpu.memory_space<vmem>>, vector<4x1xf32>
    %c1_90 = arith.constant 1 : index
    %c129_91 = arith.constant 129 : index
    %175 = vector.load %arg10[%c1_90, %c129_91] : memref<8x512xf32, #tpu.memory_space<vmem>>, vector<1x324xf32>
    %176 = vector.broadcast %174 : vector<4x1xf32> to vector<4x324xf32>
    %177 = vector.broadcast %175 : vector<1x324xf32> to vector<4x324xf32>
    %178 = arith.mulf %176, %177 : vector<4x324xf32>
    %179 = arith.addf %173, %178 : vector<4x324xf32>
    %c0_92 = arith.constant 0 : index
    %c22 = arith.constant 22 : index
    %180 = vector.load %arg2[%c0_92, %c22] : memref<4x36xf32, #tpu.memory_space<vmem>>, vector<4x1xf32>
    %c2_93 = arith.constant 2 : index
    %c129_94 = arith.constant 129 : index
    %181 = vector.load %arg10[%c2_93, %c129_94] : memref<8x512xf32, #tpu.memory_space<vmem>>, vector<1x324xf32>
    %182 = vector.broadcast %180 : vector<4x1xf32> to vector<4x324xf32>
    %183 = vector.broadcast %181 : vector<1x324xf32> to vector<4x324xf32>
    %184 = arith.mulf %182, %183 : vector<4x324xf32>
    %185 = arith.addf %179, %184 : vector<4x324xf32>
    %c0_95 = arith.constant 0 : index
    %c23 = arith.constant 23 : index
    %186 = vector.load %arg2[%c0_95, %c23] : memref<4x36xf32, #tpu.memory_space<vmem>>, vector<4x1xf32>
    %c3_96 = arith.constant 3 : index
    %c129_97 = arith.constant 129 : index
    %187 = vector.load %arg10[%c3_96, %c129_97] : memref<8x512xf32, #tpu.memory_space<vmem>>, vector<1x324xf32>
    %188 = vector.broadcast %186 : vector<4x1xf32> to vector<4x324xf32>
    %189 = vector.broadcast %187 : vector<1x324xf32> to vector<4x324xf32>
    %190 = arith.mulf %188, %189 : vector<4x324xf32>
    %191 = arith.addf %185, %190 : vector<4x324xf32>
    %c0_98 = arith.constant 0 : index
    %c24 = arith.constant 24 : index
    %192 = vector.load %arg2[%c0_98, %c24] : memref<4x36xf32, #tpu.memory_space<vmem>>, vector<4x1xf32>
    %c0_99 = arith.constant 0 : index
    %c145 = arith.constant 145 : index
    %193 = vector.load %arg10[%c0_99, %c145] : memref<8x512xf32, #tpu.memory_space<vmem>>, vector<1x324xf32>
    %194 = vector.broadcast %192 : vector<4x1xf32> to vector<4x324xf32>
    %195 = vector.broadcast %193 : vector<1x324xf32> to vector<4x324xf32>
    %196 = arith.mulf %194, %195 : vector<4x324xf32>
    %197 = arith.addf %191, %196 : vector<4x324xf32>
    %c0_100 = arith.constant 0 : index
    %c25 = arith.constant 25 : index
    %198 = vector.load %arg2[%c0_100, %c25] : memref<4x36xf32, #tpu.memory_space<vmem>>, vector<4x1xf32>
    %c1_101 = arith.constant 1 : index
    %c145_102 = arith.constant 145 : index
    %199 = vector.load %arg10[%c1_101, %c145_102] : memref<8x512xf32, #tpu.memory_space<vmem>>, vector<1x324xf32>
    %200 = vector.broadcast %198 : vector<4x1xf32> to vector<4x324xf32>
    %201 = vector.broadcast %199 : vector<1x324xf32> to vector<4x324xf32>
    %202 = arith.mulf %200, %201 : vector<4x324xf32>
    %203 = arith.addf %197, %202 : vector<4x324xf32>
    %c0_103 = arith.constant 0 : index
    %c26 = arith.constant 26 : index
    %204 = vector.load %arg2[%c0_103, %c26] : memref<4x36xf32, #tpu.memory_space<vmem>>, vector<4x1xf32>
    %c2_104 = arith.constant 2 : index
    %c145_105 = arith.constant 145 : index
    %205 = vector.load %arg10[%c2_104, %c145_105] : memref<8x512xf32, #tpu.memory_space<vmem>>, vector<1x324xf32>
    %206 = vector.broadcast %204 : vector<4x1xf32> to vector<4x324xf32>
    %207 = vector.broadcast %205 : vector<1x324xf32> to vector<4x324xf32>
    %208 = arith.mulf %206, %207 : vector<4x324xf32>
    %209 = arith.addf %203, %208 : vector<4x324xf32>
    %c0_106 = arith.constant 0 : index
    %c27 = arith.constant 27 : index
    %210 = vector.load %arg2[%c0_106, %c27] : memref<4x36xf32, #tpu.memory_space<vmem>>, vector<4x1xf32>
    %c3_107 = arith.constant 3 : index
    %c145_108 = arith.constant 145 : index
    %211 = vector.load %arg10[%c3_107, %c145_108] : memref<8x512xf32, #tpu.memory_space<vmem>>, vector<1x324xf32>
    %212 = vector.broadcast %210 : vector<4x1xf32> to vector<4x324xf32>
    %213 = vector.broadcast %211 : vector<1x324xf32> to vector<4x324xf32>
    %214 = arith.mulf %212, %213 : vector<4x324xf32>
    %215 = arith.addf %209, %214 : vector<4x324xf32>
    %c0_109 = arith.constant 0 : index
    %c28 = arith.constant 28 : index
    %216 = vector.load %arg2[%c0_109, %c28] : memref<4x36xf32, #tpu.memory_space<vmem>>, vector<4x1xf32>
    %c0_110 = arith.constant 0 : index
    %c146 = arith.constant 146 : index
    %217 = vector.load %arg10[%c0_110, %c146] : memref<8x512xf32, #tpu.memory_space<vmem>>, vector<1x324xf32>
    %218 = vector.broadcast %216 : vector<4x1xf32> to vector<4x324xf32>
    %219 = vector.broadcast %217 : vector<1x324xf32> to vector<4x324xf32>
    %220 = arith.mulf %218, %219 : vector<4x324xf32>
    %221 = arith.addf %215, %220 : vector<4x324xf32>
    %c0_111 = arith.constant 0 : index
    %c29 = arith.constant 29 : index
    %222 = vector.load %arg2[%c0_111, %c29] : memref<4x36xf32, #tpu.memory_space<vmem>>, vector<4x1xf32>
    %c1_112 = arith.constant 1 : index
    %c146_113 = arith.constant 146 : index
    %223 = vector.load %arg10[%c1_112, %c146_113] : memref<8x512xf32, #tpu.memory_space<vmem>>, vector<1x324xf32>
    %224 = vector.broadcast %222 : vector<4x1xf32> to vector<4x324xf32>
    %225 = vector.broadcast %223 : vector<1x324xf32> to vector<4x324xf32>
    %226 = arith.mulf %224, %225 : vector<4x324xf32>
    %227 = arith.addf %221, %226 : vector<4x324xf32>
    %c0_114 = arith.constant 0 : index
    %c30 = arith.constant 30 : index
    %228 = vector.load %arg2[%c0_114, %c30] : memref<4x36xf32, #tpu.memory_space<vmem>>, vector<4x1xf32>
    %c2_115 = arith.constant 2 : index
    %c146_116 = arith.constant 146 : index
    %229 = vector.load %arg10[%c2_115, %c146_116] : memref<8x512xf32, #tpu.memory_space<vmem>>, vector<1x324xf32>
    %230 = vector.broadcast %228 : vector<4x1xf32> to vector<4x324xf32>
    %231 = vector.broadcast %229 : vector<1x324xf32> to vector<4x324xf32>
    %232 = arith.mulf %230, %231 : vector<4x324xf32>
    %233 = arith.addf %227, %232 : vector<4x324xf32>
    %c0_117 = arith.constant 0 : index
    %c31 = arith.constant 31 : index
    %234 = vector.load %arg2[%c0_117, %c31] : memref<4x36xf32, #tpu.memory_space<vmem>>, vector<4x1xf32>
    %c3_118 = arith.constant 3 : index
    %c146_119 = arith.constant 146 : index
    %235 = vector.load %arg10[%c3_118, %c146_119] : memref<8x512xf32, #tpu.memory_space<vmem>>, vector<1x324xf32>
    %236 = vector.broadcast %234 : vector<4x1xf32> to vector<4x324xf32>
    %237 = vector.broadcast %235 : vector<1x324xf32> to vector<4x324xf32>
    %238 = arith.mulf %236, %237 : vector<4x324xf32>
    %239 = arith.addf %233, %238 : vector<4x324xf32>
    %c0_120 = arith.constant 0 : index
    %c32 = arith.constant 32 : index
    %240 = vector.load %arg2[%c0_120, %c32] : memref<4x36xf32, #tpu.memory_space<vmem>>, vector<4x1xf32>
    %c0_121 = arith.constant 0 : index
    %c147 = arith.constant 147 : index
    %241 = vector.load %arg10[%c0_121, %c147] : memref<8x512xf32, #tpu.memory_space<vmem>>, vector<1x324xf32>
    %242 = vector.broadcast %240 : vector<4x1xf32> to vector<4x324xf32>
    %243 = vector.broadcast %241 : vector<1x324xf32> to vector<4x324xf32>
    %244 = arith.mulf %242, %243 : vector<4x324xf32>
    %245 = arith.addf %239, %244 : vector<4x324xf32>
    %c0_122 = arith.constant 0 : index
    %c33 = arith.constant 33 : index
    %246 = vector.load %arg2[%c0_122, %c33] : memref<4x36xf32, #tpu.memory_space<vmem>>, vector<4x1xf32>
    %c1_123 = arith.constant 1 : index
    %c147_124 = arith.constant 147 : index
    %247 = vector.load %arg10[%c1_123, %c147_124] : memref<8x512xf32, #tpu.memory_space<vmem>>, vector<1x324xf32>
    %248 = vector.broadcast %246 : vector<4x1xf32> to vector<4x324xf32>
    %249 = vector.broadcast %247 : vector<1x324xf32> to vector<4x324xf32>
    %250 = arith.mulf %248, %249 : vector<4x324xf32>
    %251 = arith.addf %245, %250 : vector<4x324xf32>
    %c0_125 = arith.constant 0 : index
    %c34 = arith.constant 34 : index
    %252 = vector.load %arg2[%c0_125, %c34] : memref<4x36xf32, #tpu.memory_space<vmem>>, vector<4x1xf32>
    %c2_126 = arith.constant 2 : index
    %c147_127 = arith.constant 147 : index
    %253 = vector.load %arg10[%c2_126, %c147_127] : memref<8x512xf32, #tpu.memory_space<vmem>>, vector<1x324xf32>
    %254 = vector.broadcast %252 : vector<4x1xf32> to vector<4x324xf32>
    %255 = vector.broadcast %253 : vector<1x324xf32> to vector<4x324xf32>
    %256 = arith.mulf %254, %255 : vector<4x324xf32>
    %257 = arith.addf %251, %256 : vector<4x324xf32>
    %c0_128 = arith.constant 0 : index
    %c35 = arith.constant 35 : index
    %258 = vector.load %arg2[%c0_128, %c35] : memref<4x36xf32, #tpu.memory_space<vmem>>, vector<4x1xf32>
    %c3_129 = arith.constant 3 : index
    %c147_130 = arith.constant 147 : index
    %259 = vector.load %arg10[%c3_129, %c147_130] : memref<8x512xf32, #tpu.memory_space<vmem>>, vector<1x324xf32>
    %260 = vector.broadcast %258 : vector<4x1xf32> to vector<4x324xf32>
    %261 = vector.broadcast %259 : vector<1x324xf32> to vector<4x324xf32>
    %262 = arith.mulf %260, %261 : vector<4x324xf32>
    %263 = arith.addf %257, %262 : vector<4x324xf32>
    %cst_131 = arith.constant 0.000000e+00 : f32
    %264 = vector.broadcast %cst_131 : f32 to vector<4x324xf32>
    %265 = arith.maximumf %263, %264 : vector<4x324xf32>
    %266 = vector.broadcast %6 : vector<1x324xf32> to vector<4x324xf32>
    %267 = arith.mulf %265, %266 : vector<4x324xf32>
    %c0_132 = arith.constant 0 : index
    %c128_133 = arith.constant 128 : index
    %268 = vector.load %arg10[%c0_132, %c128_133] : memref<8x512xf32, #tpu.memory_space<vmem>>, vector<4x324xf32>
    tpu.vector_store %arg10[%c0_132, %c128_133], %267 {strides = array<i32>} : memref<8x512xf32, #tpu.memory_space<vmem>>, vector<4x324xf32>,
    %cst_134 = arith.constant 0.000000e+00 : f32
    %269 = vector.broadcast %cst_134 : f32 to vector<4x324xf32>
    %c0_135 = arith.constant 0 : index
    %c0_136 = arith.constant 0 : index
    %270 = vector.load %arg5[%c0_135, %c0_136] : memref<4x1xf32, #tpu.memory_space<vmem>>, vector<4x1xf32>
    %271 = vector.broadcast %270 : vector<4x1xf32> to vector<4x324xf32>
    %272 = arith.addf %269, %271 : vector<4x324xf32>
    %c0_137 = arith.constant 0 : index
    %c0_138 = arith.constant 0 : index
    %273 = vector.load %arg4[%c0_137, %c0_138] : memref<4x36xf32, #tpu.memory_space<vmem>>, vector<4x1xf32>
    %c0_139 = arith.constant 0 : index
    %c109_140 = arith.constant 109 : index
    %274 = vector.load %arg10[%c0_139, %c109_140] : memref<8x512xf32, #tpu.memory_space<vmem>>, vector<1x324xf32>
    %275 = vector.broadcast %273 : vector<4x1xf32> to vector<4x324xf32>
    %276 = vector.broadcast %274 : vector<1x324xf32> to vector<4x324xf32>
    %277 = arith.mulf %275, %276 : vector<4x324xf32>
    %278 = arith.addf %272, %277 : vector<4x324xf32>
    %c0_141 = arith.constant 0 : index
    %c1_142 = arith.constant 1 : index
    %279 = vector.load %arg4[%c0_141, %c1_142] : memref<4x36xf32, #tpu.memory_space<vmem>>, vector<4x1xf32>
    %c1_143 = arith.constant 1 : index
    %c109_144 = arith.constant 109 : index
    %280 = vector.load %arg10[%c1_143, %c109_144] : memref<8x512xf32, #tpu.memory_space<vmem>>, vector<1x324xf32>
    %281 = vector.broadcast %279 : vector<4x1xf32> to vector<4x324xf32>
    %282 = vector.broadcast %280 : vector<1x324xf32> to vector<4x324xf32>
    %283 = arith.mulf %281, %282 : vector<4x324xf32>
    %284 = arith.addf %278, %283 : vector<4x324xf32>
    %c0_145 = arith.constant 0 : index
    %c2_146 = arith.constant 2 : index
    %285 = vector.load %arg4[%c0_145, %c2_146] : memref<4x36xf32, #tpu.memory_space<vmem>>, vector<4x1xf32>
    %c2_147 = arith.constant 2 : index
    %c109_148 = arith.constant 109 : index
    %286 = vector.load %arg10[%c2_147, %c109_148] : memref<8x512xf32, #tpu.memory_space<vmem>>, vector<1x324xf32>
    %287 = vector.broadcast %285 : vector<4x1xf32> to vector<4x324xf32>
    %288 = vector.broadcast %286 : vector<1x324xf32> to vector<4x324xf32>
    %289 = arith.mulf %287, %288 : vector<4x324xf32>
    %290 = arith.addf %284, %289 : vector<4x324xf32>
    %c0_149 = arith.constant 0 : index
    %c3_150 = arith.constant 3 : index
    %291 = vector.load %arg4[%c0_149, %c3_150] : memref<4x36xf32, #tpu.memory_space<vmem>>, vector<4x1xf32>
    %c3_151 = arith.constant 3 : index
    %c109_152 = arith.constant 109 : index
    %292 = vector.load %arg10[%c3_151, %c109_152] : memref<8x512xf32, #tpu.memory_space<vmem>>, vector<1x324xf32>
    %293 = vector.broadcast %291 : vector<4x1xf32> to vector<4x324xf32>
    %294 = vector.broadcast %292 : vector<1x324xf32> to vector<4x324xf32>
    %295 = arith.mulf %293, %294 : vector<4x324xf32>
    %296 = arith.addf %290, %295 : vector<4x324xf32>
    %c0_153 = arith.constant 0 : index
    %c4_154 = arith.constant 4 : index
    %297 = vector.load %arg4[%c0_153, %c4_154] : memref<4x36xf32, #tpu.memory_space<vmem>>, vector<4x1xf32>
    %c0_155 = arith.constant 0 : index
    %c110_156 = arith.constant 110 : index
    %298 = vector.load %arg10[%c0_155, %c110_156] : memref<8x512xf32, #tpu.memory_space<vmem>>, vector<1x324xf32>
    %299 = vector.broadcast %297 : vector<4x1xf32> to vector<4x324xf32>
    %300 = vector.broadcast %298 : vector<1x324xf32> to vector<4x324xf32>
    %301 = arith.mulf %299, %300 : vector<4x324xf32>
    %302 = arith.addf %296, %301 : vector<4x324xf32>
    %c0_157 = arith.constant 0 : index
    %c5_158 = arith.constant 5 : index
    %303 = vector.load %arg4[%c0_157, %c5_158] : memref<4x36xf32, #tpu.memory_space<vmem>>, vector<4x1xf32>
    %c1_159 = arith.constant 1 : index
    %c110_160 = arith.constant 110 : index
    %304 = vector.load %arg10[%c1_159, %c110_160] : memref<8x512xf32, #tpu.memory_space<vmem>>, vector<1x324xf32>
    %305 = vector.broadcast %303 : vector<4x1xf32> to vector<4x324xf32>
    %306 = vector.broadcast %304 : vector<1x324xf32> to vector<4x324xf32>
    %307 = arith.mulf %305, %306 : vector<4x324xf32>
    %308 = arith.addf %302, %307 : vector<4x324xf32>
    %c0_161 = arith.constant 0 : index
    %c6_162 = arith.constant 6 : index
    %309 = vector.load %arg4[%c0_161, %c6_162] : memref<4x36xf32, #tpu.memory_space<vmem>>, vector<4x1xf32>
    %c2_163 = arith.constant 2 : index
    %c110_164 = arith.constant 110 : index
    %310 = vector.load %arg10[%c2_163, %c110_164] : memref<8x512xf32, #tpu.memory_space<vmem>>, vector<1x324xf32>
    %311 = vector.broadcast %309 : vector<4x1xf32> to vector<4x324xf32>
    %312 = vector.broadcast %310 : vector<1x324xf32> to vector<4x324xf32>
    %313 = arith.mulf %311, %312 : vector<4x324xf32>
    %314 = arith.addf %308, %313 : vector<4x324xf32>
    %c0_165 = arith.constant 0 : index
    %c7_166 = arith.constant 7 : index
    %315 = vector.load %arg4[%c0_165, %c7_166] : memref<4x36xf32, #tpu.memory_space<vmem>>, vector<4x1xf32>
    %c3_167 = arith.constant 3 : index
    %c110_168 = arith.constant 110 : index
    %316 = vector.load %arg10[%c3_167, %c110_168] : memref<8x512xf32, #tpu.memory_space<vmem>>, vector<1x324xf32>
    %317 = vector.broadcast %315 : vector<4x1xf32> to vector<4x324xf32>
    %318 = vector.broadcast %316 : vector<1x324xf32> to vector<4x324xf32>
    %319 = arith.mulf %317, %318 : vector<4x324xf32>
    %320 = arith.addf %314, %319 : vector<4x324xf32>
    %c0_169 = arith.constant 0 : index
    %c8_170 = arith.constant 8 : index
    %321 = vector.load %arg4[%c0_169, %c8_170] : memref<4x36xf32, #tpu.memory_space<vmem>>, vector<4x1xf32>
    %c0_171 = arith.constant 0 : index
    %c111_172 = arith.constant 111 : index
    %322 = vector.load %arg10[%c0_171, %c111_172] : memref<8x512xf32, #tpu.memory_space<vmem>>, vector<1x324xf32>
    %323 = vector.broadcast %321 : vector<4x1xf32> to vector<4x324xf32>
    %324 = vector.broadcast %322 : vector<1x324xf32> to vector<4x324xf32>
    %325 = arith.mulf %323, %324 : vector<4x324xf32>
    %326 = arith.addf %320, %325 : vector<4x324xf32>
    %c0_173 = arith.constant 0 : index
    %c9_174 = arith.constant 9 : index
    %327 = vector.load %arg4[%c0_173, %c9_174] : memref<4x36xf32, #tpu.memory_space<vmem>>, vector<4x1xf32>
    %c1_175 = arith.constant 1 : index
    %c111_176 = arith.constant 111 : index
    %328 = vector.load %arg10[%c1_175, %c111_176] : memref<8x512xf32, #tpu.memory_space<vmem>>, vector<1x324xf32>
    %329 = vector.broadcast %327 : vector<4x1xf32> to vector<4x324xf32>
    %330 = vector.broadcast %328 : vector<1x324xf32> to vector<4x324xf32>
    %331 = arith.mulf %329, %330 : vector<4x324xf32>
    %332 = arith.addf %326, %331 : vector<4x324xf32>
    %c0_177 = arith.constant 0 : index
    %c10_178 = arith.constant 10 : index
    %333 = vector.load %arg4[%c0_177, %c10_178] : memref<4x36xf32, #tpu.memory_space<vmem>>, vector<4x1xf32>
    %c2_179 = arith.constant 2 : index
    %c111_180 = arith.constant 111 : index
    %334 = vector.load %arg10[%c2_179, %c111_180] : memref<8x512xf32, #tpu.memory_space<vmem>>, vector<1x324xf32>
    %335 = vector.broadcast %333 : vector<4x1xf32> to vector<4x324xf32>
    %336 = vector.broadcast %334 : vector<1x324xf32> to vector<4x324xf32>
    %337 = arith.mulf %335, %336 : vector<4x324xf32>
    %338 = arith.addf %332, %337 : vector<4x324xf32>
    %c0_181 = arith.constant 0 : index
    %c11_182 = arith.constant 11 : index
    %339 = vector.load %arg4[%c0_181, %c11_182] : memref<4x36xf32, #tpu.memory_space<vmem>>, vector<4x1xf32>
    %c3_183 = arith.constant 3 : index
    %c111_184 = arith.constant 111 : index
    %340 = vector.load %arg10[%c3_183, %c111_184] : memref<8x512xf32, #tpu.memory_space<vmem>>, vector<1x324xf32>
    %341 = vector.broadcast %339 : vector<4x1xf32> to vector<4x324xf32>
    %342 = vector.broadcast %340 : vector<1x324xf32> to vector<4x324xf32>
    %343 = arith.mulf %341, %342 : vector<4x324xf32>
    %344 = arith.addf %338, %343 : vector<4x324xf32>
    %c0_185 = arith.constant 0 : index
    %c12_186 = arith.constant 12 : index
    %345 = vector.load %arg4[%c0_185, %c12_186] : memref<4x36xf32, #tpu.memory_space<vmem>>, vector<4x1xf32>
    %c0_187 = arith.constant 0 : index
    %c127_188 = arith.constant 127 : index
    %346 = vector.load %arg10[%c0_187, %c127_188] : memref<8x512xf32, #tpu.memory_space<vmem>>, vector<1x324xf32>
    %347 = vector.broadcast %345 : vector<4x1xf32> to vector<4x324xf32>
    %348 = vector.broadcast %346 : vector<1x324xf32> to vector<4x324xf32>
    %349 = arith.mulf %347, %348 : vector<4x324xf32>
    %350 = arith.addf %344, %349 : vector<4x324xf32>
    %c0_189 = arith.constant 0 : index
    %c13_190 = arith.constant 13 : index
    %351 = vector.load %arg4[%c0_189, %c13_190] : memref<4x36xf32, #tpu.memory_space<vmem>>, vector<4x1xf32>
    %c1_191 = arith.constant 1 : index
    %c127_192 = arith.constant 127 : index
    %352 = vector.load %arg10[%c1_191, %c127_192] : memref<8x512xf32, #tpu.memory_space<vmem>>, vector<1x324xf32>
    %353 = vector.broadcast %351 : vector<4x1xf32> to vector<4x324xf32>
    %354 = vector.broadcast %352 : vector<1x324xf32> to vector<4x324xf32>
    %355 = arith.mulf %353, %354 : vector<4x324xf32>
    %356 = arith.addf %350, %355 : vector<4x324xf32>
    %c0_193 = arith.constant 0 : index
    %c14_194 = arith.constant 14 : index
    %357 = vector.load %arg4[%c0_193, %c14_194] : memref<4x36xf32, #tpu.memory_space<vmem>>, vector<4x1xf32>
    %c2_195 = arith.constant 2 : index
    %c127_196 = arith.constant 127 : index
    %358 = vector.load %arg10[%c2_195, %c127_196] : memref<8x512xf32, #tpu.memory_space<vmem>>, vector<1x324xf32>
    %359 = vector.broadcast %357 : vector<4x1xf32> to vector<4x324xf32>
    %360 = vector.broadcast %358 : vector<1x324xf32> to vector<4x324xf32>
    %361 = arith.mulf %359, %360 : vector<4x324xf32>
    %362 = arith.addf %356, %361 : vector<4x324xf32>
    %c0_197 = arith.constant 0 : index
    %c15_198 = arith.constant 15 : index
    %363 = vector.load %arg4[%c0_197, %c15_198] : memref<4x36xf32, #tpu.memory_space<vmem>>, vector<4x1xf32>
    %c3_199 = arith.constant 3 : index
    %c127_200 = arith.constant 127 : index
    %364 = vector.load %arg10[%c3_199, %c127_200] : memref<8x512xf32, #tpu.memory_space<vmem>>, vector<1x324xf32>
    %365 = vector.broadcast %363 : vector<4x1xf32> to vector<4x324xf32>
    %366 = vector.broadcast %364 : vector<1x324xf32> to vector<4x324xf32>
    %367 = arith.mulf %365, %366 : vector<4x324xf32>
    %368 = arith.addf %362, %367 : vector<4x324xf32>
    %c0_201 = arith.constant 0 : index
    %c16_202 = arith.constant 16 : index
    %369 = vector.load %arg4[%c0_201, %c16_202] : memref<4x36xf32, #tpu.memory_space<vmem>>, vector<4x1xf32>
    %c0_203 = arith.constant 0 : index
    %c128_204 = arith.constant 128 : index
    %370 = vector.load %arg10[%c0_203, %c128_204] : memref<8x512xf32, #tpu.memory_space<vmem>>, vector<1x324xf32>
    %371 = vector.broadcast %369 : vector<4x1xf32> to vector<4x324xf32>
    %372 = vector.broadcast %370 : vector<1x324xf32> to vector<4x324xf32>
    %373 = arith.mulf %371, %372 : vector<4x324xf32>
    %374 = arith.addf %368, %373 : vector<4x324xf32>
    %c0_205 = arith.constant 0 : index
    %c17_206 = arith.constant 17 : index
    %375 = vector.load %arg4[%c0_205, %c17_206] : memref<4x36xf32, #tpu.memory_space<vmem>>, vector<4x1xf32>
    %c1_207 = arith.constant 1 : index
    %c128_208 = arith.constant 128 : index
    %376 = vector.load %arg10[%c1_207, %c128_208] : memref<8x512xf32, #tpu.memory_space<vmem>>, vector<1x324xf32>
    %377 = vector.broadcast %375 : vector<4x1xf32> to vector<4x324xf32>
    %378 = vector.broadcast %376 : vector<1x324xf32> to vector<4x324xf32>
    %379 = arith.mulf %377, %378 : vector<4x324xf32>
    %380 = arith.addf %374, %379 : vector<4x324xf32>
    %c0_209 = arith.constant 0 : index
    %c18_210 = arith.constant 18 : index
    %381 = vector.load %arg4[%c0_209, %c18_210] : memref<4x36xf32, #tpu.memory_space<vmem>>, vector<4x1xf32>
    %c2_211 = arith.constant 2 : index
    %c128_212 = arith.constant 128 : index
    %382 = vector.load %arg10[%c2_211, %c128_212] : memref<8x512xf32, #tpu.memory_space<vmem>>, vector<1x324xf32>
    %383 = vector.broadcast %381 : vector<4x1xf32> to vector<4x324xf32>
    %384 = vector.broadcast %382 : vector<1x324xf32> to vector<4x324xf32>
    %385 = arith.mulf %383, %384 : vector<4x324xf32>
    %386 = arith.addf %380, %385 : vector<4x324xf32>
    %c0_213 = arith.constant 0 : index
    %c19_214 = arith.constant 19 : index
    %387 = vector.load %arg4[%c0_213, %c19_214] : memref<4x36xf32, #tpu.memory_space<vmem>>, vector<4x1xf32>
    %c3_215 = arith.constant 3 : index
    %c128_216 = arith.constant 128 : index
    %388 = vector.load %arg10[%c3_215, %c128_216] : memref<8x512xf32, #tpu.memory_space<vmem>>, vector<1x324xf32>
    %389 = vector.broadcast %387 : vector<4x1xf32> to vector<4x324xf32>
    %390 = vector.broadcast %388 : vector<1x324xf32> to vector<4x324xf32>
    %391 = arith.mulf %389, %390 : vector<4x324xf32>
    %392 = arith.addf %386, %391 : vector<4x324xf32>
    %c0_217 = arith.constant 0 : index
    %c20_218 = arith.constant 20 : index
    %393 = vector.load %arg4[%c0_217, %c20_218] : memref<4x36xf32, #tpu.memory_space<vmem>>, vector<4x1xf32>
    %c0_219 = arith.constant 0 : index
    %c129_220 = arith.constant 129 : index
    %394 = vector.load %arg10[%c0_219, %c129_220] : memref<8x512xf32, #tpu.memory_space<vmem>>, vector<1x324xf32>
    %395 = vector.broadcast %393 : vector<4x1xf32> to vector<4x324xf32>
    %396 = vector.broadcast %394 : vector<1x324xf32> to vector<4x324xf32>
    %397 = arith.mulf %395, %396 : vector<4x324xf32>
    %398 = arith.addf %392, %397 : vector<4x324xf32>
    %c0_221 = arith.constant 0 : index
    %c21_222 = arith.constant 21 : index
    %399 = vector.load %arg4[%c0_221, %c21_222] : memref<4x36xf32, #tpu.memory_space<vmem>>, vector<4x1xf32>
    %c1_223 = arith.constant 1 : index
    %c129_224 = arith.constant 129 : index
    %400 = vector.load %arg10[%c1_223, %c129_224] : memref<8x512xf32, #tpu.memory_space<vmem>>, vector<1x324xf32>
    %401 = vector.broadcast %399 : vector<4x1xf32> to vector<4x324xf32>
    %402 = vector.broadcast %400 : vector<1x324xf32> to vector<4x324xf32>
    %403 = arith.mulf %401, %402 : vector<4x324xf32>
    %404 = arith.addf %398, %403 : vector<4x324xf32>
    %c0_225 = arith.constant 0 : index
    %c22_226 = arith.constant 22 : index
    %405 = vector.load %arg4[%c0_225, %c22_226] : memref<4x36xf32, #tpu.memory_space<vmem>>, vector<4x1xf32>
    %c2_227 = arith.constant 2 : index
    %c129_228 = arith.constant 129 : index
    %406 = vector.load %arg10[%c2_227, %c129_228] : memref<8x512xf32, #tpu.memory_space<vmem>>, vector<1x324xf32>
    %407 = vector.broadcast %405 : vector<4x1xf32> to vector<4x324xf32>
    %408 = vector.broadcast %406 : vector<1x324xf32> to vector<4x324xf32>
    %409 = arith.mulf %407, %408 : vector<4x324xf32>
    %410 = arith.addf %404, %409 : vector<4x324xf32>
    %c0_229 = arith.constant 0 : index
    %c23_230 = arith.constant 23 : index
    %411 = vector.load %arg4[%c0_229, %c23_230] : memref<4x36xf32, #tpu.memory_space<vmem>>, vector<4x1xf32>
    %c3_231 = arith.constant 3 : index
    %c129_232 = arith.constant 129 : index
    %412 = vector.load %arg10[%c3_231, %c129_232] : memref<8x512xf32, #tpu.memory_space<vmem>>, vector<1x324xf32>
    %413 = vector.broadcast %411 : vector<4x1xf32> to vector<4x324xf32>
    %414 = vector.broadcast %412 : vector<1x324xf32> to vector<4x324xf32>
    %415 = arith.mulf %413, %414 : vector<4x324xf32>
    %416 = arith.addf %410, %415 : vector<4x324xf32>
    %c0_233 = arith.constant 0 : index
    %c24_234 = arith.constant 24 : index
    %417 = vector.load %arg4[%c0_233, %c24_234] : memref<4x36xf32, #tpu.memory_space<vmem>>, vector<4x1xf32>
    %c0_235 = arith.constant 0 : index
    %c145_236 = arith.constant 145 : index
    %418 = vector.load %arg10[%c0_235, %c145_236] : memref<8x512xf32, #tpu.memory_space<vmem>>, vector<1x324xf32>
    %419 = vector.broadcast %417 : vector<4x1xf32> to vector<4x324xf32>
    %420 = vector.broadcast %418 : vector<1x324xf32> to vector<4x324xf32>
    %421 = arith.mulf %419, %420 : vector<4x324xf32>
    %422 = arith.addf %416, %421 : vector<4x324xf32>
    %c0_237 = arith.constant 0 : index
    %c25_238 = arith.constant 25 : index
    %423 = vector.load %arg4[%c0_237, %c25_238] : memref<4x36xf32, #tpu.memory_space<vmem>>, vector<4x1xf32>
    %c1_239 = arith.constant 1 : index
    %c145_240 = arith.constant 145 : index
    %424 = vector.load %arg10[%c1_239, %c145_240] : memref<8x512xf32, #tpu.memory_space<vmem>>, vector<1x324xf32>
    %425 = vector.broadcast %423 : vector<4x1xf32> to vector<4x324xf32>
    %426 = vector.broadcast %424 : vector<1x324xf32> to vector<4x324xf32>
    %427 = arith.mulf %425, %426 : vector<4x324xf32>
    %428 = arith.addf %422, %427 : vector<4x324xf32>
    %c0_241 = arith.constant 0 : index
    %c26_242 = arith.constant 26 : index
    %429 = vector.load %arg4[%c0_241, %c26_242] : memref<4x36xf32, #tpu.memory_space<vmem>>, vector<4x1xf32>
    %c2_243 = arith.constant 2 : index
    %c145_244 = arith.constant 145 : index
    %430 = vector.load %arg10[%c2_243, %c145_244] : memref<8x512xf32, #tpu.memory_space<vmem>>, vector<1x324xf32>
    %431 = vector.broadcast %429 : vector<4x1xf32> to vector<4x324xf32>
    %432 = vector.broadcast %430 : vector<1x324xf32> to vector<4x324xf32>
    %433 = arith.mulf %431, %432 : vector<4x324xf32>
    %434 = arith.addf %428, %433 : vector<4x324xf32>
    %c0_245 = arith.constant 0 : index
    %c27_246 = arith.constant 27 : index
    %435 = vector.load %arg4[%c0_245, %c27_246] : memref<4x36xf32, #tpu.memory_space<vmem>>, vector<4x1xf32>
    %c3_247 = arith.constant 3 : index
    %c145_248 = arith.constant 145 : index
    %436 = vector.load %arg10[%c3_247, %c145_248] : memref<8x512xf32, #tpu.memory_space<vmem>>, vector<1x324xf32>
    %437 = vector.broadcast %435 : vector<4x1xf32> to vector<4x324xf32>
    %438 = vector.broadcast %436 : vector<1x324xf32> to vector<4x324xf32>
    %439 = arith.mulf %437, %438 : vector<4x324xf32>
    %440 = arith.addf %434, %439 : vector<4x324xf32>
    %c0_249 = arith.constant 0 : index
    %c28_250 = arith.constant 28 : index
    %441 = vector.load %arg4[%c0_249, %c28_250] : memref<4x36xf32, #tpu.memory_space<vmem>>, vector<4x1xf32>
    %c0_251 = arith.constant 0 : index
    %c146_252 = arith.constant 146 : index
    %442 = vector.load %arg10[%c0_251, %c146_252] : memref<8x512xf32, #tpu.memory_space<vmem>>, vector<1x324xf32>
    %443 = vector.broadcast %441 : vector<4x1xf32> to vector<4x324xf32>
    %444 = vector.broadcast %442 : vector<1x324xf32> to vector<4x324xf32>
    %445 = arith.mulf %443, %444 : vector<4x324xf32>
    %446 = arith.addf %440, %445 : vector<4x324xf32>
    %c0_253 = arith.constant 0 : index
    %c29_254 = arith.constant 29 : index
    %447 = vector.load %arg4[%c0_253, %c29_254] : memref<4x36xf32, #tpu.memory_space<vmem>>, vector<4x1xf32>
    %c1_255 = arith.constant 1 : index
    %c146_256 = arith.constant 146 : index
    %448 = vector.load %arg10[%c1_255, %c146_256] : memref<8x512xf32, #tpu.memory_space<vmem>>, vector<1x324xf32>
    %449 = vector.broadcast %447 : vector<4x1xf32> to vector<4x324xf32>
    %450 = vector.broadcast %448 : vector<1x324xf32> to vector<4x324xf32>
    %451 = arith.mulf %449, %450 : vector<4x324xf32>
    %452 = arith.addf %446, %451 : vector<4x324xf32>
    %c0_257 = arith.constant 0 : index
    %c30_258 = arith.constant 30 : index
    %453 = vector.load %arg4[%c0_257, %c30_258] : memref<4x36xf32, #tpu.memory_space<vmem>>, vector<4x1xf32>
    %c2_259 = arith.constant 2 : index
    %c146_260 = arith.constant 146 : index
    %454 = vector.load %arg10[%c2_259, %c146_260] : memref<8x512xf32, #tpu.memory_space<vmem>>, vector<1x324xf32>
    %455 = vector.broadcast %453 : vector<4x1xf32> to vector<4x324xf32>
    %456 = vector.broadcast %454 : vector<1x324xf32> to vector<4x324xf32>
    %457 = arith.mulf %455, %456 : vector<4x324xf32>
    %458 = arith.addf %452, %457 : vector<4x324xf32>
    %c0_261 = arith.constant 0 : index
    %c31_262 = arith.constant 31 : index
    %459 = vector.load %arg4[%c0_261, %c31_262] : memref<4x36xf32, #tpu.memory_space<vmem>>, vector<4x1xf32>
    %c3_263 = arith.constant 3 : index
    %c146_264 = arith.constant 146 : index
    %460 = vector.load %arg10[%c3_263, %c146_264] : memref<8x512xf32, #tpu.memory_space<vmem>>, vector<1x324xf32>
    %461 = vector.broadcast %459 : vector<4x1xf32> to vector<4x324xf32>
    %462 = vector.broadcast %460 : vector<1x324xf32> to vector<4x324xf32>
    %463 = arith.mulf %461, %462 : vector<4x324xf32>
    %464 = arith.addf %458, %463 : vector<4x324xf32>
    %c0_265 = arith.constant 0 : index
    %c32_266 = arith.constant 32 : index
    %465 = vector.load %arg4[%c0_265, %c32_266] : memref<4x36xf32, #tpu.memory_space<vmem>>, vector<4x1xf32>
    %c0_267 = arith.constant 0 : index
    %c147_268 = arith.constant 147 : index
    %466 = vector.load %arg10[%c0_267, %c147_268] : memref<8x512xf32, #tpu.memory_space<vmem>>, vector<1x324xf32>
    %467 = vector.broadcast %465 : vector<4x1xf32> to vector<4x324xf32>
    %468 = vector.broadcast %466 : vector<1x324xf32> to vector<4x324xf32>
    %469 = arith.mulf %467, %468 : vector<4x324xf32>
    %470 = arith.addf %464, %469 : vector<4x324xf32>
    %c0_269 = arith.constant 0 : index
    %c33_270 = arith.constant 33 : index
    %471 = vector.load %arg4[%c0_269, %c33_270] : memref<4x36xf32, #tpu.memory_space<vmem>>, vector<4x1xf32>
    %c1_271 = arith.constant 1 : index
    %c147_272 = arith.constant 147 : index
    %472 = vector.load %arg10[%c1_271, %c147_272] : memref<8x512xf32, #tpu.memory_space<vmem>>, vector<1x324xf32>
    %473 = vector.broadcast %471 : vector<4x1xf32> to vector<4x324xf32>
    %474 = vector.broadcast %472 : vector<1x324xf32> to vector<4x324xf32>
    %475 = arith.mulf %473, %474 : vector<4x324xf32>
    %476 = arith.addf %470, %475 : vector<4x324xf32>
    %c0_273 = arith.constant 0 : index
    %c34_274 = arith.constant 34 : index
    %477 = vector.load %arg4[%c0_273, %c34_274] : memref<4x36xf32, #tpu.memory_space<vmem>>, vector<4x1xf32>
    %c2_275 = arith.constant 2 : index
    %c147_276 = arith.constant 147 : index
    %478 = vector.load %arg10[%c2_275, %c147_276] : memref<8x512xf32, #tpu.memory_space<vmem>>, vector<1x324xf32>
    %479 = vector.broadcast %477 : vector<4x1xf32> to vector<4x324xf32>
    %480 = vector.broadcast %478 : vector<1x324xf32> to vector<4x324xf32>
    %481 = arith.mulf %479, %480 : vector<4x324xf32>
    %482 = arith.addf %476, %481 : vector<4x324xf32>
    %c0_277 = arith.constant 0 : index
    %c35_278 = arith.constant 35 : index
    %483 = vector.load %arg4[%c0_277, %c35_278] : memref<4x36xf32, #tpu.memory_space<vmem>>, vector<4x1xf32>
    %c3_279 = arith.constant 3 : index
    %c147_280 = arith.constant 147 : index
    %484 = vector.load %arg10[%c3_279, %c147_280] : memref<8x512xf32, #tpu.memory_space<vmem>>, vector<1x324xf32>
    %485 = vector.broadcast %483 : vector<4x1xf32> to vector<4x324xf32>
    %486 = vector.broadcast %484 : vector<1x324xf32> to vector<4x324xf32>
    %487 = arith.mulf %485, %486 : vector<4x324xf32>
    %488 = arith.addf %482, %487 : vector<4x324xf32>
    %cst_281 = arith.constant 0.000000e+00 : f32
    %489 = vector.broadcast %cst_281 : f32 to vector<4x324xf32>
    %490 = arith.maximumf %488, %489 : vector<4x324xf32>
    %c0_282 = arith.constant 0 : index
    %c128_283 = arith.constant 128 : index
    %491 = vector.load %arg10[%c0_282, %c128_283] : memref<8x512xf32, #tpu.memory_space<vmem>>, vector<4x324xf32>
    tpu.vector_store %arg10[%c0_282, %c128_283], %490 {strides = array<i32>} : memref<8x512xf32, #tpu.memory_space<vmem>>, vector<4x324xf32>,
    %cst_284 = arith.constant 1.000000e+00 : f32
    %492 = vector.broadcast %cst_284 : f32 to vector<1x324xf32>
    %493 = arith.subf %492, %2 : vector<1x324xf32>
    %494 = vector.broadcast %493 : vector<1x324xf32> to vector<4x324xf32>
    %495 = arith.mulf %490, %494 : vector<4x324xf32>
    %c0_285 = arith.constant 0 : index
    %c164_286 = arith.constant 164 : index
    %496 = vector.load %arg10[%c0_285, %c164_286] : memref<8x512xf32, #tpu.memory_space<vmem>>, vector<4x324xf32>
    %497 = vector.broadcast %2 : vector<1x324xf32> to vector<4x324xf32>
    %498 = arith.mulf %496, %497 : vector<4x324xf32>
    %499 = arith.addf %495, %498 : vector<4x324xf32>
    %cst_287 = arith.constant 1.000000e+00 : f32
    %500 = vector.broadcast %cst_287 : f32 to vector<1x324xf32>
    %501 = arith.subf %500, %3 : vector<1x324xf32>
    %502 = vector.broadcast %501 : vector<1x324xf32> to vector<4x324xf32>
    %503 = arith.mulf %499, %502 : vector<4x324xf32>
    %c0_288 = arith.constant 0 : index
    %c92_289 = arith.constant 92 : index
    %504 = vector.load %arg10[%c0_288, %c92_289] : memref<8x512xf32, #tpu.memory_space<vmem>>, vector<4x324xf32>
    %505 = vector.broadcast %3 : vector<1x324xf32> to vector<4x324xf32>
    %506 = arith.mulf %504, %505 : vector<4x324xf32>
    %507 = arith.addf %503, %506 : vector<4x324xf32>
    %c0_290 = arith.constant 0 : index
    %c128_291 = arith.constant 128 : index
    %508 = vector.load %arg10[%c0_290, %c128_291] : memref<8x512xf32, #tpu.memory_space<vmem>>, vector<4x324xf32>
    tpu.vector_store %arg10[%c0_290, %c128_291], %507 {strides = array<i32>} : memref<8x512xf32, #tpu.memory_space<vmem>>, vector<4x324xf32>,
    %cst_292 = arith.constant 1.000000e+00 : f32
    %509 = vector.broadcast %cst_292 : f32 to vector<1x324xf32>
    %510 = arith.subf %509, %4 : vector<1x324xf32>
    %511 = vector.broadcast %510 : vector<1x324xf32> to vector<4x324xf32>
    %512 = arith.mulf %507, %511 : vector<4x324xf32>
    %c0_293 = arith.constant 0 : index
    %c130_294 = arith.constant 130 : index
    %513 = vector.load %arg10[%c0_293, %c130_294] : memref<8x512xf32, #tpu.memory_space<vmem>>, vector<4x324xf32>
    %514 = vector.broadcast %4 : vector<1x324xf32> to vector<4x324xf32>
    %515 = arith.mulf %513, %514 : vector<4x324xf32>
    %516 = arith.addf %512, %515 : vector<4x324xf32>
    %cst_295 = arith.constant 1.000000e+00 : f32
    %517 = vector.broadcast %cst_295 : f32 to vector<1x324xf32>
    %518 = arith.subf %517, %5 : vector<1x324xf32>
    %519 = vector.broadcast %518 : vector<1x324xf32> to vector<4x324xf32>
    %520 = arith.mulf %516, %519 : vector<4x324xf32>
    %c0_296 = arith.constant 0 : index
    %c126_297 = arith.constant 126 : index
    %521 = vector.load %arg10[%c0_296, %c126_297] : memref<8x512xf32, #tpu.memory_space<vmem>>, vector<4x324xf32>
    %522 = vector.broadcast %5 : vector<1x324xf32> to vector<4x324xf32>
    %523 = arith.mulf %521, %522 : vector<4x324xf32>
    %524 = arith.addf %520, %523 : vector<4x324xf32>
    %c0_298 = arith.constant 0 : index
    %c128_299 = arith.constant 128 : index
    %525 = vector.load %arg10[%c0_298, %c128_299] : memref<8x512xf32, #tpu.memory_space<vmem>>, vector<4x324xf32>
    tpu.vector_store %arg10[%c0_298, %c128_299], %524 {strides = array<i32>} : memref<8x512xf32, #tpu.memory_space<vmem>>, vector<4x324xf32>,
    %cst_300 = arith.constant 0.000000e+00 : f32
    %526 = vector.broadcast %cst_300 : f32 to vector<4x324xf32>
    %c0_301 = arith.constant 0 : index
    %c0_302 = arith.constant 0 : index
    %527 = vector.load %arg7[%c0_301, %c0_302] : memref<4x1xf32, #tpu.memory_space<vmem>>, vector<4x1xf32>
    %528 = vector.broadcast %527 : vector<4x1xf32> to vector<4x324xf32>
    %529 = arith.addf %526, %528 : vector<4x324xf32>
    %c0_303 = arith.constant 0 : index
    %c0_304 = arith.constant 0 : index
    %530 = vector.load %arg6[%c0_303, %c0_304] : memref<4x36xf32, #tpu.memory_space<vmem>>, vector<4x1xf32>
    %c0_305 = arith.constant 0 : index
    %c109_306 = arith.constant 109 : index
    %531 = vector.load %arg10[%c0_305, %c109_306] : memref<8x512xf32, #tpu.memory_space<vmem>>, vector<1x324xf32>
    %532 = vector.broadcast %530 : vector<4x1xf32> to vector<4x324xf32>
    %533 = vector.broadcast %531 : vector<1x324xf32> to vector<4x324xf32>
    %534 = arith.mulf %532, %533 : vector<4x324xf32>
    %535 = arith.addf %529, %534 : vector<4x324xf32>
    %c0_307 = arith.constant 0 : index
    %c1_308 = arith.constant 1 : index
    %536 = vector.load %arg6[%c0_307, %c1_308] : memref<4x36xf32, #tpu.memory_space<vmem>>, vector<4x1xf32>
    %c1_309 = arith.constant 1 : index
    %c109_310 = arith.constant 109 : index
    %537 = vector.load %arg10[%c1_309, %c109_310] : memref<8x512xf32, #tpu.memory_space<vmem>>, vector<1x324xf32>
    %538 = vector.broadcast %536 : vector<4x1xf32> to vector<4x324xf32>
    %539 = vector.broadcast %537 : vector<1x324xf32> to vector<4x324xf32>
    %540 = arith.mulf %538, %539 : vector<4x324xf32>
    %541 = arith.addf %535, %540 : vector<4x324xf32>
    %c0_311 = arith.constant 0 : index
    %c2_312 = arith.constant 2 : index
    %542 = vector.load %arg6[%c0_311, %c2_312] : memref<4x36xf32, #tpu.memory_space<vmem>>, vector<4x1xf32>
    %c2_313 = arith.constant 2 : index
    %c109_314 = arith.constant 109 : index
    %543 = vector.load %arg10[%c2_313, %c109_314] : memref<8x512xf32, #tpu.memory_space<vmem>>, vector<1x324xf32>
    %544 = vector.broadcast %542 : vector<4x1xf32> to vector<4x324xf32>
    %545 = vector.broadcast %543 : vector<1x324xf32> to vector<4x324xf32>
    %546 = arith.mulf %544, %545 : vector<4x324xf32>
    %547 = arith.addf %541, %546 : vector<4x324xf32>
    %c0_315 = arith.constant 0 : index
    %c3_316 = arith.constant 3 : index
    %548 = vector.load %arg6[%c0_315, %c3_316] : memref<4x36xf32, #tpu.memory_space<vmem>>, vector<4x1xf32>
    %c3_317 = arith.constant 3 : index
    %c109_318 = arith.constant 109 : index
    %549 = vector.load %arg10[%c3_317, %c109_318] : memref<8x512xf32, #tpu.memory_space<vmem>>, vector<1x324xf32>
    %550 = vector.broadcast %548 : vector<4x1xf32> to vector<4x324xf32>
    %551 = vector.broadcast %549 : vector<1x324xf32> to vector<4x324xf32>
    %552 = arith.mulf %550, %551 : vector<4x324xf32>
    %553 = arith.addf %547, %552 : vector<4x324xf32>
    %c0_319 = arith.constant 0 : index
    %c4_320 = arith.constant 4 : index
    %554 = vector.load %arg6[%c0_319, %c4_320] : memref<4x36xf32, #tpu.memory_space<vmem>>, vector<4x1xf32>
    %c0_321 = arith.constant 0 : index
    %c110_322 = arith.constant 110 : index
    %555 = vector.load %arg10[%c0_321, %c110_322] : memref<8x512xf32, #tpu.memory_space<vmem>>, vector<1x324xf32>
    %556 = vector.broadcast %554 : vector<4x1xf32> to vector<4x324xf32>
    %557 = vector.broadcast %555 : vector<1x324xf32> to vector<4x324xf32>
    %558 = arith.mulf %556, %557 : vector<4x324xf32>
    %559 = arith.addf %553, %558 : vector<4x324xf32>
    %c0_323 = arith.constant 0 : index
    %c5_324 = arith.constant 5 : index
    %560 = vector.load %arg6[%c0_323, %c5_324] : memref<4x36xf32, #tpu.memory_space<vmem>>, vector<4x1xf32>
    %c1_325 = arith.constant 1 : index
    %c110_326 = arith.constant 110 : index
    %561 = vector.load %arg10[%c1_325, %c110_326] : memref<8x512xf32, #tpu.memory_space<vmem>>, vector<1x324xf32>
    %562 = vector.broadcast %560 : vector<4x1xf32> to vector<4x324xf32>
    %563 = vector.broadcast %561 : vector<1x324xf32> to vector<4x324xf32>
    %564 = arith.mulf %562, %563 : vector<4x324xf32>
    %565 = arith.addf %559, %564 : vector<4x324xf32>
    %c0_327 = arith.constant 0 : index
    %c6_328 = arith.constant 6 : index
    %566 = vector.load %arg6[%c0_327, %c6_328] : memref<4x36xf32, #tpu.memory_space<vmem>>, vector<4x1xf32>
    %c2_329 = arith.constant 2 : index
    %c110_330 = arith.constant 110 : index
    %567 = vector.load %arg10[%c2_329, %c110_330] : memref<8x512xf32, #tpu.memory_space<vmem>>, vector<1x324xf32>
    %568 = vector.broadcast %566 : vector<4x1xf32> to vector<4x324xf32>
    %569 = vector.broadcast %567 : vector<1x324xf32> to vector<4x324xf32>
    %570 = arith.mulf %568, %569 : vector<4x324xf32>
    %571 = arith.addf %565, %570 : vector<4x324xf32>
    %c0_331 = arith.constant 0 : index
    %c7_332 = arith.constant 7 : index
    %572 = vector.load %arg6[%c0_331, %c7_332] : memref<4x36xf32, #tpu.memory_space<vmem>>, vector<4x1xf32>
    %c3_333 = arith.constant 3 : index
    %c110_334 = arith.constant 110 : index
    %573 = vector.load %arg10[%c3_333, %c110_334] : memref<8x512xf32, #tpu.memory_space<vmem>>, vector<1x324xf32>
    %574 = vector.broadcast %572 : vector<4x1xf32> to vector<4x324xf32>
    %575 = vector.broadcast %573 : vector<1x324xf32> to vector<4x324xf32>
    %576 = arith.mulf %574, %575 : vector<4x324xf32>
    %577 = arith.addf %571, %576 : vector<4x324xf32>
    %c0_335 = arith.constant 0 : index
    %c8_336 = arith.constant 8 : index
    %578 = vector.load %arg6[%c0_335, %c8_336] : memref<4x36xf32, #tpu.memory_space<vmem>>, vector<4x1xf32>
    %c0_337 = arith.constant 0 : index
    %c111_338 = arith.constant 111 : index
    %579 = vector.load %arg10[%c0_337, %c111_338] : memref<8x512xf32, #tpu.memory_space<vmem>>, vector<1x324xf32>
    %580 = vector.broadcast %578 : vector<4x1xf32> to vector<4x324xf32>
    %581 = vector.broadcast %579 : vector<1x324xf32> to vector<4x324xf32>
    %582 = arith.mulf %580, %581 : vector<4x324xf32>
    %583 = arith.addf %577, %582 : vector<4x324xf32>
    %c0_339 = arith.constant 0 : index
    %c9_340 = arith.constant 9 : index
    %584 = vector.load %arg6[%c0_339, %c9_340] : memref<4x36xf32, #tpu.memory_space<vmem>>, vector<4x1xf32>
    %c1_341 = arith.constant 1 : index
    %c111_342 = arith.constant 111 : index
    %585 = vector.load %arg10[%c1_341, %c111_342] : memref<8x512xf32, #tpu.memory_space<vmem>>, vector<1x324xf32>
    %586 = vector.broadcast %584 : vector<4x1xf32> to vector<4x324xf32>
    %587 = vector.broadcast %585 : vector<1x324xf32> to vector<4x324xf32>
    %588 = arith.mulf %586, %587 : vector<4x324xf32>
    %589 = arith.addf %583, %588 : vector<4x324xf32>
    %c0_343 = arith.constant 0 : index
    %c10_344 = arith.constant 10 : index
    %590 = vector.load %arg6[%c0_343, %c10_344] : memref<4x36xf32, #tpu.memory_space<vmem>>, vector<4x1xf32>
    %c2_345 = arith.constant 2 : index
    %c111_346 = arith.constant 111 : index
    %591 = vector.load %arg10[%c2_345, %c111_346] : memref<8x512xf32, #tpu.memory_space<vmem>>, vector<1x324xf32>
    %592 = vector.broadcast %590 : vector<4x1xf32> to vector<4x324xf32>
    %593 = vector.broadcast %591 : vector<1x324xf32> to vector<4x324xf32>
    %594 = arith.mulf %592, %593 : vector<4x324xf32>
    %595 = arith.addf %589, %594 : vector<4x324xf32>
    %c0_347 = arith.constant 0 : index
    %c11_348 = arith.constant 11 : index
    %596 = vector.load %arg6[%c0_347, %c11_348] : memref<4x36xf32, #tpu.memory_space<vmem>>, vector<4x1xf32>
    %c3_349 = arith.constant 3 : index
    %c111_350 = arith.constant 111 : index
    %597 = vector.load %arg10[%c3_349, %c111_350] : memref<8x512xf32, #tpu.memory_space<vmem>>, vector<1x324xf32>
    %598 = vector.broadcast %596 : vector<4x1xf32> to vector<4x324xf32>
    %599 = vector.broadcast %597 : vector<1x324xf32> to vector<4x324xf32>
    %600 = arith.mulf %598, %599 : vector<4x324xf32>
    %601 = arith.addf %595, %600 : vector<4x324xf32>
    %c0_351 = arith.constant 0 : index
    %c12_352 = arith.constant 12 : index
    %602 = vector.load %arg6[%c0_351, %c12_352] : memref<4x36xf32, #tpu.memory_space<vmem>>, vector<4x1xf32>
    %c0_353 = arith.constant 0 : index
    %c127_354 = arith.constant 127 : index
    %603 = vector.load %arg10[%c0_353, %c127_354] : memref<8x512xf32, #tpu.memory_space<vmem>>, vector<1x324xf32>
    %604 = vector.broadcast %602 : vector<4x1xf32> to vector<4x324xf32>
    %605 = vector.broadcast %603 : vector<1x324xf32> to vector<4x324xf32>
    %606 = arith.mulf %604, %605 : vector<4x324xf32>
    %607 = arith.addf %601, %606 : vector<4x324xf32>
    %c0_355 = arith.constant 0 : index
    %c13_356 = arith.constant 13 : index
    %608 = vector.load %arg6[%c0_355, %c13_356] : memref<4x36xf32, #tpu.memory_space<vmem>>, vector<4x1xf32>
    %c1_357 = arith.constant 1 : index
    %c127_358 = arith.constant 127 : index
    %609 = vector.load %arg10[%c1_357, %c127_358] : memref<8x512xf32, #tpu.memory_space<vmem>>, vector<1x324xf32>
    %610 = vector.broadcast %608 : vector<4x1xf32> to vector<4x324xf32>
    %611 = vector.broadcast %609 : vector<1x324xf32> to vector<4x324xf32>
    %612 = arith.mulf %610, %611 : vector<4x324xf32>
    %613 = arith.addf %607, %612 : vector<4x324xf32>
    %c0_359 = arith.constant 0 : index
    %c14_360 = arith.constant 14 : index
    %614 = vector.load %arg6[%c0_359, %c14_360] : memref<4x36xf32, #tpu.memory_space<vmem>>, vector<4x1xf32>
    %c2_361 = arith.constant 2 : index
    %c127_362 = arith.constant 127 : index
    %615 = vector.load %arg10[%c2_361, %c127_362] : memref<8x512xf32, #tpu.memory_space<vmem>>, vector<1x324xf32>
    %616 = vector.broadcast %614 : vector<4x1xf32> to vector<4x324xf32>
    %617 = vector.broadcast %615 : vector<1x324xf32> to vector<4x324xf32>
    %618 = arith.mulf %616, %617 : vector<4x324xf32>
    %619 = arith.addf %613, %618 : vector<4x324xf32>
    %c0_363 = arith.constant 0 : index
    %c15_364 = arith.constant 15 : index
    %620 = vector.load %arg6[%c0_363, %c15_364] : memref<4x36xf32, #tpu.memory_space<vmem>>, vector<4x1xf32>
    %c3_365 = arith.constant 3 : index
    %c127_366 = arith.constant 127 : index
    %621 = vector.load %arg10[%c3_365, %c127_366] : memref<8x512xf32, #tpu.memory_space<vmem>>, vector<1x324xf32>
    %622 = vector.broadcast %620 : vector<4x1xf32> to vector<4x324xf32>
    %623 = vector.broadcast %621 : vector<1x324xf32> to vector<4x324xf32>
    %624 = arith.mulf %622, %623 : vector<4x324xf32>
    %625 = arith.addf %619, %624 : vector<4x324xf32>
    %c0_367 = arith.constant 0 : index
    %c16_368 = arith.constant 16 : index
    %626 = vector.load %arg6[%c0_367, %c16_368] : memref<4x36xf32, #tpu.memory_space<vmem>>, vector<4x1xf32>
    %c0_369 = arith.constant 0 : index
    %c128_370 = arith.constant 128 : index
    %627 = vector.load %arg10[%c0_369, %c128_370] : memref<8x512xf32, #tpu.memory_space<vmem>>, vector<1x324xf32>
    %628 = vector.broadcast %626 : vector<4x1xf32> to vector<4x324xf32>
    %629 = vector.broadcast %627 : vector<1x324xf32> to vector<4x324xf32>
    %630 = arith.mulf %628, %629 : vector<4x324xf32>
    %631 = arith.addf %625, %630 : vector<4x324xf32>
    %c0_371 = arith.constant 0 : index
    %c17_372 = arith.constant 17 : index
    %632 = vector.load %arg6[%c0_371, %c17_372] : memref<4x36xf32, #tpu.memory_space<vmem>>, vector<4x1xf32>
    %c1_373 = arith.constant 1 : index
    %c128_374 = arith.constant 128 : index
    %633 = vector.load %arg10[%c1_373, %c128_374] : memref<8x512xf32, #tpu.memory_space<vmem>>, vector<1x324xf32>
    %634 = vector.broadcast %632 : vector<4x1xf32> to vector<4x324xf32>
    %635 = vector.broadcast %633 : vector<1x324xf32> to vector<4x324xf32>
    %636 = arith.mulf %634, %635 : vector<4x324xf32>
    %637 = arith.addf %631, %636 : vector<4x324xf32>
    %c0_375 = arith.constant 0 : index
    %c18_376 = arith.constant 18 : index
    %638 = vector.load %arg6[%c0_375, %c18_376] : memref<4x36xf32, #tpu.memory_space<vmem>>, vector<4x1xf32>
    %c2_377 = arith.constant 2 : index
    %c128_378 = arith.constant 128 : index
    %639 = vector.load %arg10[%c2_377, %c128_378] : memref<8x512xf32, #tpu.memory_space<vmem>>, vector<1x324xf32>
    %640 = vector.broadcast %638 : vector<4x1xf32> to vector<4x324xf32>
    %641 = vector.broadcast %639 : vector<1x324xf32> to vector<4x324xf32>
    %642 = arith.mulf %640, %641 : vector<4x324xf32>
    %643 = arith.addf %637, %642 : vector<4x324xf32>
    %c0_379 = arith.constant 0 : index
    %c19_380 = arith.constant 19 : index
    %644 = vector.load %arg6[%c0_379, %c19_380] : memref<4x36xf32, #tpu.memory_space<vmem>>, vector<4x1xf32>
    %c3_381 = arith.constant 3 : index
    %c128_382 = arith.constant 128 : index
    %645 = vector.load %arg10[%c3_381, %c128_382] : memref<8x512xf32, #tpu.memory_space<vmem>>, vector<1x324xf32>
    %646 = vector.broadcast %644 : vector<4x1xf32> to vector<4x324xf32>
    %647 = vector.broadcast %645 : vector<1x324xf32> to vector<4x324xf32>
    %648 = arith.mulf %646, %647 : vector<4x324xf32>
    %649 = arith.addf %643, %648 : vector<4x324xf32>
    %c0_383 = arith.constant 0 : index
    %c20_384 = arith.constant 20 : index
    %650 = vector.load %arg6[%c0_383, %c20_384] : memref<4x36xf32, #tpu.memory_space<vmem>>, vector<4x1xf32>
    %c0_385 = arith.constant 0 : index
    %c129_386 = arith.constant 129 : index
    %651 = vector.load %arg10[%c0_385, %c129_386] : memref<8x512xf32, #tpu.memory_space<vmem>>, vector<1x324xf32>
    %652 = vector.broadcast %650 : vector<4x1xf32> to vector<4x324xf32>
    %653 = vector.broadcast %651 : vector<1x324xf32> to vector<4x324xf32>
    %654 = arith.mulf %652, %653 : vector<4x324xf32>
    %655 = arith.addf %649, %654 : vector<4x324xf32>
    %c0_387 = arith.constant 0 : index
    %c21_388 = arith.constant 21 : index
    %656 = vector.load %arg6[%c0_387, %c21_388] : memref<4x36xf32, #tpu.memory_space<vmem>>, vector<4x1xf32>
    %c1_389 = arith.constant 1 : index
    %c129_390 = arith.constant 129 : index
    %657 = vector.load %arg10[%c1_389, %c129_390] : memref<8x512xf32, #tpu.memory_space<vmem>>, vector<1x324xf32>
    %658 = vector.broadcast %656 : vector<4x1xf32> to vector<4x324xf32>
    %659 = vector.broadcast %657 : vector<1x324xf32> to vector<4x324xf32>
    %660 = arith.mulf %658, %659 : vector<4x324xf32>
    %661 = arith.addf %655, %660 : vector<4x324xf32>
    %c0_391 = arith.constant 0 : index
    %c22_392 = arith.constant 22 : index
    %662 = vector.load %arg6[%c0_391, %c22_392] : memref<4x36xf32, #tpu.memory_space<vmem>>, vector<4x1xf32>
    %c2_393 = arith.constant 2 : index
    %c129_394 = arith.constant 129 : index
    %663 = vector.load %arg10[%c2_393, %c129_394] : memref<8x512xf32, #tpu.memory_space<vmem>>, vector<1x324xf32>
    %664 = vector.broadcast %662 : vector<4x1xf32> to vector<4x324xf32>
    %665 = vector.broadcast %663 : vector<1x324xf32> to vector<4x324xf32>
    %666 = arith.mulf %664, %665 : vector<4x324xf32>
    %667 = arith.addf %661, %666 : vector<4x324xf32>
    %c0_395 = arith.constant 0 : index
    %c23_396 = arith.constant 23 : index
    %668 = vector.load %arg6[%c0_395, %c23_396] : memref<4x36xf32, #tpu.memory_space<vmem>>, vector<4x1xf32>
    %c3_397 = arith.constant 3 : index
    %c129_398 = arith.constant 129 : index
    %669 = vector.load %arg10[%c3_397, %c129_398] : memref<8x512xf32, #tpu.memory_space<vmem>>, vector<1x324xf32>
    %670 = vector.broadcast %668 : vector<4x1xf32> to vector<4x324xf32>
    %671 = vector.broadcast %669 : vector<1x324xf32> to vector<4x324xf32>
    %672 = arith.mulf %670, %671 : vector<4x324xf32>
    %673 = arith.addf %667, %672 : vector<4x324xf32>
    %c0_399 = arith.constant 0 : index
    %c24_400 = arith.constant 24 : index
    %674 = vector.load %arg6[%c0_399, %c24_400] : memref<4x36xf32, #tpu.memory_space<vmem>>, vector<4x1xf32>
    %c0_401 = arith.constant 0 : index
    %c145_402 = arith.constant 145 : index
    %675 = vector.load %arg10[%c0_401, %c145_402] : memref<8x512xf32, #tpu.memory_space<vmem>>, vector<1x324xf32>
    %676 = vector.broadcast %674 : vector<4x1xf32> to vector<4x324xf32>
    %677 = vector.broadcast %675 : vector<1x324xf32> to vector<4x324xf32>
    %678 = arith.mulf %676, %677 : vector<4x324xf32>
    %679 = arith.addf %673, %678 : vector<4x324xf32>
    %c0_403 = arith.constant 0 : index
    %c25_404 = arith.constant 25 : index
    %680 = vector.load %arg6[%c0_403, %c25_404] : memref<4x36xf32, #tpu.memory_space<vmem>>, vector<4x1xf32>
    %c1_405 = arith.constant 1 : index
    %c145_406 = arith.constant 145 : index
    %681 = vector.load %arg10[%c1_405, %c145_406] : memref<8x512xf32, #tpu.memory_space<vmem>>, vector<1x324xf32>
    %682 = vector.broadcast %680 : vector<4x1xf32> to vector<4x324xf32>
    %683 = vector.broadcast %681 : vector<1x324xf32> to vector<4x324xf32>
    %684 = arith.mulf %682, %683 : vector<4x324xf32>
    %685 = arith.addf %679, %684 : vector<4x324xf32>
    %c0_407 = arith.constant 0 : index
    %c26_408 = arith.constant 26 : index
    %686 = vector.load %arg6[%c0_407, %c26_408] : memref<4x36xf32, #tpu.memory_space<vmem>>, vector<4x1xf32>
    %c2_409 = arith.constant 2 : index
    %c145_410 = arith.constant 145 : index
    %687 = vector.load %arg10[%c2_409, %c145_410] : memref<8x512xf32, #tpu.memory_space<vmem>>, vector<1x324xf32>
    %688 = vector.broadcast %686 : vector<4x1xf32> to vector<4x324xf32>
    %689 = vector.broadcast %687 : vector<1x324xf32> to vector<4x324xf32>
    %690 = arith.mulf %688, %689 : vector<4x324xf32>
    %691 = arith.addf %685, %690 : vector<4x324xf32>
    %c0_411 = arith.constant 0 : index
    %c27_412 = arith.constant 27 : index
    %692 = vector.load %arg6[%c0_411, %c27_412] : memref<4x36xf32, #tpu.memory_space<vmem>>, vector<4x1xf32>
    %c3_413 = arith.constant 3 : index
    %c145_414 = arith.constant 145 : index
    %693 = vector.load %arg10[%c3_413, %c145_414] : memref<8x512xf32, #tpu.memory_space<vmem>>, vector<1x324xf32>
    %694 = vector.broadcast %692 : vector<4x1xf32> to vector<4x324xf32>
    %695 = vector.broadcast %693 : vector<1x324xf32> to vector<4x324xf32>
    %696 = arith.mulf %694, %695 : vector<4x324xf32>
    %697 = arith.addf %691, %696 : vector<4x324xf32>
    %c0_415 = arith.constant 0 : index
    %c28_416 = arith.constant 28 : index
    %698 = vector.load %arg6[%c0_415, %c28_416] : memref<4x36xf32, #tpu.memory_space<vmem>>, vector<4x1xf32>
    %c0_417 = arith.constant 0 : index
    %c146_418 = arith.constant 146 : index
    %699 = vector.load %arg10[%c0_417, %c146_418] : memref<8x512xf32, #tpu.memory_space<vmem>>, vector<1x324xf32>
    %700 = vector.broadcast %698 : vector<4x1xf32> to vector<4x324xf32>
    %701 = vector.broadcast %699 : vector<1x324xf32> to vector<4x324xf32>
    %702 = arith.mulf %700, %701 : vector<4x324xf32>
    %703 = arith.addf %697, %702 : vector<4x324xf32>
    %c0_419 = arith.constant 0 : index
    %c29_420 = arith.constant 29 : index
    %704 = vector.load %arg6[%c0_419, %c29_420] : memref<4x36xf32, #tpu.memory_space<vmem>>, vector<4x1xf32>
    %c1_421 = arith.constant 1 : index
    %c146_422 = arith.constant 146 : index
    %705 = vector.load %arg10[%c1_421, %c146_422] : memref<8x512xf32, #tpu.memory_space<vmem>>, vector<1x324xf32>
    %706 = vector.broadcast %704 : vector<4x1xf32> to vector<4x324xf32>
    %707 = vector.broadcast %705 : vector<1x324xf32> to vector<4x324xf32>
    %708 = arith.mulf %706, %707 : vector<4x324xf32>
    %709 = arith.addf %703, %708 : vector<4x324xf32>
    %c0_423 = arith.constant 0 : index
    %c30_424 = arith.constant 30 : index
    %710 = vector.load %arg6[%c0_423, %c30_424] : memref<4x36xf32, #tpu.memory_space<vmem>>, vector<4x1xf32>
    %c2_425 = arith.constant 2 : index
    %c146_426 = arith.constant 146 : index
    %711 = vector.load %arg10[%c2_425, %c146_426] : memref<8x512xf32, #tpu.memory_space<vmem>>, vector<1x324xf32>
    %712 = vector.broadcast %710 : vector<4x1xf32> to vector<4x324xf32>
    %713 = vector.broadcast %711 : vector<1x324xf32> to vector<4x324xf32>
    %714 = arith.mulf %712, %713 : vector<4x324xf32>
    %715 = arith.addf %709, %714 : vector<4x324xf32>
    %c0_427 = arith.constant 0 : index
    %c31_428 = arith.constant 31 : index
    %716 = vector.load %arg6[%c0_427, %c31_428] : memref<4x36xf32, #tpu.memory_space<vmem>>, vector<4x1xf32>
    %c3_429 = arith.constant 3 : index
    %c146_430 = arith.constant 146 : index
    %717 = vector.load %arg10[%c3_429, %c146_430] : memref<8x512xf32, #tpu.memory_space<vmem>>, vector<1x324xf32>
    %718 = vector.broadcast %716 : vector<4x1xf32> to vector<4x324xf32>
    %719 = vector.broadcast %717 : vector<1x324xf32> to vector<4x324xf32>
    %720 = arith.mulf %718, %719 : vector<4x324xf32>
    %721 = arith.addf %715, %720 : vector<4x324xf32>
    %c0_431 = arith.constant 0 : index
    %c32_432 = arith.constant 32 : index
    %722 = vector.load %arg6[%c0_431, %c32_432] : memref<4x36xf32, #tpu.memory_space<vmem>>, vector<4x1xf32>
    %c0_433 = arith.constant 0 : index
    %c147_434 = arith.constant 147 : index
    %723 = vector.load %arg10[%c0_433, %c147_434] : memref<8x512xf32, #tpu.memory_space<vmem>>, vector<1x324xf32>
    %724 = vector.broadcast %722 : vector<4x1xf32> to vector<4x324xf32>
    %725 = vector.broadcast %723 : vector<1x324xf32> to vector<4x324xf32>
    %726 = arith.mulf %724, %725 : vector<4x324xf32>
    %727 = arith.addf %721, %726 : vector<4x324xf32>
    %c0_435 = arith.constant 0 : index
    %c33_436 = arith.constant 33 : index
    %728 = vector.load %arg6[%c0_435, %c33_436] : memref<4x36xf32, #tpu.memory_space<vmem>>, vector<4x1xf32>
    %c1_437 = arith.constant 1 : index
    %c147_438 = arith.constant 147 : index
    %729 = vector.load %arg10[%c1_437, %c147_438] : memref<8x512xf32, #tpu.memory_space<vmem>>, vector<1x324xf32>
    %730 = vector.broadcast %728 : vector<4x1xf32> to vector<4x324xf32>
    %731 = vector.broadcast %729 : vector<1x324xf32> to vector<4x324xf32>
    %732 = arith.mulf %730, %731 : vector<4x324xf32>
    %733 = arith.addf %727, %732 : vector<4x324xf32>
    %c0_439 = arith.constant 0 : index
    %c34_440 = arith.constant 34 : index
    %734 = vector.load %arg6[%c0_439, %c34_440] : memref<4x36xf32, #tpu.memory_space<vmem>>, vector<4x1xf32>
    %c2_441 = arith.constant 2 : index
    %c147_442 = arith.constant 147 : index
    %735 = vector.load %arg10[%c2_441, %c147_442] : memref<8x512xf32, #tpu.memory_space<vmem>>, vector<1x324xf32>
    %736 = vector.broadcast %734 : vector<4x1xf32> to vector<4x324xf32>
    %737 = vector.broadcast %735 : vector<1x324xf32> to vector<4x324xf32>
    %738 = arith.mulf %736, %737 : vector<4x324xf32>
    %739 = arith.addf %733, %738 : vector<4x324xf32>
    %c0_443 = arith.constant 0 : index
    %c35_444 = arith.constant 35 : index
    %740 = vector.load %arg6[%c0_443, %c35_444] : memref<4x36xf32, #tpu.memory_space<vmem>>, vector<4x1xf32>
    %c3_445 = arith.constant 3 : index
    %c147_446 = arith.constant 147 : index
    %741 = vector.load %arg10[%c3_445, %c147_446] : memref<8x512xf32, #tpu.memory_space<vmem>>, vector<1x324xf32>
    %742 = vector.broadcast %740 : vector<4x1xf32> to vector<4x324xf32>
    %743 = vector.broadcast %741 : vector<1x324xf32> to vector<4x324xf32>
    %744 = arith.mulf %742, %743 : vector<4x324xf32>
    %745 = arith.addf %739, %744 : vector<4x324xf32>
    %c0_447 = arith.constant 0 : index
    %c0_448 = arith.constant 0 : index
    %c0_449 = arith.constant 0 : index
    %746 = vector.load %arg9[%c0_447, %c0_448, %c0_449] : memref<1x4x324xf32, #tpu.memory_space<vmem>>, vector<1x4x324xf32>
    %747 = vector.shape_cast %746 : vector<1x4x324xf32> to vector<4x324xf32>
    %748 = vector.shape_cast %745 : vector<4x324xf32> to vector<1x4x324xf32>
    tpu.vector_store %arg9[%c0_447, %c0_448, %c0_449], %748 {strides = array<i32>} : memref<1x4x324xf32, #tpu.memory_space<vmem>>, vector<1x4x324xf32>,
    return
  }
  func.func @transform_0(%arg0: i32) -> (i32, i32, i32) {
    %c0_i32 = arith.constant 0 : i32
    %c0_i32_0 = arith.constant 0 : i32
    %c0_i32_1 = arith.constant 0 : i32
    return %arg0, %c0_i32, %c0_i32_0 : i32, i32, i32
  }
  func.func @transform_1(%arg0: i32) -> (i32, i32) {
    %c0_i32 = arith.constant 0 : i32
    %c0_i32_0 = arith.constant 0 : i32
    %c0_i32_1 = arith.constant 0 : i32
    return %c0_i32, %c0_i32_0 : i32, i32
  }
  func.func @transform_2(%arg0: i32) -> (i32, i32) {
    %c0_i32 = arith.constant 0 : i32
    %c0_i32_0 = arith.constant 0 : i32
    %c0_i32_1 = arith.constant 0 : i32
    return %c0_i32, %c0_i32_0 : i32, i32
  }
  func.func @transform_3(%arg0: i32) -> (i32, i32) {
    %c0_i32 = arith.constant 0 : i32
    %c0_i32_0 = arith.constant 0 : i32
    %c0_i32_1 = arith.constant 0 : i32
    return %c0_i32, %c0_i32_0 : i32, i32
  }
  func.func @transform_4(%arg0: i32) -> (i32, i32) {
    %c0_i32 = arith.constant 0 : i32
    %c0_i32_0 = arith.constant 0 : i32
    %c0_i32_1 = arith.constant 0 : i32
    return %c0_i32, %c0_i32_0 : i32, i32
  }
  func.func @transform_5(%arg0: i32) -> (i32, i32) {
    %c0_i32 = arith.constant 0 : i32
    %c0_i32_0 = arith.constant 0 : i32
    %c0_i32_1 = arith.constant 0 : i32
    return %c0_i32, %c0_i32_0 : i32, i32
  }
  func.func @transform_6(%arg0: i32) -> (i32, i32) {
    %c0_i32 = arith.constant 0 : i32
    %c0_i32_0 = arith.constant 0 : i32
    %c0_i32_1 = arith.constant 0 : i32
    return %c0_i32, %c0_i32_0 : i32, i32
  }
  func.func @transform_7(%arg0: i32) -> (i32, i32) {
    %c0_i32 = arith.constant 0 : i32
    %c0_i32_0 = arith.constant 0 : i32
    %c0_i32_1 = arith.constant 0 : i32
    return %c0_i32, %c0_i32_0 : i32, i32
  }
  func.func @transform_8(%arg0: i32) -> (i32, i32, i32) {
    %c0_i32 = arith.constant 0 : i32
    %c0_i32_0 = arith.constant 0 : i32
    %c0_i32_1 = arith.constant 0 : i32
    return %arg0, %c0_i32, %c0_i32_0 : i32, i32, i32
  }
}

</mosaic_0001>

<bundles_post_ra>
// kernel: simple_cnn_generator_forward.1
= control target key start
LH: loop header
LB: loop body
LE: loop exit
PB: predicated region body
PF: predicated region fallthrough
CT: control target
= control target key end

     0   :  { %s4596_s27 = smov 0   ;;  %s8108_s0 = inlined_call_operand.vmem [shape: f32[2,4,324], index: 0, kind: input, shape index: {}]   ;;  %s8109_s1 = inlined_call_operand.vmem [shape: f32[4,36], index: 1, kind: input, shape index: {}]   ;;  %s8110_s2 = inlined_call_operand.vmem [shape: f32[4,1], index: 2, kind: input, shape index: {}]   ;;  %s8111_s3 = inlined_call_operand.vmem [shape: f32[4,36], index: 3, kind: input, shape index: {}]   ;;  %s8112_s4 = inlined_call_operand.vmem [shape: f32[4,1], index: 4, kind: input, shape index: {}]   ;;  %s8113_s5 = inlined_call_operand.vmem [shape: f32[4,36], index: 5, kind: input, shape index: {}]   ;;  %s8114_s6 = inlined_call_operand.vmem [shape: f32[4,1], index: 6, kind: input, shape index: {}]   ;;  %s8115_s7 = inlined_call_operand.vmem [shape: f32[5,324], index: 7, kind: input, shape index: {}]   ;;  %s8116_s8 = inlined_call_operand.vmem [shape: f32[2,4,324], index: 8, kind: output, shape index: {}]  }
   0x1 LB: > { %s4309_s28 = sadd.s32 4294967295, %s4497_s27   ;;  %p4313_p0 = scmp.ge.s32.totalorder %s4497_s27, 1  ;;  %s4497_s27 = sphi %s4596_s27, %s18_s27  }
   0x2   : > { %p262_p1 = scmp.lt.s32.totalorder %s4497_s27, 3 }
   0x4   : > { %p263_p2 = pnand %p4313_p0, %p262_p1 }
   0x6   : > { %266 = sbr.rel (%p263_p2) target bundleno = 2550 (0x9f6), region = 52 }
   0xd   : > { %v330_v0 = vlaneseq  ;;  %v8150_v1 = vmov 0   ;;  %v4611_v3 = vld [vmem:[%s8115_s7] ss:$8 sm:$0x7]  ;;  %p296_p3 = scmp.lt.s32.totalorder %s4309_s28, 1  ;;  %s4500_s11 = smov 36  }
   0xe   : > { %4384 = vset.pattern.permute.xlu1 %v8150_v1  ;;  %4383 = vset.pattern.permute.xlu0 %v8150_v1  ;;  %v4625_v7 = vld [vmem:[%s8115_s7 + $0x1] ss:$8 sm:$0x7]  ;;  %s4501_s16 = smov 92   ;;  %v4502_v17 = vmov 0.0   ;;  %vm326_vm0 = vcmask 551936  }
   0xf   : > { %v4606_v2 = vshrl.u32 %v330_v0, 7  ;;  %s8620_s28 = smov (!%p296_p3, %s4309_s28), 1  ;;  %v4656_v15 = vld [vmem:[%s8115_s7 + $0x2] ss:$8 sm:$0x7]  ;;  %307 = vst [vmem:[#allocation2 + $0x8] sm:$0xff] %v4502_v17 }
  0x10   : > { %s4322_s12 = smul.u32 12, %s8620_s28  ;;  %306 = vst [vmem:[#allocation2] sm:$0xff] %v4502_v17  ;;  %308 = vst [vmem:[#allocation2 + $0x10] sm:$0xff] %v4502_v17  ;;  %v4674_v21 = vld [vmem:[%s8115_s7 + $0x3] ss:$8 sm:$0x7] }
  0x11   : > { %v4614_v4 = vsub.s32 2, %v4606_v2  ;;  %v4617_v5 = vsub.s32 0, %v4606_v2  ;;  %v4620_v6 = vsub.s32 1, %v4606_v2  ;;  %309 = vst [vmem:[#allocation2 + $0x18] sm:$0xff] %v4502_v17  ;;  %s4503_s21 = smov 2   ;;  %s4504_s22 = smov 126  }
  0x12   : > { %s300_s15 = scalar_lea.vmem %s8108_s0, %s4322_s12  ;;  %v4693_v26 = vld [vmem:[%s8109_s1] sm:$0xf]  ;;  %v8127_v28 = vmov 1   ;;  %v8126_v29 = vmov 2   ;;  %v8125_v30 = vmov 3   ;;  %v8123_v31 = vmov 5  }
  0x13   : > { %8309 = vst [vmem:[#allocation3_spill] sm:$0xff] %v4614_v4  ;;  %8310 = vst [vmem:[#allocation4_spill] sm:$0xff] %v4617_v5  ;;  %v362_v8 = vrot.slane %v4611_v3, %v4614_v4  ;;  %v354_v9 = vrot.slane %v4611_v3, %v4617_v5  ;;  %v420_v10 = vrot.slane %v4625_v7, %v4617_v5  ;;  %v4651_v14 = vld [vmem:[%s300_s15] sm:$0xff]  ;;  %v4658_v16 = vld [vmem:[%s300_s15 + $0x8] sm:$0xf]  ;;  %v8122_v32 = vmov 4  }
  0x14   : > { %8311 = vst [vmem:[#allocation5_spill] sm:$0xff] %v4620_v6  ;;  %v358_v11 = vrot.slane %v4611_v3, %v4620_v6  ;;  %v428_v12 = vrot.slane %v4625_v7, %v4614_v4  ;;  %v424_v13 = vrot.slane %v4625_v7, %v4620_v6  ;;  %v322_v18 = vcombine.high %v4651_v14, %v4651_v14  ;;  %v611_v27 = vld [vmem:[%s8110_s2] sm:$0xf]  ;;  %v4734_v44 = vld [vmem:[%s8115_s7 + $0x4] ss:$8 sm:$0x7] }
  0x15   : > { %367 = vrot.lane.b32.xlu1 %v362_v8, %s4500_s11  ;;  %363 = vrot.lane.b32.xlu0 %v354_v9, %s4500_s11  ;;  %v500_v19 = vrot.slane %v4656_v15, %v4620_v6  ;;  %v496_v20 = vrot.slane %v4656_v15, %v4617_v5  ;;  %324 = vst [vmem:[#allocation2 + $0x8] sm:$0xf] %v4651_v14  ;;  %327 = vst.msk [vmem:[#allocation2 + $0x18] sm:$0xf] %vm326_vm0, %v4658_v16  ;;  %v8176_v33 = vmov 11   ;;  %v8172_v34 = vmov 17  }
  0x16   : > { %325 = vst [vmem:[#allocation2 + $0x10] sm:$0xf] %v322_v18  ;;  %v561_v22 = vrot.slane %v4674_v21, %v4617_v5  ;;  %v504_v23 = vrot.slane %v4656_v15, %v4614_v4  ;;  %v569_v24 = vrot.slane %v4674_v21, %v4614_v4  ;;  %v565_v25 = vrot.slane %v4674_v21, %v4620_v6  ;;  %s4524_s9 = smov 109   ;;  %s4542_s17 = smov 110  }
  0x17   : > { %v8121_v35 = vmov 12   ;;  %v8152_v36 = vmov 18   ;;  %v8164_v37 = vmov 13   ;;  %v8148_v38 = vmov 19   ;;  %s4543_s18 = smov 108   ;;  %s4544_s19 = smov 91  }
  0x18   : > { %v8174_v39 = vmov 14   ;;  %v8170_v40 = vmov 20   ;;  %v8160_v41 = vmov 15   ;;  %v8146_v42 = vmov 21   ;;  %s4545_s20 = smov 90   ;;  %s4546_s24 = smov 19  }
  0x19   : > { %429 = vrot.lane.b32.xlu1 %v420_v10, %s4501_s16  ;;  %365 = vrot.lane.b32.xlu0 %v358_v11, %s4500_s11  ;;  %v8156_v43 = vmov 16   ;;  %v8144_v45 = vmov 22   ;;  %v8130_v46 = vmov 33   ;;  %v1737_v47 = vrot.slane %v4734_v44, %v4617_v5  ;;  %v415_v10 = vld [vmem:[#allocation2] sm:$0xf]  ;;  %s4547_s25 = smov 17  }
  0x1a   : > { %v8168_v48 = vmov 23   ;;  %v1745_v49 = vrot.slane %v4734_v44, %v4614_v4  ;;  %v8142_v50 = vmov 24   ;;  %v8140_v51 = vmov 25   ;;  %s4548_s26 = smov 111   ;;  %s4549_s14 = smov 73  }
  0x1b   : > { %v8166_v52 = vmov 26   ;;  %v8138_v53 = vmov 27   ;;  %v8136_v54 = vmov 28   ;;  %v8162_v55 = vmov 29   ;;  %s4550_s15 = smov 107  }
  0x1c   : > { %v8134_v56 = vmov 30   ;;  %v8132_v57 = vmov 31   ;;  %vm369_vm1 = vcmask 293888   ;;  %v349_v60 = vld [vmem:[#allocation2 + $0x18] sm:$0xf]  ;;  %v8158_v61 = vmov 32  }
  0x1d   : > { %433 = vrot.lane.b32.xlu1 %v428_v12, %s4501_s16  ;;  %431 = vrot.lane.b32.xlu0 %v424_v13, %s4501_s16  ;;  %vm390_vm2 = vcmask 752640   ;;  %v347_v8 = vld [vmem:[#allocation2 + $0x8] sm:$0xf]  ;;  %v8128_v13 = vmov 34   ;;  %vm388_vm3 = vcmask 1043456   ;;  %vm531_vm4 = vcmask 1031168  }
  0x1e   : > { %vm511_vm5 = vcmask 15360   ;;  %vm779_vm6 = vcmask 1039360   ;;  %vm1028_vm7 = vcmask 900096   ;;  %vm1167_vm8 = vcmask 891904  }
  0x1f   : > { %vm1326_vm9 = vcmask 883712   ;;  %vm1535_vm10 = vcmask 744448   ;;  %vm1640_vm11 = vcmask 736256   ;;  %vm1774_vm12 = vcmask 154624  }
  0x20   : > { %vm2945_vm13 = vcmask 596992   ;;  %vm2989_vm14 = vcmask 138240   ;;  %vm3097_vm15 = vcmask 908288  }
  0x21   : > { %507 = vrot.lane.b32.xlu1 %v500_v19, %s4503_s21  ;;  %505 = vrot.lane.b32.xlu0 %v496_v20, %s4503_s21  ;;  %v8154_v20 = vmov 35  }
  0x25   : > { %570 = vrot.lane.b32.xlu1 %v561_v22, %s4504_s22  ;;  %509 = vrot.lane.b32.xlu0 %v504_v23, %s4503_s21  ;;  %v1741_v23 = vrot.slane %v4734_v44, %v4620_v6  ;;  %v8120_v44 = vmov 6  }
  0x29   : > { %574 = vrot.lane.b32.xlu1 %v569_v24, %s4504_s22  ;;  %572 = vrot.lane.b32.xlu0 %v565_v25, %s4504_s22  ;;  %v1791_v24 = vld [vmem:[%s8111_s3] sm:$0xf] }
  0x2a   : > { %v1784_v25 = vld [vmem:[%s8112_s4] sm:$0xf] }
  0x2d   : > { %622 = vperm.xlu1 %4384, %v4693_v26   ;;  %614 = vperm.xlu0 %4383, %v611_v27  }
  0x31   : > { %4385 = vset.pattern.permute.xlu1 %v8127_v28  ;;  %4386 = vset.pattern.permute.xlu0 %v8126_v29 }
  0x32   : > { %657 = vperm.xlu1 %4385, %v4693_v26   ;;  %692 = vperm.xlu0 %4386, %v4693_v26  }
  0x36   : > { %4387 = vset.pattern.permute.xlu1 %v8125_v30  ;;  %4389 = vset.pattern.permute.xlu0 %v8123_v31 }
  0x37   : > { %727 = vperm.xlu1 %4387, %v4693_v26   ;;  %792 = vperm.xlu0 %4389, %v4693_v26  }
  0x3b   : > { %4388 = vset.pattern.permute.xlu1 %v8122_v32  ;;  %4390 = vset.pattern.permute.xlu0 %v8176_v33 }
  0x3c   : > { %760 = vperm.xlu1 %4388, %v4693_v26   ;;  %978 = vperm.xlu0 %4390, %v4693_v26  }
  0x40   : > { %4396 = vset.pattern.permute.xlu1 %v8172_v34  ;;  %4391 = vset.pattern.permute.xlu0 %v8121_v35 }
  0x41   : > { %1181 = vperm.xlu1 %4396, %v4693_v26   ;;  %1009 = vperm.xlu0 %4391, %v4693_v26  }
  0x45   : > { %4397 = vset.pattern.permute.xlu1 %v8152_v36  ;;  %4392 = vset.pattern.permute.xlu0 %v8164_v37  ;;  %v328_v37 = vsub.f32 1.0, %v4611_v3 }
  0x46   : > { %1225 = vperm.xlu1 %4397, %v4693_v26   ;;  %1041 = vperm.xlu0 %4392, %v4693_v26  }
  0x47   : > { %v4917_v34 = vrot.slane %v328_v37, %v4620_v6 }
  0x49   : > { %8335 = vst [vmem:[#allocation29_spill] sm:$0xff] %v4917_v34 }
  0x4a   : > { %4398 = vset.pattern.permute.xlu1 %v8148_v38  ;;  %4393 = vset.pattern.permute.xlu0 %v8174_v39  ;;  %v4920_v39 = vrot.slane %v328_v37, %v4614_v4 }
  0x4b   : > { %1269 = vperm.xlu1 %4398, %v4693_v26   ;;  %1072 = vperm.xlu0 %4393, %v4693_v26  }
  0x4c   : > { %8336 = vst [vmem:[#allocation30_spill] sm:$0xff] %v4920_v39 }
  0x4f   : > { %4399 = vset.pattern.permute.xlu1 %v8170_v40  ;;  %4394 = vset.pattern.permute.xlu0 %v8160_v41  ;;  %v4914_v40 = vrot.slane %v328_v37, %v4617_v5 }
  0x50   : > { %1311 = vperm.xlu1 %4399, %v4693_v26   ;;  %1103 = vperm.xlu0 %4394, %v4693_v26  }
  0x51   : > { %8334 = vst [vmem:[#allocation28_spill] sm:$0xff] %v4914_v40  ;;  %v343_v3 = vcombine.low %v4914_v40, %v4917_v34 }
  0x54   : > { %4400 = vset.pattern.permute.xlu1 %v8146_v42  ;;  %4395 = vset.pattern.permute.xlu0 %v8156_v43 }
  0x55   : > { %1338 = vperm.xlu1 %4400, %v4693_v26   ;;  %1136 = vperm.xlu0 %4395, %v4693_v26  }
  0x59   : > { %4401 = vset.pattern.permute.xlu1 %v8144_v45  ;;  %4412 = vset.pattern.permute.xlu0 %v8130_v46 }
  0x5a   : > { %1364 = vperm.xlu1 %4401, %v4693_v26   ;;  %1652 = vperm.xlu0 %4412, %v4693_v26  }
  0x5e   : > { %4402 = vset.pattern.permute.xlu1 %v8168_v48  ;;  %1746 = vrot.lane.b32.xlu0 %v1737_v47, %s4524_s9 }
  0x5f   : > { %1390 = vperm.xlu1 %4402, %v4693_v26   ;;  %4418 = vset.pattern.permute.xlu0 %v8125_v30 }
  0x62   : > { %1750 = vrot.lane.b32.xlu0 %v1745_v49, %s4524_s9  ;;  %v348_v49 = vld [vmem:[#allocation2 + $0x10] sm:$0xf] }
  0x63   : > { %4403 = vset.pattern.permute.xlu1 %v8142_v50 }
  0x64   : > { %1416 = vperm.xlu1 %4403, %v4693_v26  }
  0x68   : > { %4404 = vset.pattern.permute.xlu1 %v8140_v51 }
  0x69   : > { %1442 = vperm.xlu1 %4404, %v4693_v26  }
  0x6d   : > { %4405 = vset.pattern.permute.xlu1 %v8166_v52 }
  0x6e   : > { %1468 = vperm.xlu1 %4405, %v4693_v26  }
  0x72   : > { %4406 = vset.pattern.permute.xlu1 %v8138_v53 }
  0x73   : > { %1494 = vperm.xlu1 %4406, %v4693_v26  }
  0x77   : > { %4407 = vset.pattern.permute.xlu1 %v8136_v54 }
  0x78   : > { %1520 = vperm.xlu1 %4407, %v4693_v26  }
  0x7c   : > { %4408 = vset.pattern.permute.xlu1 %v8162_v55 }
  0x7d   : > { %1547 = vperm.xlu1 %4408, %v4693_v26  }
  0x81   : > { %4409 = vset.pattern.permute.xlu1 %v8134_v56 }
  0x82   : > { %1573 = vperm.xlu1 %4409, %v4693_v26  }
  0x86   : > { %4410 = vset.pattern.permute.xlu1 %v8132_v57 }
  0x87   : > { %1599 = vperm.xlu1 %4410, %v4693_v26   ;;  %v4765_v58 = vpop.permute.xlu0 %363  ;;  %v368_v59 = vpop.permute.xlu1 %367 }
  0x88   : > { %8312 = vst [vmem:[#allocation6_spill] sm:$0xff] %v4765_v58 }
  0x8b   : > { %4411 = vset.pattern.permute.xlu1 %v8158_v61  ;;  %v366_v62 = vpop.permute.xlu0 %365  ;;  %v4773_v9 = vpop.permute.xlu1 %429 }
  0x8c   : > { %v4769_v63 = vsel %vm369_vm1, %v366_v62, %v368_v59  ;;  %1625 = vperm.xlu1 %4411, %v4693_v26   ;;  %8314 = vst [vmem:[#allocation8_spill] sm:$0xff] %v4773_v9  ;;  %v441_v17 = vmul.f32 %v4773_v9, %v415_v10  ;;  %v4801_v27 = vsel %vm369_vm1, %v4765_v58, %v366_v62 }
  0x8d   : > { %8313 = vst [vmem:[#allocation7_spill] sm:$0xff] %v4769_v63  ;;  %v377_v0 = vmul.f32 %v4769_v63, %v349_v60  ;;  %8317 = vst [vmem:[#allocation11_spill] sm:$0xff] %v4801_v27  ;;  %v375_v59 = vmul.f32 %v4765_v58, %v347_v8 }
  0x8f   : > { %v432_v11 = vpop.permute.xlu0 %431  ;;  %384 = vrot.lane.b32.xlu0 %v377_v0, %s4501_s16  ;;  %v4786_v22 = vpop.permute.xlu1 %433  ;;  %v376_v0 = vmul.f32 %v4801_v27, %v348_v49 }
  0x90   : > { %v4778_v12 = vsel %vm390_vm2, %v4773_v9, %v432_v11  ;;  %4413 = vset.pattern.permute.xlu1 %v8128_v13  ;;  %8316 = vst [vmem:[#allocation10_spill] sm:$0xff] %v4786_v22  ;;  %v4811_v10 = vsel %vm390_vm2, %v432_v11, %v4786_v22  ;;  %v345_v9 = vmul.f32 %v343_v3, %v4651_v14 }
  0x91   : > { %8315 = vst [vmem:[#allocation9_spill] sm:$0xff] %v4778_v12  ;;  %v442_v18 = vmul.f32 %v4778_v12, %v347_v8  ;;  %1678 = vperm.xlu1 %4413, %v4693_v26   ;;  %8318 = vst [vmem:[#allocation12_spill] sm:$0xff] %v4811_v10  ;;  %v381_v62 = vcombine.low %v375_v59, %v376_v0  ;;  %v8117_v0 = vmov 9   ;;  %v346_v12 = vmul.f32 %v4920_v39, %v4658_v16 }
  0x93   : > { %v449_v19 = vcombine.low %v441_v17, %v442_v18  ;;  %v4803_v47 = vpop.permute.xlu1 %507  ;;  %v444_v18 = vmul.f32 %v4786_v22, %v349_v60  ;;  %v8118_v60 = vmov 8   ;;  %v396_v22 = vsub.f32 1.0, %v4625_v7 }
  0x95   : > { %4414 = vset.pattern.permute.xlu1 %v8154_v20  ;;  %451 = vrot.lane.b32.xlu0 %v449_v19, %s4500_s11  ;;  %v443_v19 = vmul.f32 %v4811_v10, %v348_v49  ;;  %v4930_v27 = vrot.slane %v396_v22, %v4617_v5  ;;  %v4933_v63 = vrot.slane %v396_v22, %v4620_v6 }
  0x96   : > { %1704 = vperm.xlu1 %4414, %v4693_v26   ;;  %v4937_v7 = vrot.slane %v396_v22, %v4614_v4 }
  0x97   : > { %v4813_v17 = vpop.permute.xlu1 %570  ;;  %v450_v11 = vcombine.low %v443_v19, %v444_v18  ;;  %v8124_v19 = vmov 10   ;;  %8338 = vst [vmem:[#allocation32_spill] sm:$0xff] %v4930_v27  ;;  %8339 = vst [vmem:[#allocation33_spill] sm:$0xff] %v4933_v63  ;;  %v411_v16 = vcombine.low %v4930_v27, %v4933_v63 }
  0x98   : > { %8319 = vst [vmem:[#allocation13_spill] sm:$0xff] %v4813_v17  ;;  %8340 = vst [vmem:[#allocation34_spill] sm:$0xff] %v4937_v7 }
  0x99   : > { %1897 = vperm.xlu0 %4418, %v1791_v24  }
  0x9a   : > { %1748 = vrot.lane.b32.xlu1 %v1741_v23, %s4524_s9  ;;  %v8119_v23 = vmov 7  }
  0x9b   : > { %4415 = vset.pattern.permute.xlu1 %v8150_v1  ;;  %v4821_v8 = vpop.permute.xlu1 %574 }
  0x9c   : > { %8320 = vst [vmem:[#allocation14_spill] sm:$0xff] %v4821_v8 }
  0x9d   : > { %4419 = vset.pattern.permute.xlu0 %v8120_v44 }
  0x9e   : > { %1787 = vperm.xlu1 %4415, %v1784_v25   ;;  %823 = vperm.xlu0 %4419, %v4693_v26  }
  0xa2   : > { %4416 = vset.pattern.permute.xlu1 %v8127_v28  ;;  %1992 = vperm.xlu0 %4419, %v1791_v24  }
  0xa3   : > { %1829 = vperm.xlu1 %4416, %v1791_v24  }
  0xa6   : > { %4422 = vset.pattern.permute.xlu0 %v8119_v23 }
  0xa7   : > { %382 = vrot.lane.b32.xlu1 %v381_v62, %s4501_s16  ;;  %854 = vperm.xlu0 %4422, %v4693_v26  }
  0xa8   : > { %4417 = vset.pattern.permute.xlu1 %v8126_v29 }
  0xab   : > { %453 = vrot.lane.b32.xlu1 %v450_v11, %s4500_s11  ;;  %2023 = vperm.xlu0 %4422, %v1791_v24   ;;  %s4541_s11 = smov 127  }
  0xac   : > { %v4825_v25 = vpop.permute.xlu1 %622 }
  0xaf   : > { %4423 = vset.pattern.permute.xlu0 %v8118_v60  ;;  %1863 = vperm.xlu1 %4417, %v1791_v24   ;;  %v4848_v60 = vpop.permute.xlu0 %505 }
  0xb0   : > { %885 = vperm.xlu0 %4423, %v4693_v26   ;;  %8321 = vst [vmem:[#allocation15_spill] sm:$0xff] %v4848_v60 }
  0xb1   : > { %v4829_v49 = vpop.permute.xlu1 %657 }
  0xb3   : > { %4420 = vset.pattern.permute.xlu1 %v8122_v32  ;;  %v4852_v44 = vpop.permute.xlu0 %509 }
  0xb4   : > { %2054 = vperm.xlu0 %4423, %v1791_v24   ;;  %1930 = vperm.xlu1 %4420, %v1791_v24  }
  0xb6   : > { %v4832_v59 = vpop.permute.xlu1 %727 }
  0xb8   : > { %4424 = vset.pattern.permute.xlu0 %v8117_v0  ;;  %4421 = vset.pattern.permute.xlu1 %v8123_v31 }
  0xb9   : > { %916 = vperm.xlu0 %4424, %v4693_v26   ;;  %1961 = vperm.xlu1 %4421, %v1791_v24  }
  0xbb   : > { %v4837_v62 = vpop.permute.xlu1 %760 }
  0xbd   : > { %2085 = vperm.xlu0 %4424, %v1791_v24   ;;  %4427 = vset.pattern.permute.xlu1 %v8121_v35  ;;  %v4856_v35 = vpop.permute.xlu0 %572 }
  0xc0   : > { %v4840_v18 = vpop.permute.xlu1 %1181 }
  0xc1   : > { %4425 = vset.pattern.permute.xlu0 %v8124_v19  ;;  %v4860_v31 = vpop.permute.xlu0 %614 }
  0xc2   : > { %947 = vperm.xlu0 %4425, %v4693_v26  }
  0xc5   : > { %v4844_v11 = vpop.permute.xlu1 %1225  ;;  %v4864_v26 = vpop.permute.xlu0 %692 }
  0xc9   : > { %v4868_v29 = vpop.permute.xlu0 %792 }
  0xca   : > { %v4846_v0 = vpop.permute.xlu1 %1269 }
  0xcd   : > { %v4874_v46 = vpop.permute.xlu0 %978 }
  0xcf   : > { %v4850_v23 = vpop.permute.xlu1 %1311 }
  0xd1   : > { %v4878_v56 = vpop.permute.xlu0 %1009 }
  0xd4   : > { %v4854_v24 = vpop.permute.xlu1 %1338 }
  0xd5   : > { %v4882_v53 = vpop.permute.xlu0 %1041 }
  0xd9   : > { %v4858_v32 = vpop.permute.xlu1 %1364  ;;  %v4886_v50 = vpop.permute.xlu0 %1072 }
  0xdd   : > { %v4890_v42 = vpop.permute.xlu0 %1103 }
  0xde   : > { %v4862_v19 = vpop.permute.xlu1 %1390 }
  0xe1   : > { %v4896_v36 = vpop.permute.xlu0 %1136 }
  0xe3   : > { %v4866_v30 = vpop.permute.xlu1 %1416 }
  0xe5   : > { %v4900_v43 = vpop.permute.xlu0 %1652 }
  0xe6   : > { %8328 = vst [vmem:[#allocation22_spill] sm:$0xff] %v4900_v43 }
  0xe8   : > { %v4870_v28 = vpop.permute.xlu1 %1442 }
  0xe9   : > { %v4904_v41 = vpop.permute.xlu0 %1746 }
  0xea   : > { %8330 = vst [vmem:[#allocation24_spill] sm:$0xff] %v4904_v41 }
  0xed   : > { %v4872_v13 = vpop.permute.xlu1 %1468  ;;  %v4911_v48 = vpop.permute.xlu0 %1750 }
  0xee   : > { %8333 = vst [vmem:[#allocation27_spill] sm:$0xff] %v4911_v48 }
  0xf2   : > { %v4876_v57 = vpop.permute.xlu1 %1494 }
  0xf7   : > { %v4880_v54 = vpop.permute.xlu1 %1520 }
  0xf8   : > { %8322 = vst [vmem:[#allocation16_spill] sm:$0xff] %v4880_v54 }
  0xfc   : > { %v4884_v51 = vpop.permute.xlu1 %1547 }
  0xfd   : > { %8323 = vst [vmem:[#allocation17_spill] sm:$0xff] %v4884_v51 }
 0x101   : > { %v4888_v45 = vpop.permute.xlu1 %1573  ;;  %v385_v10 = vpop.permute.xlu0 %384 }
 0x102   : > { %8324 = vst [vmem:[#allocation18_spill] sm:$0xff] %v4888_v45  ;;  %v387_v58 = vrot.slane %v385_v10, 4  ;;  %v395_v40 = vadd.f32 %v385_v10, %v346_v12 }
 0x106   : > { %v4892_v38 = vpop.permute.xlu1 %1599 }
 0x107   : > { %8325 = vst [vmem:[#allocation19_spill] sm:$0xff] %v4892_v38  ;;  %v452_v34 = vpop.permute.xlu0 %451 }
 0x108   : > { %v455_v48 = vrot.slane %v452_v34, 4 }
 0x10b   : > { %v4894_v1 = vpop.permute.xlu1 %1625 }
 0x10c   : > { %8326 = vst [vmem:[#allocation20_spill] sm:$0xff] %v4894_v1 }
 0x110   : > { %v4898_v20 = vpop.permute.xlu1 %1678 }
 0x111   : > { %8327 = vst [vmem:[#allocation21_spill] sm:$0xff] %v4898_v20  ;;  %v414_v20 = vmul.f32 %v4937_v7, %v395_v40 }
 0x115   : > { %v4902_v61 = vpop.permute.xlu1 %1704 }
 0x116   : > { %8329 = vst [vmem:[#allocation23_spill] sm:$0xff] %v4902_v61 }
 0x119   : > { %v4906_v55 = vpop.permute.xlu1 %1748 }
 0x11a   : > { %8331 = vst [vmem:[#allocation25_spill] sm:$0xff] %v4906_v55 }
 0x11d   : > { %v4909_v52 = vpop.permute.xlu1 %1787 }
 0x11e   : > { %8332 = vst [vmem:[#allocation26_spill] sm:$0xff] %v4909_v52 }
 0x122   : > { %v4922_v33 = vpop.permute.xlu1 %1829 }
 0x123   : > { %8337 = vst [vmem:[#allocation31_spill] sm:$0xff] %v4922_v33 }
 0x126   : > { %v383_v37 = vpop.permute.xlu1 %382 }
 0x127   : > { %v386_v52 = vrot.slane %v383_v37, 4 }
 0x129   : > { %v389_v39 = vsel %vm388_vm3, %v386_v52, %v387_v58 }
 0x12a   : > { %v391_v33 = vsel %vm390_vm2, %v383_v37, %v389_v39  ;;  %v454_v55 = vpop.permute.xlu1 %453  ;;  %v4951_v39 = vsel %vm511_vm5, %v4803_v47, %v4852_v44 }
 0x12b   : > { %v394_v41 = vadd.f32 %v391_v33, %v345_v9  ;;  %v456_v61 = vrot.slane %v454_v55, 4  ;;  %v556_v33 = vld [vmem:[#allocation2] sm:$0xf]  ;;  %8341 = vst [vmem:[#allocation35_spill] sm:$0xff] %v4951_v39 }
 0x12d   : > { %v413_v14 = vmul.f32 %v411_v16, %v394_v41  ;;  %v457_v3 = vsel %vm388_vm3, %v455_v48, %v456_v61  ;;  %v459_v22 = vsel %vm369_vm1, %v454_v55, %v456_v61  ;;  %v582_v55 = vmul.f32 %v4813_v17, %v556_v33 }
 0x12e   : > { %v458_v12 = vsel %vm369_vm1, %v452_v34, %v457_v3  ;;  %v463_v10 = vadd.f32 %v459_v22, %v414_v20  ;;  %v4956_v34 = vsel %vm531_vm4, %v4813_v17, %v4856_v35  ;;  %v4964_v61 = vsel %vm511_vm5, %v4848_v60, %v4803_v47 }
 0x12f   : > { %v462_v43 = vadd.f32 %v458_v12, %v413_v14  ;;  %8342 = vst [vmem:[#allocation36_spill] sm:$0xff] %v4956_v34  ;;  %8343 = vst [vmem:[#allocation37_spill] sm:$0xff] %v4964_v61  ;;  %v4972_v16 = vsel %vm531_vm4, %v4856_v35, %v4821_v8  ;;  %v4979_v12 = vpop.permute.xlu0 %1897  ;;  %vm3053_vm1 = vcmask 875520  }
 0x130   : > { %469 = vst.msk [vmem:[#allocation2 + $0x18] sm:$0xf] %vm326_vm0, %v463_v10  ;;  %8344 = vst [vmem:[#allocation38_spill] sm:$0xff] %v4972_v16 }
 0x131   : > { %v465_v52 = vcombine.high %v462_v43, %v462_v43  ;;  %467 = vst [vmem:[#allocation2 + $0x8] sm:$0xf] %v462_v43  ;;  %8345 = vst [vmem:[#allocation39_spill] sm:$0xff] %v4979_v12 }
 0x133   : > { %468 = vst [vmem:[#allocation2 + $0x10] sm:$0xf] %v465_v52  ;;  %v4981_v52 = vpop.permute.xlu0 %823 }
 0x137   : > { %v491_v40 = vld [vmem:[#allocation2 + $0x18] sm:$0xf]  ;;  %v4983_v33 = vpop.permute.xlu0 %1992 }
 0x138   : > { %v519_v41 = vmul.f32 %v4951_v39, %v491_v40  ;;  %v489_v48 = vld [vmem:[#allocation2 + $0x8] sm:$0xf]  ;;  %v585_v47 = vmul.f32 %v4821_v8, %v491_v40  ;;  %8346 = vst [vmem:[#allocation40_spill] sm:$0xff] %v4983_v33  ;;  %v4995_v40 = vpop.permute.xlu1 %1863 }
 0x139   : > { %v583_v58 = vmul.f32 %v4956_v34, %v489_v48  ;;  %v517_v44 = vmul.f32 %v4848_v60, %v489_v48  ;;  %8349 = vst [vmem:[#allocation43_spill] sm:$0xff] %v4995_v40 }
 0x13a   : > { %526 = vrot.lane.b32.xlu0 %v519_v41, %s4504_s22  ;;  %v490_v9 = vld [vmem:[#allocation2 + $0x10] sm:$0xf] }
 0x13b   : > { %v590_v20 = vcombine.low %v582_v55, %v583_v58  ;;  %v518_v37 = vmul.f32 %v4964_v61, %v490_v9  ;;  %v584_v3 = vmul.f32 %v4972_v16, %v490_v9  ;;  %v4985_v35 = vpop.permute.xlu0 %854  ;;  %v537_v16 = vsub.f32 1.0, %v4674_v21 }
 0x13d   : > { %v523_v14 = vcombine.low %v517_v44, %v518_v37  ;;  %v591_v22 = vcombine.low %v584_v3, %v585_v47  ;;  %v470_v37 = vsub.f32 1.0, %v4656_v15  ;;  %v5019_v39 = vrot.slane %v537_v16, %v4617_v5 }
 0x13e   : > { %592 = vrot.lane.b32.xlu0 %v590_v20, %s4503_s21  ;;  %v4999_v20 = vpop.permute.xlu1 %1930  ;;  %v5022_v15 = vrot.slane %v537_v16, %v4620_v6 }
 0x13f   : > { %524 = vrot.lane.b32.xlu1 %v523_v14, %s4504_s22  ;;  %v4987_v41 = vpop.permute.xlu0 %2023  ;;  %8351 = vst [vmem:[#allocation45_spill] sm:$0xff] %v4999_v20  ;;  %v5007_v3 = vrot.slane %v470_v37, %v4617_v5  ;;  %v5010_v47 = vrot.slane %v470_v37, %v4620_v6  ;;  %8356 = vst [vmem:[#allocation50_spill] sm:$0xff] %v5019_v39 }
 0x140   : > { %8347 = vst [vmem:[#allocation41_spill] sm:$0xff] %v4987_v41  ;;  %8357 = vst [vmem:[#allocation51_spill] sm:$0xff] %v5022_v15 }
 0x141   : > { %8353 = vst [vmem:[#allocation47_spill] sm:$0xff] %v5007_v3  ;;  %8354 = vst [vmem:[#allocation48_spill] sm:$0xff] %v5010_v47  ;;  %v485_v34 = vcombine.low %v5007_v3, %v5010_v47  ;;  %v552_v47 = vcombine.low %v5019_v39, %v5022_v15 }
 0x142   : > { %v5004_v14 = vpop.permute.xlu1 %1961 }
 0x143   : > { %594 = vrot.lane.b32.xlu1 %v591_v22, %s4503_s21  ;;  %v4989_v48 = vpop.permute.xlu0 %885  ;;  %8352 = vst [vmem:[#allocation46_spill] sm:$0xff] %v5004_v14  ;;  %v5013_v22 = vrot.slane %v470_v37, %v4614_v4  ;;  %v5026_v37 = vrot.slane %v537_v16, %v4614_v4  ;;  %v487_v21 = vmul.f32 %v485_v34, %v462_v43 }
 0x145   : > { %8355 = vst [vmem:[#allocation49_spill] sm:$0xff] %v5013_v22  ;;  %v488_v61 = vmul.f32 %v5013_v22, %v463_v10  ;;  %8358 = vst [vmem:[#allocation52_spill] sm:$0xff] %v5026_v37 }
 0x147   : > { %v4991_v55 = vpop.permute.xlu0 %2054 }
 0x148   : > { %8348 = vst [vmem:[#allocation42_spill] sm:$0xff] %v4991_v55 }
 0x14b   : > { %v4993_v58 = vpop.permute.xlu0 %916 }
 0x14f   : > { %v4997_v9 = vpop.permute.xlu0 %2085 }
 0x150   : > { %8350 = vst [vmem:[#allocation44_spill] sm:$0xff] %v4997_v9 }
 0x153   : > { %v5001_v44 = vpop.permute.xlu0 %947 }
 0x1ac   : > { %v527_v8 = vpop.permute.xlu0 %526 }
 0x1ad   : > { %v529_v17 = vrot.slane %v527_v8, 4  ;;  %v536_v27 = vadd.f32 %v527_v8, %v488_v61 }
 0x1af   : > { %v555_v22 = vmul.f32 %v5026_v37, %v536_v27 }
 0x1b0   : > { %v593_v63 = vpop.permute.xlu0 %592 }
 0x1b1   : > { %v525_v60 = vpop.permute.xlu1 %524  ;;  %v596_v40 = vrot.slane %v593_v63, 4 }
 0x1b2   : > { %v528_v7 = vrot.slane %v525_v60, 4 }
 0x1b4   : > { %v530_v3 = vsel %vm388_vm3, %v528_v7, %v529_v17 }
 0x1b5   : > { %v532_v9 = vsel %vm531_vm4, %v525_v60, %v530_v3  ;;  %v595_v12 = vpop.permute.xlu1 %594  ;;  %v5038_v60 = vsub.s32 3, %v4606_v2 }
 0x1b6   : > { %v535_v41 = vadd.f32 %v532_v9, %v487_v21  ;;  %v597_v10 = vrot.slane %v595_v12, 4 }
 0x1b7   : > { %8359 = vst [vmem:[#allocation53_spill] sm:$0xff] %v5038_v60 }
 0x1b8   : > { %v554_v55 = vmul.f32 %v552_v47, %v535_v41  ;;  %v598_v16 = vsel %vm388_vm3, %v596_v40, %v597_v10  ;;  %v600_v8 = vsel %vm511_vm5, %v595_v12, %v597_v10 }
 0x1b9   : > { %v599_v43 = vsel %vm511_vm5, %v593_v63, %v598_v16  ;;  %v604_v34 = vadd.f32 %v600_v8, %v555_v22 }
 0x1ba   : > { %v603_v61 = vadd.f32 %v599_v43, %v554_v55 }
 0x1bb   : > { %610 = vst.msk [vmem:[#allocation2 + $0x18] sm:$0xf] %vm326_vm0, %v604_v34 }
 0x1bc   : > { %v606_v17 = vcombine.high %v603_v61, %v603_v61  ;;  %608 = vst [vmem:[#allocation2 + $0x8] sm:$0xf] %v603_v61 }
 0x1be   : > { %609 = vst [vmem:[#allocation2 + $0x10] sm:$0xf] %v606_v17 }
 0x1c5   : > { %v619_v7 = vld [vmem:[#allocation2] ss:$8 sm:$0xf]  ;;  %v655_v2 = vld [vmem:[#allocation2 + $0x1] ss:$8 sm:$0xf] }
 0x1c6   : > { %v5041_v27 = vrot.slane %v619_v7, %v4620_v6  ;;  %v5044_v41 = vrot.slane %v619_v7, %v4617_v5  ;;  %v5051_v55 = vrot.slane %v619_v7, %v5038_v60  ;;  %v5054_v40 = vrot.slane %v619_v7, %v4614_v4  ;;  %v690_v21 = vld [vmem:[#allocation2 + $0x2] ss:$8 sm:$0xf]  ;;  %v725_v43 = vld [vmem:[#allocation2 + $0x3] ss:$8 sm:$0xf] }
 0x1c7   : > { %v5063_v47 = vrot.slane %v655_v2, %v4617_v5  ;;  %v5066_v22 = vrot.slane %v655_v2, %v4614_v4  ;;  %v5075_v8 = vrot.slane %v655_v2, %v4620_v6  ;;  %v5087_v17 = vrot.slane %v655_v2, %v5038_v60 }
 0x1c8   : > { %v764_v63 = vmul.f32 %v4837_v62, %v5041_v27  ;;  %v763_v12 = vmul.f32 %v4837_v62, %v5044_v41  ;;  %v766_v9 = vmul.f32 %v4837_v62, %v5051_v55  ;;  %v765_v3 = vmul.f32 %v4837_v62, %v5054_v40 }
 0x1c9   : > { %v795_v10 = vmul.f32 %v4868_v29, %v5063_v47  ;;  %v797_v16 = vmul.f32 %v4868_v29, %v5066_v22  ;;  %v5078_v62 = vrot.slane %v690_v21, %v4614_v4  ;;  %v796_v34 = vmul.f32 %v4868_v29, %v5075_v8 }
 0x1ca   : > { %773 = vrot.lane.b32.xlu1 %v764_v63, %s4541_s11  ;;  %771 = vrot.lane.b32.xlu0 %v763_v12, %s4541_s11  ;;  %v5090_v7 = vrot.slane %v725_v43, %v4614_v4  ;;  %v798_v63 = vmul.f32 %v4868_v29, %v5087_v17  ;;  %v890_v2 = vmul.f32 %v4989_v48, %v5054_v40 }
 0x1cb   : > { %v828_v61 = vmul.f32 %v4981_v52, %v5078_v62  ;;  %v5111_v29 = vrot.slane %v690_v21, %v5038_v60  ;;  %v5125_v37 = vrot.slane %v725_v43, %v4620_v6  ;;  %v649_v39 = vmul.f32 %v5051_v55, %v4825_v25 }
 0x1cc   : > { %v859_v12 = vmul.f32 %v4985_v35, %v5090_v7  ;;  %v681_v15 = vmul.f32 %v5063_v47, %v4829_v49  ;;  %v647_v14 = vmul.f32 %v5041_v27, %v4825_v25  ;;  %v682_v38 = vmul.f32 %v5075_v8, %v4829_v49 }
 0x1cd   : > { %v719_v51 = vmul.f32 %v5111_v29, %v4864_v26  ;;  %v683_v54 = vmul.f32 %v5066_v22, %v4829_v49 }
 0x1ce   : > { %777 = vrot.lane.b32.xlu1 %v766_v9, %s4541_s11  ;;  %775 = vrot.lane.b32.xlu0 %v765_v3, %s4541_s11  ;;  %v5099_v9 = vrot.slane %v690_v21, %v4617_v5  ;;  %v5102_v3 = vrot.slane %v690_v21, %v4620_v6  ;;  %v5128_v21 = vrot.slane %v725_v43, %v5038_v60 }
 0x1cf   : > { %v684_v60 = vmul.f32 %v5087_v17, %v4829_v49  ;;  %v829_v49 = vmul.f32 %v4981_v52, %v5111_v29 }
 0x1d0   : > { %v716_v20 = vmul.f32 %v5099_v9, %v4864_v26 }
 0x1d2   : > { %803 = vrot.lane.b32.xlu1 %v795_v10, %s4541_s11  ;;  %807 = vrot.lane.b32.xlu0 %v797_v16, %s4541_s11  ;;  %v921_v10 = vmul.f32 %v4993_v58, %v5066_v22  ;;  %v826_v16 = vmul.f32 %v4981_v52, %v5099_v9 }
 0x1d6   : > { %805 = vrot.lane.b32.xlu1 %v796_v34, %s4541_s11  ;;  %838 = vrot.lane.b32.xlu0 %v828_v61, %s4541_s11  ;;  %v952_v34 = vmul.f32 %v5001_v44, %v5078_v62  ;;  %v5118_v61 = vrot.slane %v725_v43, %v4617_v5  ;;  %v653_v43 = vadd.f32 %v649_v39, %v4860_v31 }
 0x1d8   : > { %v688_v45 = vadd.f32 %v684_v60, %v653_v43  ;;  %v754_v60 = vmul.f32 %v5128_v21, %v4832_v59 }
 0x1da   : > { %809 = vrot.lane.b32.xlu1 %v798_v63, %s4541_s11  ;;  %869 = vrot.lane.b32.xlu0 %v859_v12, %s4541_s11  ;;  %v646_v63 = vmul.f32 %v5044_v41, %v4825_v25  ;;  %v827_v12 = vmul.f32 %v4981_v52, %v5102_v3  ;;  %v983_v52 = vmul.f32 %v4874_v46, %v5090_v7 }
 0x1dc   : > { %v650_v33 = vadd.f32 %v646_v63, %v4860_v31  ;;  %v651_v63 = vadd.f32 %v647_v14, %v4860_v31  ;;  %v717_v14 = vmul.f32 %v5102_v3, %v4864_v26 }
 0x1de   : > { %834 = vrot.lane.b32.xlu1 %v826_v16, %s4541_s11  ;;  %900 = vrot.lane.b32.xlu0 %v890_v2, %s4504_s22  ;;  %v648_v16 = vmul.f32 %v5054_v40, %v4825_v25  ;;  %v751_v2 = vmul.f32 %v5118_v61, %v4832_v59  ;;  %v685_v1 = vadd.f32 %v681_v15, %v650_v33 }
 0x1df   : > { %v686_v33 = vadd.f32 %v682_v38, %v651_v63  ;;  %v723_v15 = vadd.f32 %v719_v51, %v688_v45  ;;  %v753_v45 = vmul.f32 %v5090_v7, %v4832_v59  ;;  %v888_v63 = vmul.f32 %v4989_v48, %v5044_v41 }
 0x1e0   : > { %v652_v39 = vadd.f32 %v648_v16, %v4860_v31  ;;  %v720_v25 = vadd.f32 %v716_v20, %v685_v1  ;;  %v718_v31 = vmul.f32 %v5078_v62, %v4864_v26  ;;  %v752_v1 = vmul.f32 %v5125_v37, %v4832_v59 }
 0x1e1   : > { %v5170_v38 = vadd.f32 %v754_v60, %v723_v15  ;;  %v857_v26 = vmul.f32 %v4985_v35, %v5118_v61  ;;  %v858_v59 = vmul.f32 %v4985_v35, %v5125_v37 }
 0x1e2   : > { %836 = vrot.lane.b32.xlu1 %v827_v12, %s4541_s11  ;;  %931 = vrot.lane.b32.xlu0 %v921_v10, %s4504_s22  ;;  %v687_v43 = vadd.f32 %v683_v54, %v652_v39  ;;  %v5166_v16 = vadd.f32 %v751_v2, %v720_v25  ;;  %v721_v12 = vadd.f32 %v717_v14, %v686_v33  ;;  %v5202_v39 = vld [vmem:[#allocation2 + $0x8] ss:$8 sm:$0x7]  ;;  %v5214_v33 = vld [vmem:[#allocation2 + $0x9] ss:$8 sm:$0x7] }
 0x1e3   : > { %v1014_v10 = vmul.f32 %v4878_v56, %v5054_v40  ;;  %v1046_v2 = vmul.f32 %v4882_v53, %v5066_v22  ;;  %v1077_v40 = vmul.f32 %v4886_v50, %v5078_v62  ;;  %v1108_v22 = vmul.f32 %v4890_v42, %v5090_v7 }
 0x1e4   : > { %v722_v20 = vadd.f32 %v718_v31, %v687_v43  ;;  %v5176_v51 = vadd.f32 %v752_v1, %v721_v12  ;;  %v5212_v25 = vrot.slane %v5202_v39, %v4614_v4  ;;  %v891_v62 = vmul.f32 %v4989_v48, %v5051_v55  ;;  %v5236_v43 = vld [vmem:[#allocation2 + $0xa] ss:$8 sm:$0x7] }
 0x1e5   : > { %v5224_v15 = vrot.slane %v5214_v33, %v4617_v5  ;;  %v919_v7 = vmul.f32 %v4993_v58, %v5063_v47  ;;  %v920_v31 = vmul.f32 %v4993_v58, %v5075_v8  ;;  %v5246_v12 = vrot.slane %v5236_v43, %v4617_v5 }
 0x1e6   : > { %840 = vrot.lane.b32.xlu1 %v829_v49, %s4541_s11  ;;  %962 = vrot.lane.b32.xlu0 %v952_v34, %s4504_s22  ;;  %v5178_v54 = vadd.f32 %v753_v45, %v722_v20  ;;  %v860_v34 = vmul.f32 %v4985_v35, %v5128_v21  ;;  %v889_v35 = vmul.f32 %v4989_v48, %v5041_v27 }
 0x1e7   : > { %v1157_v14 = vmul.f32 %v5212_v25, %v4896_v36  ;;  %v1200_v60 = vmul.f32 %v5224_v15, %v4840_v18  ;;  %v5234_v48 = vrot.slane %v5214_v33, %v4614_v4  ;;  %v922_v1 = vmul.f32 %v4993_v58, %v5087_v17 }
 0x1e8   : > { %v1244_v20 = vmul.f32 %v5246_v12, %v4844_v11  ;;  %v5256_v45 = vrot.slane %v5236_v43, %v4614_v4 }
 0x1e9   : > { %v1202_v49 = vmul.f32 %v5234_v48, %v4840_v18 }
 0x1ea   : > { %865 = vrot.lane.b32.xlu1 %v857_v26, %s4541_s11  ;;  %993 = vrot.lane.b32.xlu0 %v983_v52, %s4504_s22  ;;  %v5258_v26 = vld [vmem:[#allocation2 + $0xb] ss:$8 sm:$0x7]  ;;  %v950_v52 = vmul.f32 %v5001_v44, %v5099_v9 }
 0x1eb   : > { %v5268_v58 = vrot.slane %v5258_v26, %v4617_v5 }
 0x1ee   : > { %867 = vrot.lane.b32.xlu1 %v858_v59, %s4541_s11  ;;  %1024 = vrot.lane.b32.xlu0 %v1014_v10, %s4542_s17  ;;  %v1246_v59 = vmul.f32 %v5256_v45, %v4844_v11  ;;  %v951_v10 = vmul.f32 %v5001_v44, %v5102_v3 }
 0x1f2   : > { %871 = vrot.lane.b32.xlu1 %v860_v34, %s4541_s11  ;;  %1056 = vrot.lane.b32.xlu0 %v1046_v2, %s4542_s17  ;;  %v1288_v34 = vmul.f32 %v5268_v58, %v4846_v0  ;;  %v5278_v2 = vrot.slane %v5258_v26, %v4614_v4 }
 0x1f6   : > { %896 = vrot.lane.b32.xlu1 %v888_v63, %s4504_s22  ;;  %1087 = vrot.lane.b32.xlu0 %v1077_v40, %s4542_s17  ;;  %v953_v63 = vmul.f32 %v5001_v44, %v5111_v29  ;;  %v1290_v40 = vmul.f32 %v5278_v2, %v4846_v0  ;;  %v982_v44 = vmul.f32 %v4874_v46, %v5125_v37 }
 0x1fa   : > { %898 = vrot.lane.b32.xlu1 %v889_v35, %s4504_s22  ;;  %1118 = vrot.lane.b32.xlu0 %v1108_v22, %s4542_s17  ;;  %v5288_v35 = vrot.slane %v5202_v39, %v4617_v5  ;;  %v981_v22 = vmul.f32 %v4874_v46, %v5118_v61 }
 0x1fe   : > { %902 = vrot.lane.b32.xlu1 %v891_v62, %s4504_s22  ;;  %1165 = vrot.lane.b32.xlu0 %v1157_v14, %s4524_s9  ;;  %v1314_v62 = vmul.f32 %v4850_v23, %v5288_v35  ;;  %v1316_v14 = vmul.f32 %v4850_v23, %v5212_v25 }
 0x202   : > { %927 = vrot.lane.b32.xlu1 %v919_v7, %s4504_s22  ;;  %1206 = vrot.lane.b32.xlu0 %v1200_v60, %s4524_s9  ;;  %v984_v7 = vmul.f32 %v4874_v46, %v5128_v21  ;;  %v1341_v60 = vmul.f32 %v4854_v24, %v5224_v15  ;;  %v1013_v46 = vmul.f32 %v4878_v56, %v5041_v27 }
 0x203   : > { %v1044_v27 = vmul.f32 %v4882_v53, %v5063_v47  ;;  %v1047_v47 = vmul.f32 %v4882_v53, %v5087_v17 }
 0x206   : > { %929 = vrot.lane.b32.xlu1 %v920_v31, %s4504_s22  ;;  %1210 = vrot.lane.b32.xlu0 %v1202_v49, %s4524_s9  ;;  %v1012_v31 = vmul.f32 %v4878_v56, %v5044_v41  ;;  %v1343_v49 = vmul.f32 %v4854_v24, %v5234_v48  ;;  %v1015_v41 = vmul.f32 %v4878_v56, %v5051_v55 }
 0x207   : > { %v1045_v56 = vmul.f32 %v4882_v53, %v5075_v8  ;;  %v1395_v55 = vmul.f32 %v4862_v19, %v5278_v2 }
 0x20a   : > { %933 = vrot.lane.b32.xlu1 %v922_v1, %s4504_s22  ;;  %1250 = vrot.lane.b32.xlu0 %v1244_v20, %s4524_s9  ;;  %v1367_v1 = vmul.f32 %v4858_v32, %v5246_v12  ;;  %v1369_v20 = vmul.f32 %v4858_v32, %v5256_v45 }
 0x20e   : > { %958 = vrot.lane.b32.xlu1 %v950_v52, %s4504_s22  ;;  %1254 = vrot.lane.b32.xlu0 %v1246_v59, %s4524_s9  ;;  %v1393_v52 = vmul.f32 %v4862_v19, %v5268_v58  ;;  %v1419_v59 = vmul.f32 %v4866_v30, %v5288_v35 }
 0x212   : > { %960 = vrot.lane.b32.xlu1 %v951_v10, %s4504_s22  ;;  %1294 = vrot.lane.b32.xlu0 %v1288_v34, %s4524_s9  ;;  %v1075_v34 = vmul.f32 %v4886_v50, %v5099_v9 }
 0x216   : > { %964 = vrot.lane.b32.xlu1 %v953_v63, %s4504_s22  ;;  %1298 = vrot.lane.b32.xlu0 %v1290_v40, %s4524_s9  ;;  %v1421_v63 = vmul.f32 %v4866_v30, %v5212_v25  ;;  %v1076_v40 = vmul.f32 %v4886_v50, %v5102_v3 }
 0x21a   : > { %989 = vrot.lane.b32.xlu1 %v981_v22, %s4504_s22  ;;  %1320 = vrot.lane.b32.xlu0 %v1314_v62, %s4543_s18  ;;  %v1445_v22 = vmul.f32 %v4870_v28, %v5224_v15 }
 0x21e   : > { %991 = vrot.lane.b32.xlu1 %v982_v44, %s4504_s22  ;;  %1324 = vrot.lane.b32.xlu0 %v1316_v14, %s4543_s18  ;;  %v1078_v44 = vmul.f32 %v4886_v50, %v5111_v29  ;;  %v1447_v14 = vmul.f32 %v4870_v28, %v5234_v48 }
 0x222   : > { %995 = vrot.lane.b32.xlu1 %v984_v7, %s4504_s22  ;;  %1347 = vrot.lane.b32.xlu0 %v1341_v60, %s4543_s18  ;;  %v1106_v60 = vmul.f32 %v4890_v42, %v5118_v61 }
 0x226   : > { %1020 = vrot.lane.b32.xlu1 %v1012_v31, %s4542_s17  ;;  %1351 = vrot.lane.b32.xlu0 %v1343_v49, %s4543_s18  ;;  %v1471_v31 = vmul.f32 %v4872_v13, %v5246_v12  ;;  %v1107_v49 = vmul.f32 %v4890_v42, %v5125_v37 }
 0x22a   : > { %1022 = vrot.lane.b32.xlu1 %v1013_v46, %s4542_s17  ;;  %1373 = vrot.lane.b32.xlu0 %v1367_v1, %s4543_s18  ;;  %v1473_v46 = vmul.f32 %v4872_v13, %v5256_v45 }
 0x22e   : > { %1026 = vrot.lane.b32.xlu1 %v1015_v41, %s4542_s17  ;;  %1377 = vrot.lane.b32.xlu0 %v1369_v20, %s4543_s18  ;;  %v1109_v41 = vmul.f32 %v4890_v42, %v5128_v21  ;;  %v1497_v20 = vmul.f32 %v4876_v57, %v5268_v58  ;;  %v5416_v42 = vrot.slane %v5202_v39, %v4620_v6 }
 0x232   : > { %1052 = vrot.lane.b32.xlu1 %v1044_v27, %s4542_s17  ;;  %1399 = vrot.lane.b32.xlu0 %v1393_v52, %s4543_s18  ;;  %v1155_v52 = vmul.f32 %v5288_v35, %v4896_v36 }
 0x236   : > { %1054 = vrot.lane.b32.xlu1 %v1045_v56, %s4542_s17  ;;  %1403 = vrot.lane.b32.xlu0 %v1395_v55, %s4543_s18  ;;  %v1499_v56 = vmul.f32 %v4876_v57, %v5278_v2 }
 0x23a   : > { %1058 = vrot.lane.b32.xlu1 %v1047_v47, %s4542_s17  ;;  %1425 = vrot.lane.b32.xlu0 %v1419_v59, %s4501_s16  ;;  %v1156_v47 = vmul.f32 %v5416_v42, %v4896_v36  ;;  %v8364_v59 = vld [vmem:[#allocation16_spill] sm:$0xff] }
 0x23b   : > { %v1525_v36 = vmul.f32 %v8364_v59, %v5212_v25 }
 0x23c   : > { %v5346_v10 = vpop.permute.xlu1 %773  ;;  %v5348_v8 = vpop.permute.xlu0 %771 }
 0x23e   : > { %1083 = vrot.lane.b32.xlu1 %v1075_v34, %s4542_s17  ;;  %1429 = vrot.lane.b32.xlu0 %v1421_v63, %s4501_s16  ;;  %v1523_v34 = vmul.f32 %v8364_v59, %v5288_v35  ;;  %v5430_v63 = vrot.slane %v5214_v33, %v4620_v6 }
 0x240   : > { %v5356_v53 = vpop.permute.xlu1 %777  ;;  %v5358_v17 = vpop.permute.xlu0 %775 }
 0x242   : > { %1085 = vrot.lane.b32.xlu1 %v1076_v40, %s4542_s17  ;;  %1451 = vrot.lane.b32.xlu0 %v1445_v22, %s4501_s16  ;;  %v1201_v22 = vmul.f32 %v5430_v63, %v4840_v18  ;;  %v8367_v18 = vld [vmem:[#allocation17_spill] sm:$0xff] }
 0x244   : > { %v5366_v9 = vpop.permute.xlu1 %803  ;;  %v5368_v62 = vpop.permute.xlu0 %807 }
 0x246   : > { %1089 = vrot.lane.b32.xlu1 %v1078_v44, %s4542_s17  ;;  %1455 = vrot.lane.b32.xlu0 %v1447_v14, %s4501_s16  ;;  %v5444_v44 = vrot.slane %v5236_v43, %v4620_v6 }
 0x248   : > { %v5376_v3 = vpop.permute.xlu1 %805  ;;  %v5378_v7 = vpop.permute.xlu0 %838 }
 0x24a   : > { %1114 = vrot.lane.b32.xlu1 %v1106_v60, %s4542_s17  ;;  %1477 = vrot.lane.b32.xlu0 %v1471_v31, %s4501_s16  ;;  %v1245_v60 = vmul.f32 %v5444_v44, %v4844_v11  ;;  %v1550_v31 = vmul.f32 %v8367_v18, %v5224_v15  ;;  %v1552_v11 = vmul.f32 %v8367_v18, %v5234_v48 }
 0x24c   : > { %v5386_v50 = vpop.permute.xlu1 %809  ;;  %v5388_v29 = vpop.permute.xlu0 %869 }
 0x24d   : > { %8360 = vst [vmem:[#allocation54_spill] sm:$0xff] %v5388_v29  ;;  %v8399_v29 = vmov 18  }
 0x24e   : > { %1116 = vrot.lane.b32.xlu1 %v1107_v49, %s4542_s17  ;;  %1481 = vrot.lane.b32.xlu0 %v1473_v46, %s4501_s16  ;;  %v5458_v49 = vrot.slane %v5258_v26, %v4620_v6 }
 0x250   : > { %v5396_v61 = vpop.permute.xlu1 %834  ;;  %v5398_v1 = vpop.permute.xlu0 %900 }
 0x251   : > { %8361 = vst [vmem:[#allocation55_spill] sm:$0xff] %v5398_v1 }
 0x252   : > { %1120 = vrot.lane.b32.xlu1 %v1109_v41, %s4542_s17  ;;  %1503 = vrot.lane.b32.xlu0 %v1497_v20, %s4501_s16  ;;  %v1289_v41 = vmul.f32 %v5458_v49, %v4846_v0 }
 0x254   : > { %v5406_v37 = vpop.permute.xlu1 %836  ;;  %v5408_v27 = vpop.permute.xlu0 %931 }
 0x255   : > { %8362 = vst [vmem:[#allocation56_spill] sm:$0xff] %v5408_v27 }
 0x256   : > { %1161 = vrot.lane.b32.xlu1 %v1155_v52, %s4524_s9  ;;  %1507 = vrot.lane.b32.xlu0 %v1499_v56, %s4501_s16  ;;  %v1315_v52 = vmul.f32 %v4850_v23, %v5416_v42  ;;  %v8370_v56 = vld [vmem:[#allocation18_spill] sm:$0xff] }
 0x258   : > { %v5420_v21 = vpop.permute.xlu1 %840  ;;  %v5422_v55 = vpop.permute.xlu0 %962 }
 0x259   : > { %8363 = vst [vmem:[#allocation57_spill] sm:$0xff] %v5422_v55  ;;  %v780_v55 = vsel %vm779_vm6, %v5348_v8, %v5346_v10 }
 0x25a   : > { %1163 = vrot.lane.b32.xlu1 %v1156_v47, %s4524_s9  ;;  %1529 = vrot.lane.b32.xlu0 %v1523_v34, %s4544_s19  ;;  %v1576_v47 = vmul.f32 %v8370_v56, %v5246_v12 }
 0x25c   : > { %v5434_v39 = vpop.permute.xlu1 %865  ;;  %v5436_v40 = vpop.permute.xlu0 %993 }
 0x25d   : > { %8365 = vst [vmem:[#allocation16_spill] sm:$0xff] %v5436_v40  ;;  %v8383_v40 = vmov 14  }
 0x25e   : > { %1208 = vrot.lane.b32.xlu1 %v1201_v22, %s4524_s9  ;;  %1533 = vrot.lane.b32.xlu0 %v1525_v36, %s4544_s19  ;;  %v1342_v22 = vmul.f32 %v4854_v24, %v5430_v63  ;;  %v1578_v36 = vmul.f32 %v8370_v56, %v5256_v45 }
 0x260   : > { %v5448_v33 = vpop.permute.xlu1 %867  ;;  %v5450_v14 = vpop.permute.xlu0 %1024 }
 0x261   : > { %8366 = vst [vmem:[#allocation58_spill] sm:$0xff] %v5450_v14 }
 0x262   : > { %1252 = vrot.lane.b32.xlu1 %v1245_v60, %s4524_s9  ;;  %1556 = vrot.lane.b32.xlu0 %v1550_v31, %s4544_s19  ;;  %v1368_v31 = vmul.f32 %v4858_v32, %v5444_v44 }
 0x264   : > { %v5462_v43 = vpop.permute.xlu1 %871  ;;  %v5464_v46 = vpop.permute.xlu0 %1056 }
 0x265   : > { %8368 = vst [vmem:[#allocation17_spill] sm:$0xff] %v5464_v46 }
 0x266   : > { %1296 = vrot.lane.b32.xlu1 %v1289_v41, %s4524_s9  ;;  %1560 = vrot.lane.b32.xlu0 %v1552_v11, %s4544_s19  ;;  %v8373_v41 = vld [vmem:[#allocation19_spill] sm:$0xff] }
 0x267   : > { %v1602_v11 = vmul.f32 %v8373_v41, %v5268_v58 }
 0x268   : > { %v5472_v26 = vpop.permute.xlu1 %896  ;;  %v5474_v20 = vpop.permute.xlu0 %1087 }
 0x269   : > { %8369 = vst [vmem:[#allocation59_spill] sm:$0xff] %v5474_v20 }
 0x26a   : > { %1322 = vrot.lane.b32.xlu1 %v1315_v52, %s4543_s18  ;;  %1582 = vrot.lane.b32.xlu0 %v1576_v47, %s4544_s19  ;;  %v1394_v47 = vmul.f32 %v4862_v19, %v5458_v49 }
 0x26c   : > { %v5482_v0 = vpop.permute.xlu1 %898  ;;  %v5484_v34 = vpop.permute.xlu0 %1118 }
 0x26d   : > { %8371 = vst [vmem:[#allocation18_spill] sm:$0xff] %v5482_v0  ;;  %8372 = vst [vmem:[#allocation60_spill] sm:$0xff] %v5484_v34 }
 0x26e   : > { %1349 = vrot.lane.b32.xlu1 %v1342_v22, %s4543_s18  ;;  %1586 = vrot.lane.b32.xlu0 %v1578_v36, %s4544_s19  ;;  %v1604_v22 = vmul.f32 %v8373_v41, %v5278_v2 }
 0x270   : > { %v5492_v23 = vpop.permute.xlu1 %902  ;;  %v5494_v60 = vpop.permute.xlu0 %1165 }
 0x272   : > { %1375 = vrot.lane.b32.xlu1 %v1368_v31, %s4543_s18  ;;  %1608 = vrot.lane.b32.xlu0 %v1602_v11, %s4544_s19  ;;  %v1420_v31 = vmul.f32 %v4866_v30, %v5416_v42  ;;  %v8374_v11 = vld [vmem:[#allocation20_spill] sm:$0xff] }
 0x273   : > { %v1628_v4 = vmul.f32 %v8374_v11, %v5288_v35  ;;  %v1630_v5 = vmul.f32 %v8374_v11, %v5212_v25  ;;  %v1629_v14 = vmul.f32 %v8374_v11, %v5416_v42 }
 0x274   : > { %v5502_v24 = vpop.permute.xlu1 %927  ;;  %v5504_v52 = vpop.permute.xlu0 %1206 }
 0x276   : > { %1401 = vrot.lane.b32.xlu1 %v1394_v47, %s4543_s18  ;;  %1612 = vrot.lane.b32.xlu0 %v1604_v22, %s4544_s19  ;;  %v1446_v22 = vmul.f32 %v4870_v28, %v5430_v63 }
 0x278   : > { %v5512_v32 = vpop.permute.xlu1 %929  ;;  %v5514_v36 = vpop.permute.xlu0 %1210 }
 0x27a   : > { %1427 = vrot.lane.b32.xlu1 %v1420_v31, %s4501_s16  ;;  %1634 = vrot.lane.b32.xlu0 %v1628_v4, %s4545_s20  ;;  %v1472_v4 = vmul.f32 %v4872_v13, %v5444_v44  ;;  %v8375_v31 = vld [vmem:[#allocation22_spill] sm:$0xff] }
 0x27b   : > { %v1656_v6 = vmul.f32 %v8375_v31, %v5430_v63 }
 0x27c   : > { %v5522_v19 = vpop.permute.xlu1 %933  ;;  %v5524_v47 = vpop.permute.xlu0 %1250 }
 0x27e   : > { %1453 = vrot.lane.b32.xlu1 %v1446_v22, %s4501_s16  ;;  %1638 = vrot.lane.b32.xlu0 %v1630_v5, %s4545_s20  ;;  %v1498_v5 = vmul.f32 %v4876_v57, %v5458_v49  ;;  %v8376_v22 = vld [vmem:[#allocation21_spill] sm:$0xff] }
 0x27f   : > { %v1681_v34 = vmul.f32 %v8376_v22, %v5246_v12 }
 0x280   : > { %v5532_v30 = vpop.permute.xlu1 %958  ;;  %v5534_v35 = vpop.permute.xlu0 %1254 }
 0x282   : > { %1479 = vrot.lane.b32.xlu1 %v1472_v4, %s4501_s16  ;;  %1663 = vrot.lane.b32.xlu0 %v1656_v6, %s4545_s20  ;;  %v1524_v6 = vmul.f32 %v8364_v59, %v5416_v42  ;;  %v1683_v4 = vmul.f32 %v8376_v22, %v5256_v45  ;;  %v1657_v42 = vmul.f32 %v8375_v31, %v5234_v48 }
 0x284   : > { %v5542_v28 = vpop.permute.xlu1 %960  ;;  %v5544_v25 = vpop.permute.xlu0 %1294 }
 0x286   : > { %1505 = vrot.lane.b32.xlu1 %v1498_v5, %s4501_s16  ;;  %1687 = vrot.lane.b32.xlu0 %v1681_v34, %s4545_s20  ;;  %v1551_v34 = vmul.f32 %v8367_v18, %v5430_v63  ;;  %v8378_v5 = vld [vmem:[#allocation23_spill] sm:$0xff] }
 0x287   : > { %v1708_v46 = vmul.f32 %v8378_v5, %v5458_v49  ;;  %v5582_v63 = vld [vmem:[%s8111_s3] sm:$0xf] }
 0x288   : > { %v5552_v13 = vpop.permute.xlu1 %964  ;;  %v5554_v20 = vpop.permute.xlu0 %1298 }
 0x289   : > { %8377 = vst [vmem:[#allocation19_spill] sm:$0xff] %v5554_v20  ;;  %v8398_v20 = vmov 35  }
 0x28a   : > { %1531 = vrot.lane.b32.xlu1 %v1524_v6, %s4544_s19  ;;  %1691 = vrot.lane.b32.xlu0 %v1683_v4, %s4545_s20  ;;  %v1577_v6 = vmul.f32 %v8370_v56, %v5444_v44 }
 0x28c   : > { %v5562_v57 = vpop.permute.xlu1 %989  ;;  %v5564_v12 = vpop.permute.xlu0 %1320 }
 0x28e   : > { %1558 = vrot.lane.b32.xlu1 %v1551_v34, %s4544_s19  ;;  %1715 = vrot.lane.b32.xlu0 %v1708_v46, %s4545_s20  ;;  %v1603_v46 = vmul.f32 %v8373_v41, %v5458_v49  ;;  %v8381_v34 = vmov 11   ;;  %v1655_v41 = vmul.f32 %v8375_v31, %v5224_v15 }
 0x290   : > { %v5572_v59 = vpop.permute.xlu1 %991  ;;  %v5574_v45 = vpop.permute.xlu0 %1324 }
 0x291   : > { %8379 = vst [vmem:[#allocation20_spill] sm:$0xff] %v5574_v45 }
 0x292   : > { %1584 = vrot.lane.b32.xlu1 %v1577_v6, %s4544_s19  ;;  %2116 = vperm.xlu0 %4425, %v5582_v63  }
 0x294   : > { %v5585_v18 = vpop.permute.xlu1 %995  ;;  %v5587_v4 = vpop.permute.xlu0 %1347 }
 0x295   : > { %8380 = vst [vmem:[#allocation22_spill] sm:$0xff] %v5587_v4 }
 0x296   : > { %1610 = vrot.lane.b32.xlu1 %v1603_v46, %s4544_s19  ;;  %4426 = vset.pattern.permute.xlu0 %v8381_v34 }
 0x297   : > { %2147 = vperm.xlu0 %4426, %v5582_v63  }
 0x298   : > { %v5594_v56 = vpop.permute.xlu1 %1020  ;;  %v5596_v6 = vpop.permute.xlu0 %1351 }
 0x299   : > { %8382 = vst [vmem:[#allocation21_spill] sm:$0xff] %v5596_v6  ;;  %v8394_v6 = vmov 15  }
 0x29a   : > { %1636 = vrot.lane.b32.xlu1 %v1629_v14, %s4545_s20  ;;  %v8385_v14 = vmov 17  }
 0x29b   : > { %4429 = vset.pattern.permute.xlu0 %v8383_v40  ;;  %v8387_v40 = vmov 20  }
 0x29c   : > { %v5602_v45 = vpop.permute.xlu1 %1022  ;;  %v5604_v49 = vpop.permute.xlu0 %1373  ;;  %2240 = vperm.xlu0 %4429, %v5582_v63  }
 0x29e   : > { %1661 = vrot.lane.b32.xlu1 %v1655_v41, %s4545_s20  ;;  %v1682_v41 = vmul.f32 %v8376_v22, %v5444_v44 }
 0x2a0   : > { %v5610_v46 = vpop.permute.xlu1 %1026  ;;  %v5612_v34 = vpop.permute.xlu0 %1377  ;;  %4432 = vset.pattern.permute.xlu0 %v8385_v14  ;;  %v8389_v14 = vmov 23  }
 0x2a1   : > { %8384 = vst [vmem:[#allocation23_spill] sm:$0xff] %v5612_v34  ;;  %2346 = vperm.xlu0 %4432, %v5582_v63  }
 0x2a2   : > { %1665 = vrot.lane.b32.xlu1 %v1657_v42, %s4545_s20  ;;  %v1707_v42 = vmul.f32 %v8378_v5, %v5268_v58  ;;  %v8392_v58 = vmov 13  }
 0x2a4   : > { %v5619_v11 = vpop.permute.xlu1 %1052  ;;  %v5621_v15 = vpop.permute.xlu0 %1399 }
 0x2a5   : > { %8386 = vst [vmem:[#allocation61_spill] sm:$0xff] %v5621_v15  ;;  %4435 = vset.pattern.permute.xlu0 %v8387_v40 }
 0x2a6   : > { %1689 = vrot.lane.b32.xlu1 %v1682_v41, %s4545_s20  ;;  %2474 = vperm.xlu0 %4435, %v5582_v63   ;;  %v8390_v41 = vmov 26  }
 0x2a8   : > { %v5628_v48 = vpop.permute.xlu1 %1054  ;;  %v5630_v31 = vpop.permute.xlu0 %1403 }
 0x2a9   : > { %8388 = vst [vmem:[#allocation62_spill] sm:$0xff] %v5630_v31  ;;  %v8393_v31 = vmov 29  }
 0x2aa   : > { %1713 = vrot.lane.b32.xlu1 %v1707_v42, %s4545_s20  ;;  %4438 = vset.pattern.permute.xlu0 %v8389_v14 }
 0x2ab   : > { %2552 = vperm.xlu0 %4438, %v5582_v63  }
 0x2ac   : > { %v5637_v44 = vpop.permute.xlu1 %1058  ;;  %v5639_v22 = vpop.permute.xlu0 %1425 }
 0x2ae   : > { %2178 = vperm.xlu1 %4427, %v5582_v63  }
 0x2af   : > { %4441 = vset.pattern.permute.xlu0 %v8390_v41 }
 0x2b0   : > { %v1084_v40 = vpop.permute.xlu1 %1083  ;;  %v5643_v34 = vpop.permute.xlu0 %1429  ;;  %2630 = vperm.xlu0 %4441, %v5582_v63  }
 0x2b1   : > { %8391 = vst [vmem:[#allocation63_spill] sm:$0xff] %v5643_v34  ;;  %v8395_v34 = vmov 32  }
 0x2b2   : > { %4428 = vset.pattern.permute.xlu1 %v8392_v58 }
 0x2b3   : > { %2209 = vperm.xlu1 %4428, %v5582_v63  }
 0x2b4   : > { %v5648_v42 = vpop.permute.xlu1 %1085  ;;  %v5650_v14 = vpop.permute.xlu0 %1451  ;;  %4444 = vset.pattern.permute.xlu0 %v8393_v31  ;;  %v8397_v31 = vmov 16  }
 0x2b5   : > { %2708 = vperm.xlu0 %4444, %v5582_v63  }
 0x2b7   : > { %4430 = vset.pattern.permute.xlu1 %v8394_v6  ;;  %v811_v6 = vsel %vm779_vm6, %v5366_v9, %v5376_v3  ;;  %v873_v9 = vsel %vm779_vm6, %v5434_v39, %v5448_v33  ;;  %v8402_v39 = vmov 19  }
 0x2b8   : > { %2271 = vperm.xlu1 %4430, %v5582_v63   ;;  %v5656_v41 = vpop.permute.xlu1 %1089  ;;  %v5659_v58 = vpop.permute.xlu0 %1455 }
 0x2b9   : > { %4447 = vset.pattern.permute.xlu0 %v8395_v34  ;;  %8396 = vst [vmem:[#allocation64_spill] sm:$0xff] %v5659_v58  ;;  %v787_v34 = vadd.f32 %v780_v55, %v5166_v16  ;;  %v842_v58 = vsel %vm779_vm6, %v5396_v61, %v5406_v37  ;;  %v8400_v55 = vmov 0   ;;  %v904_v61 = vsel %vm531_vm4, %v5472_v26, %v5482_v0 }
 0x2ba   : > { %2786 = vperm.xlu0 %4447, %v5582_v63   ;;  %v966_v26 = vsel %vm531_vm4, %v5532_v30, %v5542_v28 }
 0x2bb   : > { %v818_v1 = vadd.f32 %v811_v6, %v787_v34  ;;  %v935_v6 = vsel %vm531_vm4, %v5502_v24, %v5512_v32  ;;  %v997_v24 = vsel %vm531_vm4, %v5562_v57, %v5572_v59 }
 0x2bc   : > { %4431 = vset.pattern.permute.xlu1 %v8397_v31  ;;  %v1115_v27 = vpop.permute.xlu1 %1114  ;;  %v5676_v8 = vpop.permute.xlu0 %1477 }
 0x2bd   : > { %2303 = vperm.xlu1 %4431, %v5582_v63   ;;  %v849_v16 = vadd.f32 %v842_v58, %v818_v1 }
 0x2be   : > { %4450 = vset.pattern.permute.xlu0 %v8398_v20 }
 0x2bf   : > { %2864 = vperm.xlu0 %4450, %v5582_v63   ;;  %v880_v34 = vadd.f32 %v873_v9, %v849_v16  ;;  %v1709_v9 = vmul.f32 %v8378_v5, %v5278_v2  ;;  %v1060_v2 = vsel %vm1028_vm7, %v5619_v11, %v5628_v48 }
 0x2c0   : > { %v5678_v31 = vpop.permute.xlu1 %1116 }
 0x2c1   : > { %4433 = vset.pattern.permute.xlu1 %v8399_v29  ;;  %v5695_v29 = vpop.permute.xlu0 %1481  ;;  %v911_v1 = vadd.f32 %v904_v61, %v880_v34  ;;  %v1029_v61 = vsel %vm1028_vm7, %v5594_v56, %v5602_v45 }
 0x2c2   : > { %2389 = vperm.xlu1 %4433, %v5582_v63   ;;  %8401 = vst [vmem:[#allocation65_spill] sm:$0xff] %v5695_v29  ;;  %v790_v29 = vadd.f32 %v5356_v53, %v5170_v38 }
 0x2c3   : > { %4451 = vset.pattern.permute.xlu0 %v8400_v55  ;;  %v942_v0 = vadd.f32 %v935_v6, %v911_v1  ;;  %v8403_v6 = vmov 21  }
 0x2c4   : > { %v5689_v20 = vpop.permute.xlu1 %1120  ;;  %1795 = vperm.xlu0 %4451, %v5582_v63  }
 0x2c5   : > { %v973_v16 = vadd.f32 %v966_v26, %v942_v0  ;;  %v5713_v34 = vpop.permute.xlu0 %1503  ;;  %v1091_v0 = vsel %vm1028_vm7, %v1084_v40, %v5648_v42  ;;  %v1122_v26 = vsel %vm1028_vm7, %v1115_v27, %v5678_v31 }
 0x2c6   : > { %4434 = vset.pattern.permute.xlu1 %v8402_v39  ;;  %v8411_v39 = vmov 28  }
 0x2c7   : > { %2432 = vperm.xlu1 %4434, %v5582_v63   ;;  %v1004_v1 = vadd.f32 %v997_v24, %v973_v16  ;;  %v8405_v24 = vmov 22  }
 0x2c8   : > { %v5702_v58 = vpop.permute.xlu1 %1161 }
 0x2c9   : > { %v1036_v5 = vadd.f32 %v1029_v61, %v1004_v1 }
 0x2cb   : > { %1717 = vrot.lane.b32.xlu1 %v1709_v9, %s4545_s20  ;;  %v1067_v56 = vadd.f32 %v1060_v2, %v1036_v5  ;;  %v5728_v9 = vpop.permute.xlu0 %1507  ;;  %v8406_v2 = vmov 24  }
 0x2cc   : > { %v5715_v30 = vpop.permute.xlu1 %1163  ;;  %4436 = vset.pattern.permute.xlu1 %v8403_v6  ;;  %8404 = vst [vmem:[#allocation66_spill] sm:$0xff] %v5728_v9 }
 0x2cd   : > { %v1098_v6 = vadd.f32 %v1091_v0, %v1067_v56  ;;  %v8407_v0 = vmov 25  }
 0x2cf   : > { %2500 = vperm.xlu1 %4436, %v5582_v63   ;;  %v1129_v11 = vadd.f32 %v1122_v26, %v1098_v6  ;;  %v5735_v1 = vpop.permute.xlu0 %1529 }
 0x2d0   : > { %v5724_v57 = vpop.permute.xlu1 %1208 }
 0x2d1   : > { %v1174_v61 = vadd.f32 %v5702_v58, %v1129_v11  ;;  %v8409_v11 = vmov 27  }
 0x2d3   : > { %4437 = vset.pattern.permute.xlu1 %v8405_v24  ;;  %v1218_v27 = vadd.f32 %v5504_v52, %v1174_v61  ;;  %v5745_v56 = vpop.permute.xlu0 %1533 }
 0x2d4   : > { %v5731_v16 = vpop.permute.xlu1 %1252  ;;  %2526 = vperm.xlu1 %4437, %v5582_v63   ;;  %8408 = vst [vmem:[#allocation67_spill] sm:$0xff] %v5745_v56 }
 0x2d5   : > { %v1262_v6 = vadd.f32 %v5524_v47, %v1218_v27 }
 0x2d7   : > { %v5754_v24 = vpop.permute.xlu0 %1556 }
 0x2d8   : > { %v5737_v40 = vpop.permute.xlu1 %1296  ;;  %4439 = vset.pattern.permute.xlu1 %v8406_v2  ;;  %v1306_v2 = vadd.f32 %v5544_v25, %v1262_v6  ;;  %v8415_v6 = vmov 30  }
 0x2d9   : > { %2578 = vperm.xlu1 %4439, %v5582_v63  }
 0x2db   : > { %v5763_v27 = vpop.permute.xlu0 %1560 }
 0x2dc   : > { %v5742_v5 = vpop.permute.xlu1 %1322  ;;  %8413 = vst [vmem:[#allocation70_spill] sm:$0xff] %v5763_v27 }
 0x2dd   : > { %4440 = vset.pattern.permute.xlu1 %v8407_v0  ;;  %v1333_v0 = vadd.f32 %v5564_v12, %v1306_v2  ;;  %v821_v2 = vadd.f32 %v5386_v50, %v790_v29 }
 0x2de   : > { %2604 = vperm.xlu1 %4440, %v5582_v63  }
 0x2df   : > { %v852_v27 = vadd.f32 %v5420_v21, %v821_v2 }
 0x2e0   : > { %v5749_v26 = vpop.permute.xlu1 %1349 }
 0x2e2   : > { %4442 = vset.pattern.permute.xlu1 %v8409_v11  ;;  %v1359_v11 = vadd.f32 %v5587_v4, %v1333_v0  ;;  %v8417_v0 = vmov 31  }
 0x2e3   : > { %2656 = vperm.xlu1 %4442, %v5582_v63  }
 0x2e4   : > { %v5756_v61 = vpop.permute.xlu1 %1375 }
 0x2e5   : > { %8410 = vst [vmem:[#allocation68_spill] sm:$0xff] %v5756_v61 }
 0x2e7   : > { %4443 = vset.pattern.permute.xlu1 %v8411_v39  ;;  %v1385_v39 = vadd.f32 %v5604_v49, %v1359_v11  ;;  %v8420_v11 = vmov 33  }
 0x2e8   : > { %v5760_v56 = vpop.permute.xlu1 %1401  ;;  %2682 = vperm.xlu1 %4443, %v5582_v63  }
 0x2e9   : > { %8412 = vst [vmem:[#allocation69_spill] sm:$0xff] %v5760_v56  ;;  %v5774_v56 = vpop.permute.xlu0 %1582  ;;  %v1411_v38 = vadd.f32 %v5621_v15, %v1385_v39  ;;  %v8422_v15 = vmov 34  }
 0x2eb   : > { %v1437_v2 = vadd.f32 %v5639_v22, %v1411_v38 }
 0x2ec   : > { %v5766_v9 = vpop.permute.xlu1 %1427  ;;  %4445 = vset.pattern.permute.xlu1 %v8415_v6  ;;  %v883_v6 = vadd.f32 %v5462_v43, %v852_v27 }
 0x2ed   : > { %8414 = vst [vmem:[#allocation71_spill] sm:$0xff] %v5766_v9  ;;  %2734 = vperm.xlu1 %4445, %v5582_v63   ;;  %v5786_v4 = vpop.permute.xlu0 %1586 }
 0x2ee   : > { %v914_v29 = vadd.f32 %v5492_v23, %v883_v6  ;;  %8419 = vst [vmem:[#allocation74_spill] sm:$0xff] %v5786_v4 }
 0x2f0   : > { %v5776_v61 = vpop.permute.xlu1 %1453 }
 0x2f1   : > { %8416 = vst [vmem:[#allocation72_spill] sm:$0xff] %v5776_v61  ;;  %4446 = vset.pattern.permute.xlu1 %v8417_v0  ;;  %v945_v61 = vadd.f32 %v5522_v19, %v914_v29  ;;  %v5798_v6 = vpop.permute.xlu0 %1608 }
 0x2f2   : > { %2760 = vperm.xlu1 %4446, %v5582_v63  }
 0x2f3   : > { %v976_v27 = vadd.f32 %v5552_v13, %v945_v61 }
 0x2f4   : > { %v5783_v9 = vpop.permute.xlu1 %1479 }
 0x2f5   : > { %8418 = vst [vmem:[#allocation73_spill] sm:$0xff] %v5783_v9  ;;  %v1007_v39 = vadd.f32 %v5585_v18, %v976_v27  ;;  %v1463_v9 = vadd.f32 %v5650_v14, %v1437_v2  ;;  %v5810_v2 = vpop.permute.xlu0 %1612 }
 0x2f6   : > { %4448 = vset.pattern.permute.xlu1 %v8420_v11  ;;  %8424 = vst [vmem:[#allocation77_spill] sm:$0xff] %v5810_v2 }
 0x2f7   : > { %2812 = vperm.xlu1 %4448, %v5582_v63   ;;  %v1039_v38 = vadd.f32 %v5610_v46, %v1007_v39  ;;  %v1489_v11 = vadd.f32 %v5676_v8, %v1463_v9 }
 0x2f8   : > { %v5792_v0 = vpop.permute.xlu1 %1505 }
 0x2f9   : > { %8421 = vst [vmem:[#allocation75_spill] sm:$0xff] %v5792_v0  ;;  %v1070_v29 = vadd.f32 %v5637_v44, %v1039_v38  ;;  %v5818_v38 = vpop.permute.xlu0 %1634 }
 0x2fb   : > { %4449 = vset.pattern.permute.xlu1 %v8422_v15  ;;  %v1101_v61 = vadd.f32 %v5656_v41, %v1070_v29  ;;  %v1515_v15 = vadd.f32 %v5713_v34, %v1489_v11  ;;  %v782_v29 = vsel %vm779_vm6, %v5358_v17, %v5356_v53  ;;  %v843_v53 = vsel %vm779_vm6, %v5406_v37, %v5378_v7 }
 0x2fc   : > { %v5800_v4 = vpop.permute.xlu1 %1531  ;;  %2838 = vperm.xlu1 %4449, %v5582_v63  }
 0x2fd   : > { %8423 = vst [vmem:[#allocation76_spill] sm:$0xff] %v5800_v4  ;;  %v1132_v27 = vadd.f32 %v5689_v20, %v1101_v61  ;;  %v1542_v39 = vadd.f32 %v5735_v1, %v1515_v15  ;;  %v812_v15 = vsel %vm779_vm6, %v5376_v3, %v5368_v62  ;;  %v844_v3 = vsel %vm779_vm6, %v5378_v7, %v5420_v21 }
 0x2ff   : > { %v1177_v63 = vadd.f32 %v5494_v60, %v1132_v27  ;;  %v1568_v61 = vadd.f32 %v5754_v24, %v1542_v39 }
 0x300   : > { %v5806_v0 = vpop.permute.xlu1 %1558  ;;  %4452 = vset.pattern.permute.xlu1 %v8400_v55  ;;  %v781_v55 = vsel %vm779_vm6, %v5346_v10, %v5358_v17  ;;  %v813_v10 = vsel %vm779_vm6, %v5368_v62, %v5386_v50  ;;  %v5843_v17 = vpop.permute.xlu0 %1638 }
 0x301   : > { %v1221_v11 = vadd.f32 %v5514_v36, %v1177_v63  ;;  %v788_v2 = vadd.f32 %v781_v55, %v5176_v51  ;;  %v1594_v51 = vadd.f32 %v5774_v56, %v1568_v61 }
 0x303   : > { %v819_v63 = vadd.f32 %v812_v15, %v788_v2  ;;  %v1265_v39 = vadd.f32 %v5534_v35, %v1221_v11  ;;  %v8429_v15 = vld [vmem:[#allocation18_spill] sm:$0xff]  ;;  %v8430_v11 = vld [vmem:[#allocation19_spill] sm:$0xff] }
 0x304   : > { %v5814_v4 = vpop.permute.xlu1 %1584 }
 0x305   : > { %v850_v50 = vadd.f32 %v843_v53, %v819_v63  ;;  %v1309_v61 = vadd.f32 %v8430_v11, %v1265_v39  ;;  %v8431_v53 = vld [vmem:[#allocation56_spill] sm:$0xff]  ;;  %v8432_v39 = vld [vmem:[#allocation57_spill] sm:$0xff] }
 0x306   : > { %v936_v63 = vsel %vm531_vm4, %v5512_v32, %v8431_v53  ;;  %v968_v32 = vsel %vm531_vm4, %v8432_v39, %v5552_v13 }
 0x308   : > { %v5820_v9 = vpop.permute.xlu1 %1610 }
 0x309   : > { %8425 = vst [vmem:[#allocation78_spill] sm:$0xff] %v5820_v9  ;;  %v789_v9 = vadd.f32 %v782_v29, %v5178_v54  ;;  %v8428_v29 = vld [vmem:[#allocation55_spill] sm:$0xff] }
 0x30a   : > { %v905_v7 = vsel %vm531_vm4, %v8429_v15, %v8428_v29 }
 0x30b   : > { %v820_v55 = vadd.f32 %v813_v10, %v789_v9  ;;  %v906_v9 = vsel %vm531_vm4, %v8428_v29, %v5492_v23 }
 0x30c   : > { %v5833_v27 = vpop.permute.xlu1 %1636 }
 0x30d   : > { %8426 = vst [vmem:[#allocation79_spill] sm:$0xff] %v5833_v27  ;;  %v8427_v27 = vld [vmem:[#allocation54_spill] sm:$0xff]  ;;  %v851_v2 = vadd.f32 %v844_v3, %v820_v55  ;;  %v937_v55 = vsel %vm531_vm4, %v8431_v53, %v5522_v19 }
 0x30e   : > { %v874_v54 = vsel %vm779_vm6, %v5448_v33, %v8427_v27  ;;  %v875_v37 = vsel %vm779_vm6, %v8427_v27, %v5462_v43  ;;  %v1620_v33 = vadd.f32 %v5798_v6, %v1594_v51  ;;  %v5869_v43 = vpop.permute.xlu0 %1663  ;;  %v967_v51 = vsel %vm531_vm4, %v5542_v28, %v8432_v39 }
 0x30f   : > { %v881_v21 = vadd.f32 %v874_v54, %v850_v50  ;;  %v882_v10 = vadd.f32 %v875_v37, %v851_v2  ;;  %v8433_v37 = vld [vmem:[#allocation20_spill] sm:$0xff] }
 0x310   : > { %v5853_v62 = vpop.permute.xlu1 %1661  ;;  %v1647_v23 = vadd.f32 %v5818_v38, %v1620_v33  ;;  %v1336_v2 = vadd.f32 %v8433_v37, %v1309_v61 }
 0x311   : > { %v912_v3 = vadd.f32 %v905_v7, %v881_v21  ;;  %v913_v54 = vadd.f32 %v906_v9, %v882_v10  ;;  %v8434_v7 = vld [vmem:[#allocation16_spill] sm:$0xff]  ;;  %v8435_v10 = vld [vmem:[#allocation58_spill] sm:$0xff] }
 0x312   : > { %v1673_v29 = vadd.f32 %v5853_v62, %v1647_v23  ;;  %v998_v19 = vsel %vm531_vm4, %v5572_v59, %v8434_v7  ;;  %v999_v28 = vsel %vm531_vm4, %v8434_v7, %v5585_v18  ;;  %v1030_v13 = vsel %vm1028_vm7, %v5602_v45, %v8435_v10  ;;  %v5896_v61 = vpop.permute.xlu0 %1687  ;;  %v8436_v59 = vld [vmem:[#allocation21_spill] sm:$0xff] }
 0x313   : > { %v943_v50 = vadd.f32 %v936_v63, %v912_v3  ;;  %v944_v15 = vadd.f32 %v937_v55, %v913_v54  ;;  %v1031_v63 = vsel %vm1028_vm7, %v8435_v10, %v5610_v46  ;;  %v1362_v3 = vadd.f32 %v8436_v59, %v1336_v2  ;;  %v8437_v54 = vld [vmem:[#allocation17_spill] sm:$0xff]  ;;  %v8438_v46 = vld [vmem:[#allocation59_spill] sm:$0xff] }
 0x314   : > { %v5871_v27 = vpop.permute.xlu1 %1665  ;;  %v1699_v55 = vadd.f32 %v5896_v61, %v1673_v29  ;;  %v1061_v18 = vsel %vm1028_vm7, %v5628_v48, %v8437_v54  ;;  %v1062_v45 = vsel %vm1028_vm7, %v8437_v54, %v5637_v44  ;;  %v1092_v2 = vsel %vm1028_vm7, %v5648_v42, %v8438_v46  ;;  %v8439_v48 = vld [vmem:[#allocation23_spill] sm:$0xff]  ;;  %v8441_v42 = vld [vmem:[#allocation24_spill] sm:$0xff] }
 0x315   : > { %v974_v9 = vadd.f32 %v967_v51, %v943_v50  ;;  %v975_v33 = vadd.f32 %v968_v32, %v944_v15  ;;  %v1093_v15 = vsel %vm1028_vm7, %v8438_v46, %v5656_v41  ;;  %v1388_v7 = vadd.f32 %v8439_v48, %v1362_v3  ;;  %v8442_v3 = vld [vmem:[#allocation62_spill] sm:$0xff] }
 0x316   : > { %v1168_v41 = vsel %vm1167_vm8, %v5702_v58, %v5715_v30  ;;  %v1213_v58 = vsel %vm1167_vm8, %v5724_v57, %v5514_v36  ;;  %v1301_v36 = vsel %vm1167_vm8, %v5737_v40, %v8430_v11 }
 0x317   : > { %v1005_v53 = vadd.f32 %v998_v19, %v974_v9  ;;  %v1006_v23 = vadd.f32 %v999_v28, %v975_v33  ;;  %v8440_v28 = vld [vmem:[#allocation60_spill] sm:$0xff] }
 0x318   : > { %v5888_v21 = vpop.permute.xlu1 %1689  ;;  %v1123_v44 = vsel %vm1028_vm7, %v5678_v31, %v8440_v28  ;;  %v1124_v10 = vsel %vm1028_vm7, %v8440_v28, %v5689_v20  ;;  %v1169_v31 = vsel %vm1167_vm8, %v5715_v30, %v5494_v60  ;;  %v1212_v20 = vsel %vm1167_vm8, %v5504_v52, %v5724_v57 }
 0x319   : > { %v1037_v51 = vadd.f32 %v1030_v13, %v1005_v53  ;;  %v1038_v32 = vadd.f32 %v1031_v63, %v1006_v23  ;;  %v1300_v52 = vsel %vm1167_vm8, %v5544_v25, %v5737_v40  ;;  %v8445_v25 = vld [vmem:[#allocation22_spill] sm:$0xff]  ;;  %v1354_v40 = vsel %vm1326_vm9, %v5749_v26, %v8436_v59 }
 0x31b   : > { %v1068_v29 = vadd.f32 %v1061_v18, %v1037_v51  ;;  %v1069_v9 = vadd.f32 %v1062_v45, %v1038_v32  ;;  %v1256_v51 = vsel %vm1167_vm8, %v5524_v47, %v5731_v16  ;;  %v8443_v45 = vld [vmem:[#allocation63_spill] sm:$0xff]  ;;  %v1327_v47 = vsel %vm1326_vm9, %v5564_v12, %v5742_v5 }
 0x31c   : > { %v5906_v39 = vpop.permute.xlu1 %1713 }
 0x31d   : > { %v1725_v50 = vadd.f32 %v5906_v39, %v1699_v55  ;;  %v1099_v33 = vadd.f32 %v1092_v2, %v1068_v29  ;;  %v1100_v53 = vadd.f32 %v1093_v15, %v1069_v9  ;;  %v1414_v55 = vadd.f32 %v8442_v3, %v1388_v7  ;;  %v8444_v2 = vld [vmem:[#allocation64_spill] sm:$0xff] }
 0x31e   : > { %v1353_v7 = vsel %vm1326_vm9, %v8445_v25, %v5749_v26  ;;  %v8446_v9 = vld [vmem:[#allocation68_spill] sm:$0xff] }
 0x31f   : > { %v1729_v19 = vmax.f32 %v1725_v50, 0.0  ;;  %v1130_v63 = vadd.f32 %v1123_v44, %v1099_v33  ;;  %v1131_v23 = vadd.f32 %v1124_v10, %v1100_v53  ;;  %v1440_v60 = vadd.f32 %v8443_v45, %v1414_v55  ;;  %v8447_v44 = vld [vmem:[#allocation65_spill] sm:$0xff]  ;;  %v8450_v55 = vld [vmem:[#allocation71_spill] sm:$0xff] }
 0x320   : > { %v1257_v50 = vsel %vm1167_vm8, %v5731_v16, %v5534_v35  ;;  %v1328_v35 = vsel %vm1326_vm9, %v5742_v5, %v8433_v37  ;;  %v1379_v28 = vsel %vm1326_vm9, %v5604_v49, %v8446_v9  ;;  %v1380_v37 = vsel %vm1326_vm9, %v8446_v9, %v8439_v48  ;;  %v8449_v53 = vld [vmem:[#allocation61_spill] sm:$0xff] }
 0x321   : > { %v1758_v13 = vmul.f32 %v8441_v42, %v1729_v19  ;;  %v1175_v54 = vadd.f32 %v1168_v41, %v1130_v63  ;;  %v1176_v18 = vadd.f32 %v1169_v31, %v1131_v23  ;;  %v1466_v29 = vadd.f32 %v8444_v2, %v1440_v60  ;;  %v8451_v23 = vld [vmem:[#allocation66_spill] sm:$0xff] }
 0x322   : > { %v1431_v49 = vsel %vm390_vm2, %v5639_v22, %v8450_v55 }
 0x323   : > { %1766 = vrot.lane.b32.xlu1 %v1758_v13, %s4546_s24  ;;  %v1219_v30 = vadd.f32 %v1212_v20, %v1175_v54  ;;  %v1220_v32 = vadd.f32 %v1213_v58, %v1176_v18  ;;  %v1492_v33 = vadd.f32 %v8447_v44, %v1466_v29  ;;  %v8448_v13 = vld [vmem:[#allocation69_spill] sm:$0xff]  ;;  %v1432_v54 = vsel %vm390_vm2, %v8450_v55, %v8443_v45  ;;  %v8452_v18 = vld [vmem:[#allocation72_spill] sm:$0xff] }
 0x324   : > { %v1405_v41 = vsel %vm1326_vm9, %v8449_v53, %v8448_v13  ;;  %v1406_v59 = vsel %vm1326_vm9, %v8448_v13, %v8442_v3  ;;  %v1458_v60 = vsel %vm390_vm2, %v8452_v18, %v8444_v2  ;;  %v8459_v13 = vld [vmem:[#allocation78_spill] sm:$0xff] }
 0x325   : > { %v1263_v46 = vadd.f32 %v1256_v51, %v1219_v30  ;;  %v1264_v57 = vadd.f32 %v1257_v50, %v1220_v32  ;;  %v1518_v20 = vadd.f32 %v8451_v23, %v1492_v33  ;;  %v1457_v51 = vsel %vm390_vm2, %v5650_v14, %v8452_v18  ;;  %v8453_v30 = vld [vmem:[#allocation73_spill] sm:$0xff]  ;;  %v8454_v32 = vld [vmem:[#allocation67_spill] sm:$0xff]  ;;  %v8458_v33 = vld [vmem:[#allocation74_spill] sm:$0xff] }
 0x326   : > { %v1483_v50 = vsel %vm390_vm2, %v5676_v8, %v8453_v30  ;;  %v1484_v45 = vsel %vm390_vm2, %v8453_v30, %v8447_v44  ;;  %v1588_v44 = vsel %vm1535_vm10, %v5774_v56, %v5814_v4  ;;  %v1614_v53 = vsel %vm1535_vm10, %v5798_v6, %v8459_v13 }
 0x327   : > { %v1307_v15 = vadd.f32 %v1300_v52, %v1263_v46  ;;  %v1308_v16 = vadd.f32 %v1301_v36, %v1264_v57  ;;  %v1545_v52 = vadd.f32 %v8454_v32, %v1518_v20  ;;  %v8455_v57 = vld [vmem:[#allocation75_spill] sm:$0xff]  ;;  %v1668_v18 = vsel %vm1640_vm11, %v5869_v43, %v5871_v27 }
 0x328   : > { %v1510_v8 = vsel %vm390_vm2, %v8455_v57, %v8451_v23 }
 0x329   : > { %v1334_v19 = vadd.f32 %v1327_v47, %v1307_v15  ;;  %v1335_v12 = vadd.f32 %v1328_v35, %v1308_v16  ;;  %v1509_v47 = vsel %vm390_vm2, %v5713_v34, %v8455_v57  ;;  %v8456_v15 = vld [vmem:[#allocation76_spill] sm:$0xff]  ;;  %v8457_v16 = vld [vmem:[#allocation70_spill] sm:$0xff]  ;;  %v1562_v34 = vsel %vm1535_vm10, %v5754_v24, %v5806_v0 }
 0x32a   : > { %v1536_v35 = vsel %vm1535_vm10, %v5735_v1, %v8456_v15  ;;  %v1571_v25 = vadd.f32 %v8457_v16, %v1545_v52 }
 0x32b   : > { %v1360_v5 = vadd.f32 %v1353_v7, %v1334_v19  ;;  %v1361_v10 = vadd.f32 %v1354_v40, %v1335_v12  ;;  %v1537_v19 = vsel %vm1535_vm10, %v8456_v15, %v8454_v32 }
 0x32d   : > { %v5966_v11 = vpop.permute.xlu1 %2178  ;;  %v1386_v26 = vadd.f32 %v1379_v28, %v1360_v5  ;;  %v1387_v63 = vadd.f32 %v1380_v37, %v1361_v10  ;;  %v1563_v28 = vsel %vm1535_vm10, %v5806_v0, %v8457_v16  ;;  %v1597_v5 = vadd.f32 %v8458_v33, %v1571_v25 }
 0x32e   : > { %v1589_v10 = vsel %vm1535_vm10, %v5814_v4, %v8458_v33 }
 0x32f   : > { %v1412_v48 = vadd.f32 %v1405_v41, %v1386_v26  ;;  %v1413_v58 = vadd.f32 %v1406_v59, %v1387_v63  ;;  %v8460_v41 = vld [vmem:[#allocation77_spill] sm:$0xff]  ;;  %v1692_v26 = vpop.permute.xlu0 %1691 }
 0x330   : > { %v1623_v0 = vadd.f32 %v8460_v41, %v1597_v5  ;;  %v1615_v56 = vsel %vm1535_vm10, %v8459_v13, %v8460_v41  ;;  %v1694_v30 = vsel %vm1640_vm11, %v5888_v21, %v1692_v26 }
 0x331   : > { %v1438_v3 = vadd.f32 %v1431_v49, %v1412_v48  ;;  %v1439_v22 = vadd.f32 %v1432_v54, %v1413_v58  ;;  %v8461_v49 = vld [vmem:[#allocation79_spill] sm:$0xff]  ;;  %v1667_v54 = vsel %vm1640_vm11, %v5853_v62, %v5869_v43 }
 0x332   : > { %v5984_v31 = vpop.permute.xlu1 %2209  ;;  %v1641_v4 = vsel %vm1640_vm11, %v5818_v38, %v8461_v49  ;;  %v1650_v23 = vadd.f32 %v5843_v17, %v1623_v0  ;;  %v1642_v6 = vsel %vm1640_vm11, %v8461_v49, %v5843_v17 }
 0x333   : > { %v1464_v46 = vadd.f32 %v1457_v51, %v1438_v3  ;;  %v1465_v14 = vadd.f32 %v1458_v60, %v1439_v22  ;;  %v1693_v3 = vsel %vm1640_vm11, %v5896_v61, %v5888_v21  ;;  %v1716_v17 = vpop.permute.xlu0 %1715 }
 0x334   : > { %v1676_v51 = vadd.f32 %v5871_v27, %v1650_v23 }
 0x335   : > { %v1490_v2 = vadd.f32 %v1483_v50, %v1464_v46  ;;  %v1491_v29 = vadd.f32 %v1484_v45, %v1465_v14  ;;  %v1719_v50 = vsel %vm1640_vm11, %v5906_v39, %v1716_v17 }
 0x336   : > { %v1702_v43 = vadd.f32 %v1692_v26, %v1676_v51 }
 0x337   : > { %v6003_v36 = vpop.permute.xlu1 %2271  ;;  %v1516_v7 = vadd.f32 %v1509_v47, %v1490_v2  ;;  %v1517_v40 = vadd.f32 %v1510_v8, %v1491_v29  ;;  %v8462_v2 = vld [vmem:[#allocation27_spill] sm:$0xff]  ;;  %v8463_v8 = vld [vmem:[#allocation25_spill] sm:$0xff]  ;;  %v6076_v25 = vpop.permute.xlu0 %2116 }
 0x338   : > { %v1753_v29 = vsel %vm1167_vm8, %v8463_v8, %v8462_v2  ;;  %v1752_v39 = vsel %vm1167_vm8, %v8441_v42, %v8463_v8 }
 0x339   : > { %v1543_v9 = vadd.f32 %v1536_v35, %v1516_v7  ;;  %v1544_v1 = vadd.f32 %v1537_v19, %v1517_v40 }
 0x33b   : > { %v1569_v37 = vadd.f32 %v1562_v34, %v1543_v9  ;;  %v1570_v24 = vadd.f32 %v1563_v28, %v1544_v1  ;;  %v6080_v19 = vpop.permute.xlu0 %2147 }
 0x33c   : > { %v6021_v12 = vpop.permute.xlu1 %2303 }
 0x33d   : > { %v1595_v59 = vadd.f32 %v1588_v44, %v1569_v37  ;;  %v1596_v55 = vadd.f32 %v1589_v10, %v1570_v24 }
 0x33f   : > { %v1621_v20 = vadd.f32 %v1614_v53, %v1595_v59  ;;  %v1622_v48 = vadd.f32 %v1615_v56, %v1596_v55  ;;  %v6084_v34 = vpop.permute.xlu0 %2240 }
 0x341   : > { %v6040_v63 = vpop.permute.xlu1 %2389  ;;  %v1648_v58 = vadd.f32 %v1641_v4, %v1621_v20  ;;  %v1649_v38 = vadd.f32 %v1642_v6, %v1622_v48 }
 0x343   : > { %v1674_v22 = vadd.f32 %v1667_v54, %v1648_v58  ;;  %v1675_v62 = vadd.f32 %v1668_v18, %v1649_v38  ;;  %v6088_v28 = vpop.permute.xlu0 %2346  ;;  %v8471_v54 = vld [vmem:[#allocation5_spill] sm:$0xff]  ;;  %v8472_v18 = vld [vmem:[#allocation4_spill] sm:$0xff] }
 0x344   : > { %v8473_v38 = vld [vmem:[#allocation45_spill] sm:$0xff] }
 0x345   : > { %v1700_v32 = vadd.f32 %v1693_v3, %v1674_v22  ;;  %v1701_v52 = vadd.f32 %v1694_v30, %v1675_v62  ;;  %v8474_v22 = vld [vmem:[#allocation53_spill] sm:$0xff]  ;;  %v8475_v62 = vld [vmem:[#allocation3_spill] sm:$0xff] }
 0x346   : > { %v6059_v60 = vpop.permute.xlu1 %2432 }
 0x347   : > { %v1726_v46 = vadd.f32 %v1719_v50, %v1700_v32  ;;  %v6092_v1 = vpop.permute.xlu0 %2474 }
 0x349   : > { %v1730_v21 = vmax.f32 %v1726_v46, 0.0 }
 0x34a   : > { %v1718_v27 = vpop.permute.xlu1 %1717 }
 0x34b   : > { %v1720_v45 = vsel %vm1640_vm11, %v1716_v17, %v1718_v27  ;;  %v1728_v14 = vadd.f32 %v1718_v27, %v1702_v43  ;;  %v1759_v16 = vmul.f32 %v1752_v39, %v1730_v21  ;;  %v6096_v33 = vpop.permute.xlu0 %2552 }
 0x34c   : > { %v1727_v61 = vadd.f32 %v1720_v45, %v1701_v52  ;;  %v8476_v45 = vld [vmem:[#allocation46_spill] sm:$0xff] }
 0x34d   : > { %v1732_v57 = vmax.f32 %v1728_v14, 0.0 }
 0x34e   : > { %v1731_v47 = vmax.f32 %v1727_v61, 0.0  ;;  %v6078_v7 = vpop.permute.xlu1 %2500 }
 0x34f   : > { %v1761_v15 = vmul.f32 %v8462_v2, %v1732_v57  ;;  %v6100_v37 = vpop.permute.xlu0 %2630 }
 0x350   : > { %v1760_v35 = vmul.f32 %v1753_v29, %v1731_v47 }
 0x351   : > { %1772 = vrot.lane.b32.xlu0 %v1761_v15, %s4546_s24 }
 0x352   : > { %1770 = vrot.lane.b32.xlu1 %v1760_v35, %s4546_s24 }
 0x353   : > { %v6082_v40 = vpop.permute.xlu1 %2526  ;;  %v6104_v24 = vpop.permute.xlu0 %2708 }
 0x354   : > { %8465 = vst [vmem:[#allocation55_spill] sm:$0xff] %v6104_v24 }
 0x355   : > { %1768 = vrot.lane.b32.xlu0 %v1759_v16, %s4546_s24 }
 0x357   : > { %v6108_v53 = vpop.permute.xlu0 %2786 }
 0x358   : > { %v6086_v9 = vpop.permute.xlu1 %2578  ;;  %8467 = vst [vmem:[#allocation19_spill] sm:$0xff] %v6108_v53 }
 0x35b   : > { %v6112_v0 = vpop.permute.xlu0 %2864 }
 0x35c   : > { %8469 = vst [vmem:[#allocation57_spill] sm:$0xff] %v6112_v0  ;;  %v8483_v0 = vld [vmem:[#allocation39_spill] sm:$0xff] }
 0x35d   : > { %v6090_v42 = vpop.permute.xlu1 %2604 }
 0x35f   : > { %v6116_v59 = vpop.permute.xlu0 %1795 }
 0x362   : > { %v6094_v44 = vpop.permute.xlu1 %2656 }
 0x367   : > { %v6098_v5 = vpop.permute.xlu1 %2682 }
 0x36c   : > { %v6102_v10 = vpop.permute.xlu1 %2734 }
 0x36d   : > { %8464 = vst [vmem:[#allocation54_spill] sm:$0xff] %v6102_v10 }
 0x371   : > { %v6106_v13 = vpop.permute.xlu1 %2760 }
 0x372   : > { %8466 = vst [vmem:[#allocation18_spill] sm:$0xff] %v6106_v13 }
 0x376   : > { %v6110_v41 = vpop.permute.xlu1 %2812 }
 0x377   : > { %8468 = vst [vmem:[#allocation56_spill] sm:$0xff] %v6110_v41 }
 0x37b   : > { %v6114_v26 = vpop.permute.xlu1 %2838 }
 0x37c   : > { %8470 = vst [vmem:[#allocation20_spill] sm:$0xff] %v6114_v26 }
 0x395   : > { %v1767_v56 = vpop.permute.xlu1 %1766 }
 0x3c3   : > { %v1773_v55 = vpop.permute.xlu0 %1772 }
 0x3c4   : > { %v1771_v49 = vpop.permute.xlu1 %1770 }
 0x3c5   : > { %v1777_v4 = vsel %vm1774_vm12, %v1771_v49, %v1773_v55  ;;  %v8477_v55 = vld [vmem:[#allocation40_spill] sm:$0xff] }
 0x3c6   : > { %1783 = vst.msk [vmem:[#allocation2 + $0x18] sm:$0xf] %vm326_vm0, %v1777_v4 }
 0x3c7   : > { %v1769_v23 = vpop.permute.xlu0 %1768 }
 0x3c8   : > { %v1775_v20 = vsel %vm1774_vm12, %v1767_v56, %v1769_v23  ;;  %v1776_v6 = vsel %vm1774_vm12, %v1769_v23, %v1771_v49  ;;  %v8478_v23 = vld [vmem:[#allocation42_spill] sm:$0xff] }
 0x3c9   : > { %1781 = vst [vmem:[#allocation2 + $0x8] sm:$0xf] %v1775_v20  ;;  %1782 = vst [vmem:[#allocation2 + $0x10] sm:$0xf] %v1776_v6  ;;  %v8479_v6 = vld [vmem:[#allocation41_spill] sm:$0xff] }
 0x3d0   : > { %v1792_v48 = vld [vmem:[#allocation2] ss:$8 sm:$0xf]  ;;  %v1827_v32 = vld [vmem:[#allocation2 + $0x1] ss:$8 sm:$0xf] }
 0x3d1   : > { %v6123_v58 = vrot.slane %v1792_v48, %v8471_v54  ;;  %v6126_v51 = vrot.slane %v1792_v48, %v8472_v18  ;;  %v6133_v30 = vrot.slane %v1792_v48, %v8474_v22  ;;  %v6136_v50 = vrot.slane %v1792_v48, %v8475_v62  ;;  %v1861_v2 = vld [vmem:[#allocation2 + $0x2] ss:$8 sm:$0xf]  ;;  %v1895_v35 = vld [vmem:[#allocation2 + $0x3] ss:$8 sm:$0xf] }
 0x3d2   : > { %v6145_v27 = vrot.slane %v1827_v32, %v8472_v18  ;;  %v6148_v46 = vrot.slane %v1827_v32, %v8471_v54  ;;  %v6157_v57 = vrot.slane %v1827_v32, %v8475_v62  ;;  %v6160_v47 = vrot.slane %v1827_v32, %v8474_v22 }
 0x3d3   : > { %v1934_v3 = vmul.f32 %v8473_v38, %v6123_v58  ;;  %v1933_v17 = vmul.f32 %v8473_v38, %v6126_v51  ;;  %v1936_v43 = vmul.f32 %v8473_v38, %v6133_v30  ;;  %v1935_v52 = vmul.f32 %v8473_v38, %v6136_v50 }
 0x3d4   : > { %v1964_v14 = vmul.f32 %v8476_v45, %v6145_v27  ;;  %v1965_v61 = vmul.f32 %v8476_v45, %v6148_v46  ;;  %v1966_v8 = vmul.f32 %v8476_v45, %v6157_v57  ;;  %v1967_v29 = vmul.f32 %v8476_v45, %v6160_v47 }
 0x3d5   : > { %1943 = vrot.lane.b32.xlu0 %v1934_v3, %s4541_s11  ;;  %1941 = vrot.lane.b32.xlu1 %v1933_v17, %s4541_s11  ;;  %v6169_v21 = vrot.slane %v1861_v2, %v8475_v62  ;;  %v6172_v15 = vrot.slane %v1861_v2, %v8472_v18  ;;  %v6177_v39 = vrot.slane %v1895_v35, %v8475_v62 }
 0x3d6   : > { %v6180_v16 = vrot.slane %v1861_v2, %v8471_v54  ;;  %v6183_v56 = vrot.slane %v1861_v2, %v8474_v22  ;;  %v2059_v20 = vmul.f32 %v8478_v23, %v6136_v50  ;;  %v6200_v17 = vrot.slane %v1895_v35, %v8472_v18  ;;  %v8481_v2 = vld [vmem:[#allocation43_spill] sm:$0xff] }
 0x3d7   : > { %v1997_v49 = vmul.f32 %v8477_v55, %v6169_v21  ;;  %v1995_v4 = vmul.f32 %v8477_v55, %v6172_v15  ;;  %v2028_v48 = vmul.f32 %v8479_v6, %v6177_v39  ;;  %v6203_v32 = vrot.slane %v1895_v35, %v8471_v54 }
 0x3d8   : > { %v1996_v38 = vmul.f32 %v8477_v55, %v6180_v16  ;;  %v1998_v3 = vmul.f32 %v8477_v55, %v6183_v56  ;;  %v1822_v45 = vmul.f32 %v6133_v30, %v6116_v59  ;;  %v1820_v55 = vmul.f32 %v6123_v58, %v6116_v59 }
 0x3d9   : > { %1947 = vrot.lane.b32.xlu0 %v1936_v43, %s4541_s11  ;;  %1945 = vrot.lane.b32.xlu1 %v1935_v52, %s4541_s11  ;;  %v6206_v43 = vrot.slane %v1895_v35, %v8474_v22  ;;  %v1819_v52 = vmul.f32 %v6126_v51, %v6116_v59  ;;  %v8482_v35 = vld [vmem:[#allocation26_spill] sm:$0xff]  ;;  %v1821_v22 = vmul.f32 %v6136_v50, %v6116_v59 }
 0x3da   : > { %v1921_v26 = vmul.f32 %v6200_v17, %v8483_v0  ;;  %v1890_v41 = vmul.f32 %v6183_v56, %v8481_v2  ;;  %v1824_v53 = vadd.f32 %v1820_v55, %v8482_v35  ;;  %v1888_v24 = vmul.f32 %v6180_v16, %v8481_v2 }
 0x3db   : > { %v1924_v59 = vmul.f32 %v6206_v43, %v8483_v0  ;;  %v1889_v55 = vmul.f32 %v6169_v21, %v8481_v2 }
 0x3dd   : > { %1972 = vrot.lane.b32.xlu0 %v1964_v14, %s4541_s11  ;;  %1974 = vrot.lane.b32.xlu1 %v1965_v61, %s4541_s11  ;;  %v8480_v14 = vld [vmem:[#allocation31_spill] sm:$0xff] }
 0x3de   : > { %v1853_v61 = vmul.f32 %v6145_v27, %v8480_v14 }
 0x3e1   : > { %1976 = vrot.lane.b32.xlu0 %v1966_v8, %s4541_s11  ;;  %1978 = vrot.lane.b32.xlu1 %v1967_v29, %s4541_s11  ;;  %v1887_v8 = vmul.f32 %v6172_v15, %v8481_v2  ;;  %v1856_v29 = vmul.f32 %v6160_v47, %v8480_v14 }
 0x3e5   : > { %2007 = vrot.lane.b32.xlu0 %v1997_v49, %s4541_s11  ;;  %2003 = vrot.lane.b32.xlu1 %v1995_v4, %s4541_s11  ;;  %v1823_v49 = vadd.f32 %v1819_v52, %v8482_v35  ;;  %v1826_v4 = vadd.f32 %v1822_v45, %v8482_v35  ;;  %v1825_v52 = vadd.f32 %v1821_v22, %v8482_v35  ;;  %v8484_v35 = vld [vmem:[#allocation44_spill] sm:$0xff] }
 0x3e6   : > { %v1855_v45 = vmul.f32 %v6157_v57, %v8480_v14 }
 0x3e7   : > { %v1857_v13 = vadd.f32 %v1853_v61, %v1823_v49  ;;  %v2026_v49 = vmul.f32 %v8479_v6, %v6200_v17 }
 0x3e8   : > { %v1859_v22 = vadd.f32 %v1855_v45, %v1825_v52  ;;  %v2183_v52 = vmul.f32 %v5966_v11, %v6136_v50  ;;  %v2212_v45 = vmul.f32 %v5984_v31, %v6145_v27  ;;  %v2214_v50 = vmul.f32 %v5984_v31, %v6157_v57 }
 0x3e9   : > { %2038 = vrot.lane.b32.xlu0 %v2028_v48, %s4541_s11  ;;  %2005 = vrot.lane.b32.xlu1 %v1996_v38, %s4541_s11  ;;  %v1854_v48 = vmul.f32 %v6148_v46, %v8480_v14  ;;  %v1860_v38 = vadd.f32 %v1856_v29, %v1826_v4  ;;  %v1891_v61 = vadd.f32 %v1887_v8, %v1857_v13 }
 0x3ea   : > { %v2090_v14 = vmul.f32 %v8484_v35, %v6157_v57  ;;  %v1922_v4 = vmul.f32 %v6203_v32, %v8483_v0  ;;  %v1923_v13 = vmul.f32 %v6177_v39, %v8483_v0  ;;  %v2152_v0 = vmul.f32 %v6080_v19, %v6177_v39 }
 0x3eb   : > { %v1858_v10 = vadd.f32 %v1854_v48, %v1824_v53  ;;  %v1894_v29 = vadd.f32 %v1890_v41, %v1860_v38  ;;  %v6250_v48 = vadd.f32 %v1921_v26, %v1891_v61  ;;  %v2029_v26 = vmul.f32 %v8479_v6, %v6206_v43 }
 0x3ec   : > { %v2181_v8 = vmul.f32 %v5966_v11, %v6126_v51  ;;  %v2057_v38 = vmul.f32 %v8478_v23, %v6126_v51  ;;  %v2060_v51 = vmul.f32 %v8478_v23, %v6133_v30  ;;  %v2245_v57 = vmul.f32 %v6084_v34, %v6169_v21 }
 0x3ed   : > { %2069 = vrot.lane.b32.xlu0 %v2059_v20, %s4504_s22  ;;  %2009 = vrot.lane.b32.xlu1 %v1998_v3, %s4541_s11  ;;  %v1892_v53 = vadd.f32 %v1888_v24, %v1858_v10  ;;  %v6252_v2 = vadd.f32 %v1924_v59, %v1894_v29  ;;  %v1893_v20 = vadd.f32 %v1889_v55, %v1859_v22  ;;  %v6314_v22 = vld [vmem:[#allocation2 + $0x8] ss:$8 sm:$0x7] }
 0x3ee   : > { %v2121_v10 = vmul.f32 %v6076_v25, %v6169_v21  ;;  %v2027_v24 = vmul.f32 %v8479_v6, %v6203_v32  ;;  %v2058_v6 = vmul.f32 %v8478_v23, %v6123_v58  ;;  %v2088_v59 = vmul.f32 %v8484_v35, %v6145_v27 }
 0x3ef   : > { %v6256_v41 = vadd.f32 %v1922_v4, %v1892_v53  ;;  %v6260_v3 = vadd.f32 %v1923_v13, %v1893_v20  ;;  %v2243_v55 = vmul.f32 %v6084_v34, %v6172_v15  ;;  %v2089_v23 = vmul.f32 %v8484_v35, %v6148_v46  ;;  %v6336_v53 = vld [vmem:[#allocation2 + $0x9] ss:$8 sm:$0x7] }
 0x3f0   : > { %v2091_v27 = vmul.f32 %v8484_v35, %v6160_v47  ;;  %v2274_v61 = vmul.f32 %v6003_v36, %v6200_v17  ;;  %v2119_v29 = vmul.f32 %v6076_v25, %v6172_v15  ;;  %v2276_v21 = vmul.f32 %v6003_v36, %v6177_v39 }
 0x3f1   : > { %2100 = vrot.lane.b32.xlu0 %v2090_v14, %s4504_s22  ;;  %2034 = vrot.lane.b32.xlu1 %v2026_v49, %s4541_s11  ;;  %v2120_v35 = vmul.f32 %v6076_v25, %v6180_v16  ;;  %v6324_v14 = vrot.slane %v6314_v22, %v8472_v18  ;;  %v2122_v49 = vmul.f32 %v6076_v25, %v6183_v56  ;;  %v6348_v25 = vld [vmem:[#allocation2 + $0xa] ss:$8 sm:$0x7] }
 0x3f2   : > { %v6334_v39 = vrot.slane %v6314_v22, %v8475_v62  ;;  %v2150_v20 = vmul.f32 %v6080_v19, %v6200_v17  ;;  %v6346_v13 = vrot.slane %v6336_v53, %v8471_v54 }
 0x3f3   : > { %v2322_v15 = vmul.f32 %v6324_v14, %v6021_v12 }
 0x3f4   : > { %v2324_v4 = vmul.f32 %v6334_v39, %v6021_v12 }
 0x3f5   : > { %2131 = vrot.lane.b32.xlu0 %v2121_v10, %s4504_s22  ;;  %2036 = vrot.lane.b32.xlu1 %v2027_v24, %s4541_s11  ;;  %v2366_v10 = vmul.f32 %v6346_v13, %v6088_v28  ;;  %v2151_v24 = vmul.f32 %v6080_v19, %v6203_v32 }
 0x3f9   : > { %2162 = vrot.lane.b32.xlu0 %v2152_v0, %s4504_s22  ;;  %2040 = vrot.lane.b32.xlu1 %v2029_v26, %s4541_s11  ;;  %v6358_v0 = vrot.slane %v6348_v25, %v8472_v18  ;;  %v2153_v26 = vmul.f32 %v6080_v19, %v6206_v43 }
 0x3fb   : > { %v2408_v17 = vmul.f32 %v6358_v0, %v6040_v63 }
 0x3fd   : > { %2189 = vrot.lane.b32.xlu0 %v2181_v8, %s4542_s17  ;;  %2065 = vrot.lane.b32.xlu1 %v2057_v38, %s4504_s22  ;;  %v6368_v8 = vrot.slane %v6348_v25, %v8475_v62  ;;  %v6370_v38 = vld [vmem:[#allocation2 + $0xb] ss:$8 sm:$0x7] }
 0x401   : > { %2193 = vrot.lane.b32.xlu0 %v2183_v52, %s4542_s17  ;;  %2067 = vrot.lane.b32.xlu1 %v2058_v6, %s4504_s22  ;;  %v2410_v52 = vmul.f32 %v6368_v8, %v6040_v63  ;;  %v2182_v6 = vmul.f32 %v5966_v11, %v6123_v58  ;;  %v2477_v58 = vmul.f32 %v6092_v1, %v6324_v14 }
 0x405   : > { %2220 = vrot.lane.b32.xlu0 %v2212_v45, %s4542_s17  ;;  %2071 = vrot.lane.b32.xlu1 %v2060_v51, %s4504_s22  ;;  %v6380_v45 = vrot.slane %v6370_v38, %v8471_v54  ;;  %v2184_v51 = vmul.f32 %v5966_v11, %v6133_v30  ;;  %v2215_v11 = vmul.f32 %v5984_v31, %v6160_v47 }
 0x406   : > { %v2504_v30 = vmul.f32 %v6078_v7, %v6346_v13  ;;  %v2531_v47 = vmul.f32 %v6082_v40, %v6368_v8 }
 0x407   : > { %v2452_v19 = vmul.f32 %v6380_v45, %v6059_v60 }
 0x409   : > { %2224 = vrot.lane.b32.xlu0 %v2214_v50, %s4542_s17  ;;  %2096 = vrot.lane.b32.xlu1 %v2088_v59, %s4504_s22  ;;  %v2213_v50 = vmul.f32 %v5984_v31, %v6148_v46  ;;  %v2479_v59 = vmul.f32 %v6092_v1, %v6334_v39  ;;  %v2244_v46 = vmul.f32 %v6084_v34, %v6180_v16 }
 0x40a   : > { %v2246_v31 = vmul.f32 %v6084_v34, %v6183_v56  ;;  %v2275_v16 = vmul.f32 %v6003_v36, %v6203_v32  ;;  %v2556_v34 = vmul.f32 %v6096_v33, %v6380_v45  ;;  %v2277_v56 = vmul.f32 %v6003_v36, %v6206_v43 }
 0x40b   : > { %v6444_v36 = vrot.slane %v6336_v53, %v8472_v18 }
 0x40d   : > { %2251 = vrot.lane.b32.xlu0 %v2243_v55, %s4542_s17  ;;  %2098 = vrot.lane.b32.xlu1 %v2089_v23, %s4504_s22  ;;  %v2529_v55 = vmul.f32 %v6082_v40, %v6358_v0 }
 0x411   : > { %2255 = vrot.lane.b32.xlu0 %v2245_v57, %s4542_s17  ;;  %2102 = vrot.lane.b32.xlu1 %v2091_v27, %s4504_s22  ;;  %v6430_v27 = vrot.slane %v6314_v22, %v8471_v54 }
 0x415   : > { %2282 = vrot.lane.b32.xlu0 %v2274_v61, %s4542_s17  ;;  %2127 = vrot.lane.b32.xlu1 %v2119_v29, %s4504_s22  ;;  %v2581_v29 = vmul.f32 %v6086_v9, %v6324_v14 }
 0x419   : > { %2286 = vrot.lane.b32.xlu0 %v2276_v21, %s4542_s17  ;;  %2129 = vrot.lane.b32.xlu1 %v2120_v35, %s4504_s22  ;;  %v2323_v21 = vmul.f32 %v6430_v27, %v6021_v12  ;;  %v2583_v35 = vmul.f32 %v6086_v9, %v6334_v39  ;;  %v6458_v12 = vrot.slane %v6336_v53, %v8475_v62 }
 0x41d   : > { %2328 = vrot.lane.b32.xlu0 %v2322_v15, %s4524_s9  ;;  %2133 = vrot.lane.b32.xlu1 %v2122_v49, %s4504_s22  ;;  %v2365_v15 = vmul.f32 %v6444_v36, %v6088_v28 }
 0x421   : > { %2332 = vrot.lane.b32.xlu0 %v2324_v4, %s4524_s9  ;;  %2158 = vrot.lane.b32.xlu1 %v2150_v20, %s4504_s22  ;;  %v2608_v20 = vmul.f32 %v6090_v42, %v6346_v13 }
 0x425   : > { %2373 = vrot.lane.b32.xlu0 %v2366_v10, %s4524_s9  ;;  %2160 = vrot.lane.b32.xlu1 %v2151_v24, %s4504_s22  ;;  %v2367_v10 = vmul.f32 %v6458_v12, %v6088_v28  ;;  %v6472_v24 = vrot.slane %v6348_v25, %v8471_v54  ;;  %v6486_v28 = vrot.slane %v6370_v38, %v8472_v18 }
 0x429   : > { %2414 = vrot.lane.b32.xlu0 %v2408_v17, %s4524_s9  ;;  %2164 = vrot.lane.b32.xlu1 %v2153_v26, %s4504_s22  ;;  %v2633_v26 = vmul.f32 %v6100_v37, %v6358_v0 }
 0x42d   : > { %2418 = vrot.lane.b32.xlu0 %v2410_v52, %s4524_s9  ;;  %2191 = vrot.lane.b32.xlu1 %v2182_v6, %s4542_s17  ;;  %v2409_v52 = vmul.f32 %v6472_v24, %v6040_v63  ;;  %v6500_v63 = vrot.slane %v6370_v38, %v8475_v62  ;;  %v2634_v62 = vmul.f32 %v6100_v37, %v6472_v24 }
 0x42f   : > { %v2661_v18 = vmul.f32 %v6094_v44, %v6500_v63 }
 0x431   : > { %2459 = vrot.lane.b32.xlu0 %v2452_v19, %s4524_s9  ;;  %2195 = vrot.lane.b32.xlu1 %v2184_v51, %s4542_s17  ;;  %v2635_v19 = vmul.f32 %v6100_v37, %v6368_v8  ;;  %v2451_v51 = vmul.f32 %v6486_v28, %v6059_v60 }
 0x435   : > { %2483 = vrot.lane.b32.xlu0 %v2477_v58, %s4543_s18  ;;  %2222 = vrot.lane.b32.xlu1 %v2213_v50, %s4542_s17 }
 0x439   : > { %2487 = vrot.lane.b32.xlu0 %v2479_v59, %s4543_s18  ;;  %2226 = vrot.lane.b32.xlu1 %v2215_v11, %s4542_s17  ;;  %v2660_v59 = vmul.f32 %v6094_v44, %v6380_v45  ;;  %v2453_v11 = vmul.f32 %v6500_v63, %v6059_v60 }
 0x43d   : > { %2511 = vrot.lane.b32.xlu0 %v2504_v30, %s4543_s18  ;;  %2253 = vrot.lane.b32.xlu1 %v2244_v46, %s4542_s17  ;;  %v2685_v46 = vmul.f32 %v6098_v5, %v6324_v14 }
 0x441   : > { %2535 = vrot.lane.b32.xlu0 %v2529_v55, %s4543_s18  ;;  %2257 = vrot.lane.b32.xlu1 %v2246_v31, %s4542_s17  ;;  %v2478_v55 = vmul.f32 %v6092_v1, %v6430_v27 }
 0x445   : > { %2539 = vrot.lane.b32.xlu0 %v2531_v47, %s4543_s18  ;;  %2284 = vrot.lane.b32.xlu1 %v2275_v16, %s4542_s17  ;;  %v2687_v47 = vmul.f32 %v6098_v5, %v6334_v39  ;;  %v2503_v16 = vmul.f32 %v6078_v7, %v6444_v36 }
 0x447   : > { %v6420_v23 = vpop.permute.xlu0 %1943  ;;  %v6422_v57 = vpop.permute.xlu1 %1941 }
 0x449   : > { %2563 = vrot.lane.b32.xlu0 %v2556_v34, %s4543_s18  ;;  %2288 = vrot.lane.b32.xlu1 %v2277_v56, %s4542_s17  ;;  %v8485_v56 = vld [vmem:[#allocation55_spill] sm:$0xff] }
 0x44b   : > { %v6434_v32 = vpop.permute.xlu0 %1947  ;;  %v6436_v61 = vpop.permute.xlu1 %1945 }
 0x44d   : > { %2587 = vrot.lane.b32.xlu0 %v2581_v29, %s4501_s16  ;;  %2330 = vrot.lane.b32.xlu1 %v2323_v21, %s4524_s9  ;;  %v2712_v29 = vmul.f32 %v8485_v56, %v6346_v13  ;;  %v2505_v21 = vmul.f32 %v6078_v7, %v6458_v12 }
 0x44f   : > { %v6448_v43 = vpop.permute.xlu0 %1972  ;;  %v6450_v22 = vpop.permute.xlu1 %1974 }
 0x451   : > { %2591 = vrot.lane.b32.xlu0 %v2583_v35, %s4501_s16  ;;  %2371 = vrot.lane.b32.xlu1 %v2365_v15, %s4524_s9 }
 0x453   : > { %v6462_v49 = vpop.permute.xlu0 %1976  ;;  %v6464_v4 = vpop.permute.xlu1 %1978 }
 0x455   : > { %2615 = vrot.lane.b32.xlu0 %v2608_v20, %s4501_s16  ;;  %2375 = vrot.lane.b32.xlu1 %v2367_v10, %s4524_s9  ;;  %v8486_v20 = vld [vmem:[#allocation54_spill] sm:$0xff] }
 0x456   : > { %v2737_v10 = vmul.f32 %v8486_v20, %v6358_v0 }
 0x457   : > { %v6476_v53 = vpop.permute.xlu0 %2007  ;;  %v6478_v17 = vpop.permute.xlu1 %2003 }
 0x459   : > { %2639 = vrot.lane.b32.xlu0 %v2633_v26, %s4501_s16  ;;  %2416 = vrot.lane.b32.xlu1 %v2409_v52, %s4524_s9  ;;  %v2530_v26 = vmul.f32 %v6082_v40, %v6472_v24 }
 0x45b   : > { %v6490_v25 = vpop.permute.xlu0 %2038  ;;  %v6492_v6 = vpop.permute.xlu1 %2005 }
 0x45d   : > { %2643 = vrot.lane.b32.xlu0 %v2635_v19, %s4501_s16  ;;  %2457 = vrot.lane.b32.xlu1 %v2451_v51, %s4524_s9  ;;  %v2739_v19 = vmul.f32 %v8486_v20, %v6368_v8  ;;  %v2555_v51 = vmul.f32 %v6096_v33, %v6486_v28 }
 0x45f   : > { %v6504_v58 = vpop.permute.xlu0 %2069  ;;  %v6506_v50 = vpop.permute.xlu1 %2009 }
 0x461   : > { %2667 = vrot.lane.b32.xlu0 %v2660_v59, %s4501_s16  ;;  %2461 = vrot.lane.b32.xlu1 %v2453_v11, %s4524_s9  ;;  %v8488_v11 = vld [vmem:[#allocation18_spill] sm:$0xff] }
 0x463   : > { %v6514_v38 = vpop.permute.xlu0 %2100  ;;  %v6516_v30 = vpop.permute.xlu1 %2034 }
 0x465   : > { %2691 = vrot.lane.b32.xlu0 %v2685_v46, %s4544_s19  ;;  %2485 = vrot.lane.b32.xlu1 %v2478_v55, %s4543_s18  ;;  %v2764_v46 = vmul.f32 %v8488_v11, %v6380_v45  ;;  %v2557_v55 = vmul.f32 %v6096_v33, %v6500_v63 }
 0x467   : > { %v6524_v31 = vpop.permute.xlu0 %2131  ;;  %v6526_v60 = vpop.permute.xlu1 %2036 }
 0x469   : > { %2695 = vrot.lane.b32.xlu0 %v2687_v47, %s4544_s19  ;;  %2509 = vrot.lane.b32.xlu1 %v2503_v16, %s4543_s18 }
 0x46b   : > { %v6534_v34 = vpop.permute.xlu0 %2162  ;;  %v6536_v1 = vpop.permute.xlu1 %2040 }
 0x46d   : > { %2719 = vrot.lane.b32.xlu0 %v2712_v29, %s4544_s19  ;;  %2513 = vrot.lane.b32.xlu1 %v2505_v21, %s4543_s18  ;;  %v8490_v29 = vld [vmem:[#allocation19_spill] sm:$0xff] }
 0x46e   : > { %v2789_v21 = vmul.f32 %v8490_v29, %v6324_v14 }
 0x46f   : > { %v6544_v35 = vpop.permute.xlu0 %2189  ;;  %v6546_v15 = vpop.permute.xlu1 %2065 }
 0x471   : > { %2743 = vrot.lane.b32.xlu0 %v2737_v10, %s4544_s19  ;;  %2537 = vrot.lane.b32.xlu1 %v2530_v26, %s4543_s18  ;;  %v2582_v10 = vmul.f32 %v6086_v9, %v6430_v27 }
 0x473   : > { %v6554_v52 = vpop.permute.xlu0 %2193  ;;  %v6556_v7 = vpop.permute.xlu1 %2067 }
 0x474   : > { %8487 = vst [vmem:[#allocation16_spill] sm:$0xff] %v6554_v52 }
 0x475   : > { %2747 = vrot.lane.b32.xlu0 %v2739_v19, %s4544_s19  ;;  %2561 = vrot.lane.b32.xlu1 %v2555_v51, %s4543_s18  ;;  %v2791_v19 = vmul.f32 %v8490_v29, %v6334_v39  ;;  %v2607_v51 = vmul.f32 %v6090_v42, %v6444_v36 }
 0x477   : > { %v6564_v59 = vpop.permute.xlu0 %2220  ;;  %v6566_v40 = vpop.permute.xlu1 %2071 }
 0x479   : > { %2771 = vrot.lane.b32.xlu0 %v2764_v46, %s4544_s19  ;;  %2565 = vrot.lane.b32.xlu1 %v2557_v55, %s4543_s18  ;;  %v8492_v46 = vld [vmem:[#allocation56_spill] sm:$0xff] }
 0x47a   : > { %v2816_v55 = vmul.f32 %v8492_v46, %v6346_v13 }
 0x47b   : > { %v6574_v47 = vpop.permute.xlu0 %2224  ;;  %v6576_v16 = vpop.permute.xlu1 %2096 }
 0x47c   : > { %8489 = vst [vmem:[#allocation58_spill] sm:$0xff] %v6574_v47  ;;  %v2763_v47 = vmul.f32 %v8488_v11, %v6486_v28 }
 0x47d   : > { %2795 = vrot.lane.b32.xlu0 %v2789_v21, %s4545_s20  ;;  %2589 = vrot.lane.b32.xlu1 %v2582_v10, %s4501_s16  ;;  %v2609_v21 = vmul.f32 %v6090_v42, %v6458_v12 }
 0x47f   : > { %v6584_v26 = vpop.permute.xlu0 %2251  ;;  %v6586_v33 = vpop.permute.xlu1 %2098 }
 0x481   : > { %2799 = vrot.lane.b32.xlu0 %v2791_v19, %s4545_s20  ;;  %2613 = vrot.lane.b32.xlu1 %v2607_v51, %s4501_s16  ;;  %v8493_v19 = vld [vmem:[#allocation20_spill] sm:$0xff] }
 0x482   : > { %v2841_v51 = vmul.f32 %v8493_v19, %v6358_v0 }
 0x483   : > { %v6594_v14 = vpop.permute.xlu0 %2255  ;;  %v6596_v9 = vpop.permute.xlu1 %2102 }
 0x484   : > { %8491 = vst [vmem:[#allocation21_spill] sm:$0xff] %v6594_v14 }
 0x485   : > { %2823 = vrot.lane.b32.xlu0 %v2816_v55, %s4545_s20  ;;  %2617 = vrot.lane.b32.xlu1 %v2609_v21, %s4501_s16  ;;  %v2843_v55 = vmul.f32 %v8493_v19, %v6368_v8  ;;  %v2659_v21 = vmul.f32 %v6094_v44, %v6486_v28  ;;  %v2711_v44 = vmul.f32 %v8485_v56, %v6444_v36 }
 0x487   : > { %v6604_v39 = vpop.permute.xlu0 %2282  ;;  %v6606_v10 = vpop.permute.xlu1 %2127 }
 0x489   : > { %2847 = vrot.lane.b32.xlu0 %v2841_v51, %s4545_s20  ;;  %2641 = vrot.lane.b32.xlu1 %v2634_v62, %s4501_s16  ;;  %v8495_v62 = vld [vmem:[#allocation57_spill] sm:$0xff] }
 0x48a   : > { %v2868_v51 = vmul.f32 %v8495_v62, %v6380_v45 }
 0x48b   : > { %v6614_v13 = vpop.permute.xlu0 %2286  ;;  %v6616_v42 = vpop.permute.xlu1 %2129 }
 0x48c   : > { %8494 = vst [vmem:[#allocation17_spill] sm:$0xff] %v6614_v13 }
 0x48d   : > { %2851 = vrot.lane.b32.xlu0 %v2843_v55, %s4545_s20  ;;  %2665 = vrot.lane.b32.xlu1 %v2659_v21, %s4501_s16  ;;  %v2686_v55 = vmul.f32 %v6098_v5, %v6430_v27 }
 0x48f   : > { %v6624_v0 = vpop.permute.xlu0 %2328  ;;  %v6626_v37 = vpop.permute.xlu1 %2133 }
 0x491   : > { %2875 = vrot.lane.b32.xlu0 %v2868_v51, %s4545_s20  ;;  %2669 = vrot.lane.b32.xlu1 %v2661_v18, %s4501_s16  ;;  %v2713_v51 = vmul.f32 %v8485_v56, %v6458_v12 }
 0x493   : > { %v6634_v8 = vpop.permute.xlu0 %2332  ;;  %v6636_v54 = vpop.permute.xlu1 %2158 }
 0x495   : > { %2693 = vrot.lane.b32.xlu1 %v2686_v55, %s4544_s19 }
 0x497   : > { %v6641_v21 = vpop.permute.xlu0 %2373  ;;  %v6643_v13 = vpop.permute.xlu1 %2160 }
 0x498   : > { %8496 = vst [vmem:[#allocation59_spill] sm:$0xff] %v6641_v21  ;;  %v2738_v21 = vmul.f32 %v8486_v20, %v6472_v24 }
 0x499   : > { %2717 = vrot.lane.b32.xlu1 %v2711_v44, %s4544_s19 }
 0x49b   : > { %v6648_v45 = vpop.permute.xlu0 %2414  ;;  %v6650_v18 = vpop.permute.xlu1 %2164 }
 0x49d   : > { %2721 = vrot.lane.b32.xlu1 %v2713_v51, %s4544_s19 }
 0x49f   : > { %v6655_v5 = vpop.permute.xlu0 %2418  ;;  %v6657_v55 = vpop.permute.xlu1 %2191 }
 0x4a0   : > { %8497 = vst [vmem:[#allocation23_spill] sm:$0xff] %v6655_v5  ;;  %v2765_v5 = vmul.f32 %v8488_v11, %v6500_v63 }
 0x4a1   : > { %2745 = vrot.lane.b32.xlu1 %v2738_v21, %s4544_s19 }
 0x4a3   : > { %v6662_v14 = vpop.permute.xlu0 %2459  ;;  %v6664_v44 = vpop.permute.xlu1 %2195 }
 0x4a4   : > { %8498 = vst [vmem:[#allocation60_spill] sm:$0xff] %v6662_v14  ;;  %v2790_v14 = vmul.f32 %v8490_v29, %v6430_v27  ;;  %v2842_v29 = vmul.f32 %v8493_v19, %v6472_v24 }
 0x4a5   : > { %2769 = vrot.lane.b32.xlu1 %v2763_v47, %s4544_s19  ;;  %v2815_v47 = vmul.f32 %v8492_v46, %v6444_v36 }
 0x4a7   : > { %v6669_v56 = vpop.permute.xlu0 %2483  ;;  %v6671_v51 = vpop.permute.xlu1 %2222 }
 0x4a8   : > { %8499 = vst [vmem:[#allocation24_spill] sm:$0xff] %v6669_v56 }
 0x4a9   : > { %2773 = vrot.lane.b32.xlu1 %v2765_v5, %s4544_s19  ;;  %v2817_v5 = vmul.f32 %v8492_v46, %v6458_v12  ;;  %v2869_v46 = vmul.f32 %v8495_v62, %v6500_v63 }
 0x4ab   : > { %v6676_v20 = vpop.permute.xlu0 %2487  ;;  %v6678_v21 = vpop.permute.xlu1 %2226 }
 0x4ac   : > { %8500 = vst [vmem:[#allocation62_spill] sm:$0xff] %v6676_v20 }
 0x4ad   : > { %2797 = vrot.lane.b32.xlu1 %v2790_v14, %s4545_s20  ;;  %v2867_v14 = vmul.f32 %v8495_v62, %v6486_v28  ;;  %v1949_v62 = vsel %vm779_vm6, %v6422_v57, %v6420_v23  ;;  %v2042_v57 = vsel %vm779_vm6, %v6516_v30, %v6526_v60 }
 0x4af   : > { %v6683_v52 = vpop.permute.xlu1 %2253  ;;  %v6687_v56 = vpop.permute.xlu0 %2511 }
 0x4b0   : > { %8501 = vst [vmem:[#allocation63_spill] sm:$0xff] %v6687_v56 }
 0x4b1   : > { %2821 = vrot.lane.b32.xlu1 %v2815_v47, %s4545_s20 }
 0x4b3   : > { %v6690_v11 = vpop.permute.xlu1 %2257  ;;  %v6695_v20 = vpop.permute.xlu0 %2535 }
 0x4b4   : > { %8502 = vst [vmem:[#allocation64_spill] sm:$0xff] %v6695_v20 }
 0x4b5   : > { %2825 = vrot.lane.b32.xlu1 %v2817_v5, %s4545_s20 }
 0x4b7   : > { %v6697_v27 = vpop.permute.xlu1 %2284  ;;  %v6706_v47 = vpop.permute.xlu0 %2539 }
 0x4b8   : > { %8503 = vst [vmem:[#allocation22_spill] sm:$0xff] %v6706_v47 }
 0x4b9   : > { %2849 = vrot.lane.b32.xlu1 %v2842_v29, %s4545_s20 }
 0x4bb   : > { %v6702_v36 = vpop.permute.xlu1 %2288  ;;  %v6714_v5 = vpop.permute.xlu0 %2563 }
 0x4bc   : > { %8505 = vst [vmem:[#allocation65_spill] sm:$0xff] %v6714_v5 }
 0x4bd   : > { %2873 = vrot.lane.b32.xlu1 %v2867_v14, %s4545_s20 }
 0x4bf   : > { %v6709_v12 = vpop.permute.xlu1 %2330  ;;  %v6720_v29 = vpop.permute.xlu0 %2587 }
 0x4c0   : > { %8504 = vst [vmem:[#allocation68_spill] sm:$0xff] %v6709_v12  ;;  %8506 = vst [vmem:[#allocation69_spill] sm:$0xff] %v6720_v29  ;;  %v1956_v29 = vadd.f32 %v1949_v62, %v6250_v48  ;;  %v1959_v12 = vadd.f32 %v6434_v32, %v6252_v2  ;;  %v2073_v48 = vsel %vm531_vm4, %v6546_v15, %v6556_v7 }
 0x4c1   : > { %2877 = vrot.lane.b32.xlu1 %v2869_v46, %s4545_s20  ;;  %v2135_v2 = vsel %vm531_vm4, %v6606_v10, %v6616_v42 }
 0x4c3   : > { %v6716_v24 = vpop.permute.xlu1 %2371  ;;  %v6724_v56 = vpop.permute.xlu0 %2591 }
 0x4c4   : > { %8508 = vst [vmem:[#allocation71_spill] sm:$0xff] %v6724_v56  ;;  %v1980_v56 = vsel %vm779_vm6, %v6448_v43, %v6450_v22 }
 0x4c7   : > { %v6718_v19 = vpop.permute.xlu1 %2375  ;;  %v6730_v20 = vpop.permute.xlu0 %2615 }
 0x4c8   : > { %8509 = vst [vmem:[#allocation66_spill] sm:$0xff] %v6730_v20  ;;  %v2011_v20 = vsel %vm779_vm6, %v6478_v17, %v6492_v6  ;;  %v1990_v17 = vadd.f32 %v6464_v4, %v1959_v12  ;;  %v2166_v12 = vsel %vm531_vm4, %v6636_v54, %v6643_v13 }
 0x4ca   : > { %v2021_v30 = vadd.f32 %v6506_v50, %v1990_v17 }
 0x4cb   : > { %v6722_v28 = vpop.permute.xlu1 %2416  ;;  %v6737_v46 = vpop.permute.xlu0 %2639 }
 0x4cc   : > { %8507 = vst [vmem:[#allocation61_spill] sm:$0xff] %v6722_v28  ;;  %8511 = vst [vmem:[#allocation73_spill] sm:$0xff] %v6737_v46  ;;  %v2052_v15 = vadd.f32 %v6536_v1, %v2021_v30 }
 0x4cf   : > { %v6726_v14 = vpop.permute.xlu1 %2457  ;;  %v6753_v46 = vpop.permute.xlu0 %2643 }
 0x4d0   : > { %8513 = vst [vmem:[#allocation75_spill] sm:$0xff] %v6753_v46 }
 0x4d3   : > { %v6728_v47 = vpop.permute.xlu1 %2461 }
 0x4d7   : > { %v6732_v63 = vpop.permute.xlu1 %2485 }
 0x4d8   : > { %8510 = vst [vmem:[#allocation72_spill] sm:$0xff] %v6732_v63  ;;  %v1987_v63 = vadd.f32 %v1980_v56, %v1956_v29  ;;  %v2104_v56 = vsel %vm531_vm4, %v6576_v16, %v6586_v33  ;;  %v2083_v16 = vadd.f32 %v6566_v40, %v2052_v15 }
 0x4da   : > { %v2114_v10 = vadd.f32 %v6596_v9, %v2083_v16 }
 0x4db   : > { %v6739_v5 = vpop.permute.xlu1 %2509 }
 0x4dc   : > { %8512 = vst [vmem:[#allocation67_spill] sm:$0xff] %v6739_v5  ;;  %v2018_v5 = vadd.f32 %v2011_v20, %v1987_v63  ;;  %v6770_v20 = vpop.permute.xlu0 %2667  ;;  %v2145_v54 = vadd.f32 %v6626_v37, %v2114_v10 }
 0x4de   : > { %v2049_v62 = vadd.f32 %v2042_v57, %v2018_v5  ;;  %v2197_v57 = vsel %vm1028_vm7, %v6544_v35, %v6657_v55  ;;  %v1950_v35 = vsel %vm779_vm6, %v6420_v23, %v6436_v61  ;;  %v1951_v23 = vsel %vm779_vm6, %v6436_v61, %v6434_v32 }
 0x4df   : > { %v6748_v28 = vpop.permute.xlu1 %2513  ;;  %v1958_v32 = vadd.f32 %v1951_v23, %v6260_v3  ;;  %v2044_v3 = vsel %vm779_vm6, %v6490_v25, %v6536_v1  ;;  %v2167_v23 = vsel %vm531_vm4, %v6643_v13, %v6534_v34 }
 0x4e0   : > { %v2080_v29 = vadd.f32 %v2073_v48, %v2049_v62  ;;  %v2228_v62 = vsel %vm1028_vm7, %v6564_v59, %v6671_v51  ;;  %v2290_v59 = vsel %vm1028_vm7, %v6604_v39, %v6697_v27  ;;  %v2012_v39 = vsel %vm779_vm6, %v6492_v6, %v6476_v53 }
 0x4e1   : > { %v2013_v6 = vsel %vm779_vm6, %v6476_v53, %v6506_v50  ;;  %v2105_v53 = vsel %vm531_vm4, %v6586_v33, %v6514_v38  ;;  %v2106_v33 = vsel %vm531_vm4, %v6514_v38, %v6596_v9 }
 0x4e2   : > { %v2111_v46 = vadd.f32 %v2104_v56, %v2080_v29  ;;  %v6788_v56 = vpop.permute.xlu0 %2691 }
 0x4e3   : > { %v6760_v43 = vpop.permute.xlu1 %2537 }
 0x4e4   : > { %v2142_v5 = vadd.f32 %v2135_v2, %v2111_v46  ;;  %v2259_v46 = vsel %vm1028_vm7, %v6584_v26, %v6683_v52  ;;  %v2176_v2 = vadd.f32 %v6650_v18, %v2145_v54  ;;  %v2043_v54 = vsel %vm779_vm6, %v6526_v60, %v6490_v25 }
 0x4e6   : > { %v2173_v17 = vadd.f32 %v2166_v12, %v2142_v5  ;;  %v1981_v12 = vsel %vm779_vm6, %v6450_v22, %v6462_v49  ;;  %v2207_v16 = vadd.f32 %v6664_v44, %v2176_v2  ;;  %v1957_v5 = vadd.f32 %v1950_v35, %v6256_v41 }
 0x4e7   : > { %v6772_v63 = vpop.permute.xlu1 %2561  ;;  %v1982_v41 = vsel %vm779_vm6, %v6462_v49, %v6464_v4  ;;  %v2074_v35 = vsel %vm531_vm4, %v6556_v7, %v6504_v58 }
 0x4e8   : > { %v2204_v30 = vadd.f32 %v2197_v57, %v2173_v17  ;;  %v6808_v57 = vpop.permute.xlu0 %2695  ;;  %v2238_v17 = vadd.f32 %v6678_v21, %v2207_v16  ;;  %v1989_v60 = vadd.f32 %v1982_v41, %v1958_v32  ;;  %v2075_v16 = vsel %vm531_vm4, %v6504_v58, %v6566_v40  ;;  %v8514_v41 = vld [vmem:[#allocation16_spill] sm:$0xff]  ;;  %v8515_v32 = vld [vmem:[#allocation58_spill] sm:$0xff] }
 0x4e9   : > { %v2198_v38 = vsel %vm1028_vm7, %v6657_v55, %v8514_v41  ;;  %v2199_v55 = vsel %vm1028_vm7, %v8514_v41, %v6664_v44  ;;  %v8524_v41 = vld [vmem:[#allocation64_spill] sm:$0xff] }
 0x4ea   : > { %v2235_v15 = vadd.f32 %v2228_v62, %v2204_v30  ;;  %v1988_v62 = vadd.f32 %v1981_v12, %v1957_v5  ;;  %v2269_v30 = vadd.f32 %v6690_v11, %v2238_v17 }
 0x4eb   : > { %v6782_v48 = vpop.permute.xlu1 %2565 }
 0x4ec   : > { %v2266_v26 = vadd.f32 %v2259_v46, %v2235_v15  ;;  %v2019_v61 = vadd.f32 %v2012_v39, %v1988_v62  ;;  %v2300_v49 = vadd.f32 %v6702_v36, %v2269_v30  ;;  %v6837_v15 = vpop.permute.xlu0 %2719  ;;  %v2137_v62 = vsel %vm531_vm4, %v6524_v31, %v6626_v37 }
 0x4ed   : > { %v2168_v30 = vsel %vm531_vm4, %v6534_v34, %v6650_v18  ;;  %v8518_v18 = vld [vmem:[#allocation24_spill] sm:$0xff] }
 0x4ee   : > { %v2297_v22 = vadd.f32 %v2290_v59, %v2266_v26  ;;  %v2050_v2 = vadd.f32 %v2043_v54, %v2019_v61  ;;  %v2020_v59 = vadd.f32 %v2013_v6, %v1989_v60  ;;  %v2136_v26 = vsel %vm531_vm4, %v6616_v42, %v6524_v31  ;;  %v8516_v6 = vld [vmem:[#allocation23_spill] sm:$0xff] }
 0x4ef   : > { %v6794_v29 = vpop.permute.xlu1 %2589  ;;  %v2343_v25 = vadd.f32 %v6634_v8, %v2300_v49  ;;  %v2229_v61 = vsel %vm1028_vm7, %v6671_v51, %v8515_v32 }
 0x4f0   : > { %v2340_v4 = vadd.f32 %v6624_v0, %v2297_v22  ;;  %v2081_v7 = vadd.f32 %v2074_v35, %v2050_v2  ;;  %v2051_v1 = vadd.f32 %v2044_v3, %v2020_v59  ;;  %v6863_v22 = vpop.permute.xlu0 %2743  ;;  %v8519_v59 = vld [vmem:[#allocation17_spill] sm:$0xff] }
 0x4f1   : > { %v2386_v39 = vadd.f32 %v6718_v19, %v2343_v25  ;;  %v2291_v44 = vsel %vm1028_vm7, %v6697_v27, %v8519_v59  ;;  %v2292_v27 = vsel %vm1028_vm7, %v8519_v59, %v6702_v36 }
 0x4f2   : > { %v2383_v50 = vadd.f32 %v6716_v24, %v2340_v4  ;;  %v2112_v5 = vadd.f32 %v2105_v53, %v2081_v7  ;;  %v2082_v40 = vadd.f32 %v2075_v16, %v2051_v1  ;;  %v8517_v4 = vld [vmem:[#allocation21_spill] sm:$0xff]  ;;  %v8520_v7 = vld [vmem:[#allocation67_spill] sm:$0xff] }
 0x4f3   : > { %v6810_v10 = vpop.permute.xlu1 %2613  ;;  %v2429_v35 = vadd.f32 %v8516_v6, %v2386_v39  ;;  %v2260_v60 = vsel %vm1028_vm7, %v6683_v52, %v8517_v4  ;;  %v2261_v1 = vsel %vm1028_vm7, %v8517_v4, %v6690_v11 }
 0x4f4   : > { %v2426_v58 = vadd.f32 %v6648_v45, %v2383_v50  ;;  %v2143_v17 = vadd.f32 %v2136_v26, %v2112_v5  ;;  %v2113_v13 = vadd.f32 %v2106_v33, %v2082_v40  ;;  %v6891_v53 = vpop.permute.xlu0 %2747  ;;  %v2230_v50 = vsel %vm1028_vm7, %v8515_v32, %v6678_v21  ;;  %v8521_v5 = vld [vmem:[#allocation68_spill] sm:$0xff]  ;;  %v8523_v40 = vld [vmem:[#allocation59_spill] sm:$0xff] }
 0x4f5   : > { %v2472_v34 = vadd.f32 %v6728_v47, %v2429_v35  ;;  %v2334_v33 = vsel %vm1167_vm8, %v6624_v0, %v8521_v5  ;;  %v2378_v35 = vsel %vm1167_vm8, %v8523_v40, %v6718_v19 }
 0x4f6   : > { %v2469_v9 = vadd.f32 %v6726_v14, %v2426_v58  ;;  %v2174_v54 = vadd.f32 %v2167_v23, %v2143_v17  ;;  %v2144_v49 = vadd.f32 %v2137_v62, %v2113_v13  ;;  %v8522_v23 = vld [vmem:[#allocation62_spill] sm:$0xff]  ;;  %v2377_v17 = vsel %vm1167_vm8, %v6716_v24, %v8523_v40  ;;  %v8532_v40 = vld [vmem:[#allocation65_spill] sm:$0xff] }
 0x4f7   : > { %v6827_v46 = vpop.permute.xlu1 %2617  ;;  %v2498_v21 = vadd.f32 %v8522_v23, %v2472_v34 }
 0x4f8   : > { %v2205_v31 = vadd.f32 %v2198_v38, %v2174_v54  ;;  %v2495_v2 = vadd.f32 %v8518_v18, %v2469_v9  ;;  %v2175_v3 = vadd.f32 %v2168_v30, %v2144_v49  ;;  %v6917_v13 = vpop.permute.xlu0 %2771  ;;  %v2335_v54 = vsel %vm1167_vm8, %v8521_v5, %v6634_v8  ;;  %v8525_v30 = vld [vmem:[#allocation61_spill] sm:$0xff]  ;;  %v8526_v49 = vld [vmem:[#allocation60_spill] sm:$0xff] }
 0x4f9   : > { %v2524_v62 = vadd.f32 %v6748_v28, %v2498_v21  ;;  %v2420_v36 = vsel %vm1167_vm8, %v6648_v45, %v8525_v30  ;;  %v2421_v45 = vsel %vm1167_vm8, %v8525_v30, %v8516_v6  ;;  %v2541_v21 = vsel %vm1326_vm9, %v8524_v41, %v6760_v43 }
 0x4fa   : > { %v2236_v51 = vadd.f32 %v2229_v61, %v2205_v31  ;;  %v2521_v16 = vadd.f32 %v8520_v7, %v2495_v2  ;;  %v2206_v26 = vadd.f32 %v2199_v55, %v2175_v3  ;;  %v2463_v31 = vsel %vm1167_vm8, %v6726_v14, %v8526_v49  ;;  %v8527_v55 = vld [vmem:[#allocation22_spill] sm:$0xff]  ;;  %v8528_v2 = vld [vmem:[#allocation72_spill] sm:$0xff] }
 0x4fb   : > { %v6846_v12 = vpop.permute.xlu1 %2641  ;;  %v2550_v4 = vadd.f32 %v8527_v55, %v2524_v62  ;;  %v2489_v3 = vsel %vm1326_vm9, %v8518_v18, %v8528_v2  ;;  %v2542_v30 = vsel %vm1326_vm9, %v6760_v43, %v8527_v55 }
 0x4fc   : > { %v2267_v52 = vadd.f32 %v2260_v60, %v2236_v51  ;;  %v2237_v39 = vadd.f32 %v2230_v50, %v2206_v26  ;;  %v2547_v11 = vadd.f32 %v8524_v41, %v2521_v16  ;;  %v8529_v51 = vld [vmem:[#allocation69_spill] sm:$0xff]  ;;  %v2464_v16 = vsel %vm1167_vm8, %v8526_v49, %v6728_v47  ;;  %v8530_v26 = vld [vmem:[#allocation63_spill] sm:$0xff] }
 0x4fd   : > { %v2576_v19 = vadd.f32 %v6782_v48, %v2550_v4  ;;  %v2515_v6 = vsel %vm1326_vm9, %v8520_v7, %v8530_v26  ;;  %v2516_v7 = vsel %vm1326_vm9, %v8530_v26, %v6748_v28  ;;  %v2593_v28 = vsel %vm390_vm2, %v8529_v51, %v6794_v29  ;;  %v8535_v49 = vld [vmem:[#allocation75_spill] sm:$0xff] }
 0x4fe   : > { %v2298_v58 = vadd.f32 %v2291_v44, %v2267_v52  ;;  %v2268_v38 = vadd.f32 %v2261_v1, %v2237_v39  ;;  %v2573_v24 = vadd.f32 %v6772_v63, %v2547_v11  ;;  %v6945_v44 = vpop.permute.xlu0 %2795  ;;  %v8531_v39 = vld [vmem:[#allocation71_spill] sm:$0xff]  ;;  %v8533_v11 = vld [vmem:[#allocation73_spill] sm:$0xff] }
 0x4ff   : > { %v6865_v42 = vpop.permute.xlu1 %2665  ;;  %v2602_v47 = vadd.f32 %v8531_v39, %v2576_v19 }
 0x500   : > { %v2341_v9 = vadd.f32 %v2334_v33, %v2298_v58  ;;  %v2299_v32 = vadd.f32 %v2292_v27, %v2268_v38  ;;  %v2599_v50 = vadd.f32 %v8529_v51, %v2573_v24  ;;  %v2490_v33 = vsel %vm1326_vm9, %v8528_v2, %v8522_v23 }
 0x501   : > { %v2628_v62 = vadd.f32 %v6827_v46, %v2602_v47  ;;  %v2671_v51 = vsel %vm390_vm2, %v6865_v42, %v6770_v20 }
 0x502   : > { %v2384_v61 = vadd.f32 %v2377_v17, %v2341_v9  ;;  %v2342_v60 = vadd.f32 %v2335_v54, %v2299_v32  ;;  %v2625_v52 = vadd.f32 %v6810_v10, %v2599_v50  ;;  %v2567_v17 = vsel %vm1326_vm9, %v6772_v63, %v8532_v40  ;;  %v6971_v54 = vpop.permute.xlu0 %2799 }
 0x503   : > { %v6881_v37 = vpop.permute.xlu1 %2669  ;;  %v2568_v32 = vsel %vm1326_vm9, %v8532_v40, %v6782_v48 }
 0x504   : > { %v2427_v8 = vadd.f32 %v2420_v36, %v2384_v61  ;;  %v2385_v59 = vadd.f32 %v2378_v35, %v2342_v60  ;;  %v2651_v23 = vadd.f32 %v8533_v11, %v2625_v52  ;;  %v8534_v61 = vld [vmem:[#allocation66_spill] sm:$0xff]  ;;  %v2594_v60 = vsel %vm390_vm2, %v6794_v29, %v8531_v39 }
 0x505   : > { %v2619_v35 = vsel %vm390_vm2, %v6810_v10, %v8534_v61  ;;  %v2620_v19 = vsel %vm390_vm2, %v8534_v61, %v6827_v46 }
 0x506   : > { %v2470_v14 = vadd.f32 %v2463_v31, %v2427_v8  ;;  %v2428_v1 = vadd.f32 %v2421_v45, %v2385_v59  ;;  %v2677_v36 = vadd.f32 %v6865_v42, %v2651_v23  ;;  %v2654_v31 = vadd.f32 %v8535_v49, %v2628_v62  ;;  %v2824_v10 = vpop.permute.xlu0 %2823 }
 0x507   : > { %v6900_v25 = vpop.permute.xlu1 %2693  ;;  %v2645_v8 = vsel %vm390_vm2, %v8533_v11, %v6846_v12  ;;  %v2672_v42 = vsel %vm390_vm2, %v6770_v20, %v6881_v37 }
 0x508   : > { %v2496_v18 = vadd.f32 %v2489_v3, %v2470_v14  ;;  %v2471_v58 = vadd.f32 %v2464_v16, %v2428_v1  ;;  %v2680_v45 = vadd.f32 %v6881_v37, %v2654_v31  ;;  %v2703_v48 = vadd.f32 %v6788_v56, %v2677_v36 }
 0x509   : > { %v2646_v16 = vsel %vm390_vm2, %v6846_v12, %v8535_v49  ;;  %v2697_v26 = vsel %vm1535_vm10, %v6788_v56, %v6900_v25  ;;  %v2698_v47 = vsel %vm1535_vm10, %v6900_v25, %v6808_v57 }
 0x50a   : > { %v2522_v27 = vadd.f32 %v2515_v6, %v2496_v18  ;;  %v2497_v38 = vadd.f32 %v2490_v33, %v2471_v58  ;;  %v2706_v6 = vadd.f32 %v6808_v57, %v2680_v45  ;;  %v2848_v33 = vpop.permute.xlu0 %2847 }
 0x50b   : > { %v6919_v0 = vpop.permute.xlu1 %2717 }
 0x50c   : > { %v2548_v9 = vadd.f32 %v2541_v21, %v2522_v27  ;;  %v2523_v63 = vadd.f32 %v2516_v7, %v2497_v38  ;;  %v2729_v29 = vadd.f32 %v6919_v0, %v2703_v48  ;;  %v2723_v1 = vsel %vm1535_vm10, %v6919_v0, %v6837_v15 }
 0x50e   : > { %v2574_v24 = vadd.f32 %v2567_v17, %v2548_v9  ;;  %v2549_v4 = vadd.f32 %v2542_v30, %v2523_v63  ;;  %v2755_v12 = vadd.f32 %v6863_v22, %v2729_v29  ;;  %v2852_v38 = vpop.permute.xlu0 %2851 }
 0x50f   : > { %v6935_v34 = vpop.permute.xlu1 %2721 }
 0x510   : > { %v2600_v43 = vadd.f32 %v2593_v28, %v2574_v24  ;;  %v2575_v2 = vadd.f32 %v2568_v32, %v2549_v4  ;;  %v2732_v18 = vadd.f32 %v6935_v34, %v2706_v6  ;;  %v2724_v0 = vsel %vm1535_vm10, %v6837_v15, %v6935_v34  ;;  %v2972_v6 = vld [vmem:[#allocation2] sm:$0xf] }
 0x512   : > { %v2626_v3 = vadd.f32 %v2619_v35, %v2600_v43  ;;  %v2601_v50 = vadd.f32 %v2594_v60, %v2575_v2  ;;  %v2758_v40 = vadd.f32 %v6891_v53, %v2732_v18  ;;  %v8541_v18 = vld [vmem:[#allocation32_spill] sm:$0xff] }
 0x513   : > { %v6954_v5 = vpop.permute.xlu1 %2745 }
 0x514   : > { %v2652_v59 = vadd.f32 %v2645_v8, %v2626_v3  ;;  %v2627_v46 = vadd.f32 %v2620_v19, %v2601_v50  ;;  %v2749_v20 = vsel %vm1535_vm10, %v6863_v22, %v6954_v5  ;;  %v2750_v57 = vsel %vm1535_vm10, %v6954_v5, %v6891_v53 }
 0x516   : > { %v2678_v52 = vadd.f32 %v2671_v51, %v2652_v59  ;;  %v2653_v21 = vadd.f32 %v2646_v16, %v2627_v46  ;;  %v8536_v16 = vld [vmem:[#allocation29_spill] sm:$0xff] }
 0x517   : > { %v2770_v41 = vpop.permute.xlu1 %2769  ;;  %v8538_v46 = vld [vmem:[#allocation33_spill] sm:$0xff] }
 0x518   : > { %v2704_v39 = vadd.f32 %v2697_v26, %v2678_v52  ;;  %v2781_v37 = vadd.f32 %v2770_v41, %v2755_v12  ;;  %v2679_v58 = vadd.f32 %v2672_v42, %v2653_v21  ;;  %v2775_v7 = vsel %vm1535_vm10, %v2770_v41, %v6917_v13  ;;  %v8537_v26 = vld [vmem:[#allocation28_spill] sm:$0xff]  ;;  %v8539_v52 = vld [vmem:[#allocation30_spill] sm:$0xff] }
 0x519   : > { %v8540_v42 = vld [vmem:[#allocation8_spill] sm:$0xff]  ;;  %v8542_v12 = vld [vmem:[#allocation34_spill] sm:$0xff] }
 0x51a   : > { %v2730_v27 = vadd.f32 %v2723_v1, %v2704_v39  ;;  %v2705_v17 = vadd.f32 %v2698_v47, %v2679_v58  ;;  %v2807_v23 = vadd.f32 %v6945_v44, %v2781_v37  ;;  %v2973_v1 = vmul.f32 %v2972_v6, %v8540_v42  ;;  %v8544_v21 = vld [vmem:[#allocation48_spill] sm:$0xff]  ;;  %v8545_v39 = vld [vmem:[#allocation49_spill] sm:$0xff]  ;;  %v8546_v47 = vld [vmem:[#allocation51_spill] sm:$0xff] }
 0x51b   : > { %v2774_v55 = vpop.permute.xlu1 %2773  ;;  %v8548_v37 = vld [vmem:[#allocation13_spill] sm:$0xff] }
 0x51c   : > { %v2756_v62 = vadd.f32 %v2749_v20, %v2730_v27  ;;  %v2784_v22 = vadd.f32 %v2774_v55, %v2758_v40  ;;  %v2731_v15 = vadd.f32 %v2724_v0, %v2705_v17  ;;  %v2776_v9 = vsel %vm1535_vm10, %v6917_v13, %v2774_v55  ;;  %v2876_v13 = vpop.permute.xlu0 %2875  ;;  %v8547_v20 = vld [vmem:[#allocation50_spill] sm:$0xff]  ;;  %v8549_v27 = vld [vmem:[#allocation52_spill] sm:$0xff]  ;;  %v3130_v0 = vld [vmem:[%s8114_s6] sm:$0xf] }
 0x51d   : > { %v8550_v40 = vmov 1   ;;  %v8551_v17 = vmov 2  }
 0x51e   : > { %v2782_v34 = vadd.f32 %v2775_v7, %v2756_v62  ;;  %v2757_v28 = vadd.f32 %v2750_v57, %v2731_v15  ;;  %v2810_v5 = vadd.f32 %v6971_v54, %v2784_v22  ;;  %v7104_v7 = vld [vmem:[%s8113_s5] sm:$0xf]  ;;  %v8552_v62 = vmov 3  }
 0x51f   : > { %v2798_v14 = vpop.permute.xlu1 %2797  ;;  %v8554_v57 = vmov 4   ;;  %v8555_v22 = vmov 6  }
 0x520   : > { %v2801_v25 = vsel %vm1640_vm11, %v6945_v44, %v2798_v14  ;;  %v2802_v53 = vsel %vm1640_vm11, %v2798_v14, %v6971_v54  ;;  %v2783_v44 = vadd.f32 %v2776_v9, %v2757_v28 }
 0x521   : > { %v2808_v36 = vadd.f32 %v2801_v25, %v2782_v34  ;;  %v8556_v25 = vmov 14  }
 0x522   : > { %v2809_v31 = vadd.f32 %v2802_v53, %v2783_v44 }
 0x523   : > { %v2822_v56 = vpop.permute.xlu1 %2821 }
 0x524   : > { %v2827_v41 = vsel %vm1640_vm11, %v2822_v56, %v2824_v10  ;;  %v2833_v30 = vadd.f32 %v2822_v56, %v2807_v23  ;;  %v3080_v56 = vld [vmem:[#allocation2] sm:$0xf] }
 0x525   : > { %v2834_v32 = vadd.f32 %v2827_v41, %v2808_v36  ;;  %v3081_v58 = vmul.f32 %v3080_v56, %v8548_v37  ;;  %v8557_v36 = vld [vmem:[#allocation6_spill] sm:$0xff] }
 0x526   : > { %v2859_v49 = vadd.f32 %v2848_v33, %v2833_v30 }
 0x527   : > { %v2826_v11 = vpop.permute.xlu1 %2825 }
 0x528   : > { %v2828_v61 = vsel %vm1640_vm11, %v2824_v10, %v2826_v11  ;;  %v2836_v35 = vadd.f32 %v2826_v11, %v2810_v5  ;;  %v8553_v11 = vmov 5  }
 0x529   : > { %v2835_v45 = vadd.f32 %v2828_v61, %v2809_v31 }
 0x52a   : > { %v2862_v2 = vadd.f32 %v2852_v38, %v2836_v35  ;;  %v8560_v35 = vld [vmem:[#allocation12_spill] sm:$0xff] }
 0x52b   : > { %v2850_v63 = vpop.permute.xlu1 %2849 }
 0x52c   : > { %v2853_v24 = vsel %vm1640_vm11, %v2848_v33, %v2850_v63  ;;  %v2854_v55 = vsel %vm1640_vm11, %v2850_v63, %v2852_v38  ;;  %v8543_v33 = vld [vmem:[#allocation47_spill] sm:$0xff] }
 0x52d   : > { %v2860_v4 = vadd.f32 %v2853_v24, %v2834_v32  ;;  %v2861_v3 = vadd.f32 %v2854_v55, %v2835_v45  ;;  %v8558_v24 = vld [vmem:[#allocation7_spill] sm:$0xff]  ;;  %v8563_v55 = vmov 7   ;;  %v8565_v45 = vmov 9  }
 0x52e   : > { %v8559_v32 = vld [vmem:[#allocation11_spill] sm:$0xff] }
 0x52f   : > { %v2874_v43 = vpop.permute.xlu1 %2873 }
 0x530   : > { %v2879_v60 = vsel %vm1640_vm11, %v2874_v43, %v2876_v13  ;;  %v7045_v8 = vadd.f32 %v2874_v43, %v2859_v49 }
 0x531   : > { %v7047_v54 = vadd.f32 %v2879_v60, %v2860_v4  ;;  %v8562_v4 = vld [vmem:[#allocation10_spill] sm:$0xff]  ;;  %v8564_v60 = vmov 8  }
 0x532   : > { %v2889_v48 = vmax.f32 %v7045_v8, 0.0 }
 0x533   : > { %v2890_v10 = vmax.f32 %v7047_v54, 0.0  ;;  %v2878_v19 = vpop.permute.xlu1 %2877 }
 0x534   : > { %v2880_v51 = vsel %vm1640_vm11, %v2876_v13, %v2878_v19  ;;  %v7052_v29 = vadd.f32 %v2878_v19, %v2862_v2  ;;  %2897 = vrot.lane.b32.xlu0 %v2889_v48, %s4546_s24  ;;  %v8561_v13 = vld [vmem:[#allocation9_spill] sm:$0xff]  ;;  %v8566_v2 = vmov 10   ;;  %v8568_v19 = vmov 12  }
 0x535   : > { %v7057_v50 = vadd.f32 %v2880_v51, %v2861_v3  ;;  %2899 = vrot.lane.b32.xlu1 %v2890_v10, %s4546_s24  ;;  %v8567_v3 = vmov 11   ;;  %v8569_v51 = vmov 13  }
 0x536   : > { %v2892_v59 = vmax.f32 %v7052_v29, 0.0 }
 0x537   : > { %v2891_v14 = vmax.f32 %v7057_v50, 0.0  ;;  %v8589_v50 = vmov 34  }
 0x539   : > { %2903 = vrot.lane.b32.xlu1 %v2892_v59, %s4546_s24  ;;  %2901 = vrot.lane.b32.xlu0 %v2891_v14, %s4546_s24 }
 0x53d   : > { %2916 = vrot.lane.b32.xlu1 %v8536_v16, %s4524_s9  ;;  %2914 = vrot.lane.b32.xlu0 %v8537_v26, %s4524_s9 }
 0x541   : > { %2958 = vrot.lane.b32.xlu1 %v8538_v46, %s4524_s9  ;;  %2918 = vrot.lane.b32.xlu0 %v8539_v52, %s4524_s9 }
 0x545   : > { %2981 = vrot.lane.b32.xlu1 %v2973_v1, %s4547_s25  ;;  %2956 = vrot.lane.b32.xlu0 %v8541_v18, %s4524_s9 }
 0x549   : > { %2960 = vrot.lane.b32.xlu0 %v8542_v12, %s4524_s9  ;;  %3022 = vrot.lane.b32.xlu1 %v8543_v33, %s4524_s9 }
 0x54d   : > { %3024 = vrot.lane.b32.xlu0 %v8544_v21, %s4524_s9  ;;  %3026 = vrot.lane.b32.xlu1 %v8545_v39, %s4524_s9 }
 0x551   : > { %3066 = vrot.lane.b32.xlu0 %v8546_v47, %s4524_s9  ;;  %3064 = vrot.lane.b32.xlu1 %v8547_v20, %s4524_s9 }
 0x555   : > { %3089 = vrot.lane.b32.xlu0 %v3081_v58, %s4548_s26  ;;  %3068 = vrot.lane.b32.xlu1 %v8549_v27, %s4524_s9 }
 0x559   : > { %3133 = vperm.xlu0 %4451, %v3130_v0   ;;  %3141 = vperm.xlu1 %4452, %v7104_v7  }
 0x55d   : > { %4453 = vset.pattern.permute.xlu1 %v8550_v40  ;;  %4454 = vset.pattern.permute.xlu0 %v8551_v17 }
 0x55e   : > { %3175 = vperm.xlu1 %4453, %v7104_v7   ;;  %3209 = vperm.xlu0 %4454, %v7104_v7  }
 0x562   : > { %4455 = vset.pattern.permute.xlu1 %v8552_v62  ;;  %4457 = vset.pattern.permute.xlu0 %v8553_v11 }
 0x563   : > { %3243 = vperm.xlu1 %4455, %v7104_v7   ;;  %3307 = vperm.xlu0 %4457, %v7104_v7  }
 0x567   : > { %4456 = vset.pattern.permute.xlu1 %v8554_v57  ;;  %4458 = vset.pattern.permute.xlu0 %v8555_v22 }
 0x568   : > { %3276 = vperm.xlu1 %4456, %v7104_v7  }
 0x56c   : > { %4466 = vset.pattern.permute.xlu1 %v8556_v25 }
 0x5a6   : > { %v2898_v23 = vpop.permute.xlu0 %2897 }
 0x5a7   : > { %v2900_v38 = vpop.permute.xlu1 %2899 }
 0x5a8   : > { %v2905_v15 = vsel %vm1774_vm12, %v2898_v23, %v2900_v38 }
 0x5a9   : > { %2911 = vst [vmem:[#allocation2 + $0x8] sm:$0xf] %v2905_v15 }
 0x5ab   : > { %v2904_v34 = vpop.permute.xlu1 %2903  ;;  %v2902_v9 = vpop.permute.xlu0 %2901 }
 0x5ac   : > { %v2906_v41 = vsel %vm1774_vm12, %v2900_v38, %v2902_v9  ;;  %v2907_v30 = vsel %vm1774_vm12, %v2902_v9, %v2904_v34 }
 0x5ad   : > { %2912 = vst [vmem:[#allocation2 + $0x10] sm:$0xf] %v2906_v41  ;;  %2913 = vst.msk [vmem:[#allocation2 + $0x18] sm:$0xf] %vm326_vm0, %v2907_v30 }
 0x5af   : > { %v7146_v16 = vpop.permute.xlu1 %2916  ;;  %v2915_v6 = vpop.permute.xlu0 %2914 }
 0x5b0   : > { %v2930_v28 = vld [vmem:[#allocation2 + $0x8] sm:$0xf]  ;;  %v2926_v62 = vmul.f32 %v2915_v6, %v2889_v48  ;;  %v2920_v23 = vsel %vm1167_vm8, %v2915_v6, %v7146_v16  ;;  %v8586_v6 = vmov 29  }
 0x5b1   : > { %v2933_v63 = vmul.f32 %v2930_v28, %v8557_v36  ;;  %v2974_v31 = vmul.f32 %v2930_v28, %v8561_v13  ;;  %v2927_v8 = vmul.f32 %v2920_v23, %v2890_v10  ;;  %v8570_v10 = vmov 16  }
 0x5b2   : > { %v8576_v13 = vmov 22  }
 0x5b3   : > { %2939 = vrot.lane.b32.xlu1 %v2933_v63, %s4549_s14  ;;  %v7148_v26 = vpop.permute.xlu1 %2958  ;;  %v7150_v52 = vpop.permute.xlu0 %2918 }
 0x5b4   : > { %v2932_v53 = vld [vmem:[#allocation2 + $0x18] sm:$0xf]  ;;  %v2931_v5 = vld [vmem:[#allocation2 + $0x10] sm:$0xf]  ;;  %v2929_v34 = vmul.f32 %v7150_v52, %v2892_v59 }
 0x5b5   : > { %v2935_v44 = vmul.f32 %v2932_v53, %v8558_v24  ;;  %v2934_v61 = vmul.f32 %v2931_v5, %v8559_v32  ;;  %v2975_v49 = vmul.f32 %v2931_v5, %v8560_v35  ;;  %v2976_v43 = vmul.f32 %v2932_v53, %v8562_v4 }
 0x5b6   : > { %v8572_v32 = vmov 19   ;;  %v8574_v35 = vmov 20   ;;  %v8578_v4 = vmov 23  }
 0x5b7   : > { %2943 = vrot.lane.b32.xlu1 %v2935_v44, %s4549_s14  ;;  %2941 = vrot.lane.b32.xlu0 %v2934_v61, %s4549_s14  ;;  %v2982_v46 = vpop.permute.xlu1 %2981  ;;  %v2957_v1 = vpop.permute.xlu0 %2956  ;;  %v8571_v44 = vmov 17   ;;  %v8573_v61 = vmov 15  }
 0x5b8   : > { %v2962_v59 = vsel %vm1167_vm8, %v2957_v1, %v7148_v26 }
 0x5bb   : > { %2985 = vrot.lane.b32.xlu1 %v2975_v49, %s4547_s25  ;;  %2983 = vrot.lane.b32.xlu0 %v2974_v31, %s4547_s25  ;;  %v7152_v42 = vpop.permute.xlu1 %3022  ;;  %v7156_v12 = vpop.permute.xlu0 %2960  ;;  %v8575_v49 = vmov 18   ;;  %v8577_v31 = vmov 21  }
 0x5bf   : > { %2987 = vrot.lane.b32.xlu0 %v2976_v43, %s4547_s25  ;;  %v7154_v18 = vpop.permute.xlu1 %3026  ;;  %v7160_v21 = vpop.permute.xlu0 %3024  ;;  %v8579_v43 = vmov 24  }
 0x5c3   : > { %3338 = vperm.xlu0 %4458, %v7104_v7   ;;  %v7158_v33 = vpop.permute.xlu1 %3064  ;;  %v7166_v47 = vpop.permute.xlu0 %3066 }
 0x5c7   : > { %4459 = vset.pattern.permute.xlu0 %v8563_v55  ;;  %v7162_v39 = vpop.permute.xlu1 %3068  ;;  %v7170_v37 = vpop.permute.xlu0 %3089  ;;  %v8580_v55 = vmov 25  }
 0x5c8   : > { %3369 = vperm.xlu0 %4459, %v7104_v7  }
 0x5cc   : > { %4460 = vset.pattern.permute.xlu0 %v8564_v60  ;;  %v8581_v60 = vmov 27  }
 0x5cd   : > { %3400 = vperm.xlu0 %4460, %v7104_v7  }
 0x5d1   : > { %4461 = vset.pattern.permute.xlu0 %v8565_v45  ;;  %v8582_v45 = vmov 26  }
 0x5d2   : > { %3431 = vperm.xlu0 %4461, %v7104_v7  }
 0x5d6   : > { %4462 = vset.pattern.permute.xlu0 %v8566_v2  ;;  %v8583_v2 = vmov 30  }
 0x5d7   : > { %3462 = vperm.xlu0 %4462, %v7104_v7  }
 0x5d8   : > { %v7164_v56 = vpop.permute.xlu1 %3141  ;;  %v7172_v58 = vpop.permute.xlu0 %3133 }
 0x5db   : > { %4463 = vset.pattern.permute.xlu0 %v8567_v3  ;;  %v8584_v3 = vmov 28  }
 0x5dc   : > { %3493 = vperm.xlu0 %4463, %v7104_v7  }
 0x5dd   : > { %v7168_v20 = vpop.permute.xlu1 %3175  ;;  %v7176_v0 = vpop.permute.xlu0 %3209 }
 0x5e0   : > { %4464 = vset.pattern.permute.xlu0 %v8568_v19  ;;  %v8585_v19 = vmov 33  }
 0x5e1   : > { %3524 = vperm.xlu0 %4464, %v7104_v7  }
 0x5e2   : > { %v7174_v27 = vpop.permute.xlu1 %3243  ;;  %v7180_v17 = vpop.permute.xlu0 %3307 }
 0x5e5   : > { %4465 = vset.pattern.permute.xlu0 %v8569_v51  ;;  %v2921_v51 = vsel %vm1167_vm8, %v7146_v16, %v7150_v52  ;;  %v8588_v52 = vmov 32  }
 0x5e7   : > { %v7178_v40 = vpop.permute.xlu1 %3276 }
 0x625   : > { %v2940_v11 = vpop.permute.xlu1 %2939 }
 0x626   : > { %v2952_v57 = vadd.f32 %v2940_v11, %v2926_v62 }
 0x628   : > { %v2968_v22 = vmul.f32 %v2957_v1, %v2952_v57  ;;  %v2928_v1 = vmul.f32 %v2921_v51, %v2891_v14  ;;  %v2963_v57 = vsel %vm1167_vm8, %v7148_v26, %v7156_v12  ;;  %v8596_v51 = vld [vmem:[#allocation35_spill] sm:$0xff] }
 0x629   : > { %v2942_v25 = vpop.permute.xlu0 %2941  ;;  %v2944_v38 = vpop.permute.xlu1 %2943 }
 0x62a   : > { %v7186_v15 = vadd.f32 %v2982_v46, %v2968_v22  ;;  %v2946_v9 = vsel %vm2945_vm13, %v2940_v11, %v2942_v25  ;;  %v2955_v48 = vadd.f32 %v2944_v38, %v2929_v34  ;;  %v8587_v11 = vmov 31  }
 0x62b   : > { %v2953_v30 = vadd.f32 %v2946_v9, %v2927_v8 }
 0x62c   : > { %3005 = vrot.lane.b32.xlu1 %v7186_v15, %s4546_s24  ;;  %v2971_v36 = vmul.f32 %v7156_v12, %v2955_v48 }
 0x62d   : > { %v2984_v41 = vpop.permute.xlu0 %2983  ;;  %v2986_v28 = vpop.permute.xlu1 %2985  ;;  %v2969_v53 = vmul.f32 %v2962_v59, %v2953_v30  ;;  %v8590_v59 = vld [vmem:[#allocation15_spill] sm:$0xff] }
 0x62e   : > { %v2990_v54 = vsel %vm2989_vm14, %v2982_v46, %v2984_v41  ;;  %v2947_v46 = vsel %vm2945_vm13, %v2942_v25, %v2944_v38  ;;  %v2991_v16 = vsel %vm2989_vm14, %v2984_v41, %v2986_v28 }
 0x62f   : > { %v7208_v24 = vadd.f32 %v2990_v54, %v2969_v53  ;;  %v2954_v62 = vadd.f32 %v2947_v46, %v2928_v1  ;;  %v8597_v46 = vld [vmem:[#allocation36_spill] sm:$0xff] }
 0x630   : > { %3586 = vperm.xlu1 %4466, %v7104_v7  }
 0x631   : > { %v2988_v29 = vpop.permute.xlu0 %2987  ;;  %v2970_v22 = vmul.f32 %v2963_v57, %v2954_v62  ;;  %v8598_v62 = vld [vmem:[#allocation38_spill] sm:$0xff]  ;;  %v8599_v57 = vmov 35  }
 0x632   : > { %v2992_v63 = vsel %vm2989_vm14, %v2986_v28, %v2988_v29 }
 0x633   : > { %v7201_v5 = vadd.f32 %v2992_v63, %v2971_v36  ;;  %v7258_v25 = vadd.f32 %v2991_v16, %v2970_v22  ;;  %v8600_v22 = vld [vmem:[#allocation14_spill] sm:$0xff] }
 0x634   : > { %4468 = vset.pattern.permute.xlu1 %v8570_v10 }
 0x635   : > { %3649 = vperm.xlu1 %4468, %v7104_v7   ;;  %3011 = vrot.lane.b32.xlu0 %v7201_v5, %s4546_s24 }
 0x639   : > { %4469 = vset.pattern.permute.xlu1 %v8571_v44  ;;  %3007 = vrot.lane.b32.xlu0 %v7208_v24, %s4546_s24 }
 0x63a   : > { %3692 = vperm.xlu1 %4469, %v7104_v7  }
 0x63d   : > { %3555 = vperm.xlu0 %4465, %v7104_v7  }
 0x63e   : > { %4471 = vset.pattern.permute.xlu1 %v8572_v32 }
 0x63f   : > { %3778 = vperm.xlu1 %4471, %v7104_v7  }
 0x641   : > { %4467 = vset.pattern.permute.xlu0 %v8573_v61 }
 0x642   : > { %3617 = vperm.xlu0 %4467, %v7104_v7   ;;  %v7263_v14 = vpop.permute.xlu0 %3338 }
 0x643   : > { %4472 = vset.pattern.permute.xlu1 %v8574_v35 }
 0x644   : > { %3820 = vperm.xlu1 %4472, %v7104_v7  }
 0x646   : > { %4470 = vset.pattern.permute.xlu0 %v8575_v49 }
 0x647   : > { %3735 = vperm.xlu0 %4470, %v7104_v7   ;;  %v7265_v23 = vpop.permute.xlu0 %3369 }
 0x648   : > { %4474 = vset.pattern.permute.xlu1 %v8576_v13 }
 0x649   : > { %3872 = vperm.xlu1 %4474, %v7104_v7  }
 0x64b   : > { %4473 = vset.pattern.permute.xlu0 %v8577_v31 }
 0x64c   : > { %3846 = vperm.xlu0 %4473, %v7104_v7   ;;  %v7267_v38 = vpop.permute.xlu0 %3400 }
 0x64d   : > { %4475 = vset.pattern.permute.xlu1 %v8578_v4 }
 0x64e   : > { %3898 = vperm.xlu1 %4475, %v7104_v7  }
 0x650   : > { %4476 = vset.pattern.permute.xlu0 %v8579_v43 }
 0x651   : > { %3924 = vperm.xlu0 %4476, %v7104_v7   ;;  %v7269_v26 = vpop.permute.xlu0 %3431 }
 0x652   : > { %4477 = vset.pattern.permute.xlu1 %v8580_v55 }
 0x653   : > { %3950 = vperm.xlu1 %4477, %v7104_v7  }
 0x655   : > { %4479 = vset.pattern.permute.xlu0 %v8581_v60 }
 0x656   : > { %4002 = vperm.xlu0 %4479, %v7104_v7   ;;  %v7271_v12 = vpop.permute.xlu0 %3462 }
 0x657   : > { %4478 = vset.pattern.permute.xlu1 %v8582_v45 }
 0x658   : > { %3976 = vperm.xlu1 %4478, %v7104_v7  }
 0x65a   : > { %4482 = vset.pattern.permute.xlu0 %v8583_v2 }
 0x65b   : > { %4080 = vperm.xlu0 %4482, %v7104_v7   ;;  %v7273_v34 = vpop.permute.xlu0 %3493 }
 0x65c   : > { %4480 = vset.pattern.permute.xlu1 %v8584_v3  ;;  %v8595_v3 = vld [vmem:[#allocation37_spill] sm:$0xff] }
 0x65d   : > { %4028 = vperm.xlu1 %4480, %v7104_v7  }
 0x65f   : > { %4485 = vset.pattern.permute.xlu0 %v8585_v19 }
 0x660   : > { %v7275_v9 = vpop.permute.xlu0 %3524 }
 0x661   : > { %4481 = vset.pattern.permute.xlu1 %v8586_v6 }
 0x662   : > { %4054 = vperm.xlu1 %4481, %v7104_v7  }
 0x666   : > { %4483 = vset.pattern.permute.xlu1 %v8587_v11 }
 0x667   : > { %4106 = vperm.xlu1 %4483, %v7104_v7  }
 0x66b   : > { %4484 = vset.pattern.permute.xlu1 %v8588_v52 }
 0x66c   : > { %4132 = vperm.xlu1 %4484, %v7104_v7  }
 0x670   : > { %3009 = vrot.lane.b32.xlu1 %v7258_v25, %s4546_s24 }
 0x671   : > { %4486 = vset.pattern.permute.xlu1 %v8589_v50 }
 0x69e   : > { %v3006_v48 = vpop.permute.xlu1 %3005 }
 0x6a7   : > { %v3012_v8 = vpop.permute.xlu0 %3011 }
 0x6ab   : > { %v3008_v41 = vpop.permute.xlu0 %3007 }
 0x6ac   : > { %v3013_v30 = vsel %vm1774_vm12, %v3006_v48, %v3008_v41 }
 0x6ad   : > { %3019 = vst [vmem:[#allocation2 + $0x8] sm:$0xf] %v3013_v30 }
 0x6af   : > { %v7278_v28 = vpop.permute.xlu1 %3586 }
 0x6b4   : > { %v7280_v36 = vpop.permute.xlu1 %3649  ;;  %v3038_v29 = vld [vmem:[#allocation2 + $0x8] sm:$0xf] }
 0x6b5   : > { %v3041_v63 = vmul.f32 %v3038_v29, %v8590_v59  ;;  %v3082_v1 = vmul.f32 %v3038_v29, %v8597_v46  ;;  %v3028_v46 = vsel %vm1167_vm8, %v7152_v42, %v7160_v21 }
 0x6b7   : > { %3047 = vrot.lane.b32.xlu0 %v3041_v63, %s4550_s15 }
 0x6b9   : > { %v7283_v53 = vpop.permute.xlu1 %3692 }
 0x6bc   : > { %v7321_v52 = vpop.permute.xlu0 %3555 }
 0x6be   : > { %v7285_v54 = vpop.permute.xlu1 %3778 }
 0x6c1   : > { %v7323_v50 = vpop.permute.xlu0 %3617 }
 0x6c3   : > { %v7287_v10 = vpop.permute.xlu1 %3820 }
 0x6c8   : > { %v7289_v44 = vpop.permute.xlu1 %3872 }
 0x6cd   : > { %v7291_v32 = vpop.permute.xlu1 %3898 }
 0x6d2   : > { %v7293_v61 = vpop.permute.xlu1 %3950 }
 0x6d7   : > { %v7295_v35 = vpop.permute.xlu1 %3976 }
 0x6dc   : > { %v7297_v49 = vpop.permute.xlu1 %4028 }
 0x6dd   : > { %8591 = vst [vmem:[#allocation76_spill] sm:$0xff] %v7297_v49 }
 0x6e1   : > { %v7299_v13 = vpop.permute.xlu1 %4054 }
 0x6e2   : > { %8592 = vst [vmem:[#allocation70_spill] sm:$0xff] %v7299_v13 }
 0x6e6   : > { %v7301_v31 = vpop.permute.xlu1 %4106 }
 0x6e7   : > { %8593 = vst [vmem:[#allocation74_spill] sm:$0xff] %v7301_v31 }
 0x6eb   : > { %v7303_v4 = vpop.permute.xlu1 %4132 }
 0x6ec   : > { %8594 = vst [vmem:[#allocation78_spill] sm:$0xff] %v7303_v4 }
 0x6ef   : > { %v3010_v43 = vpop.permute.xlu1 %3009 }
 0x6f0   : > { %v3014_v55 = vsel %vm1774_vm12, %v3008_v41, %v3010_v43  ;;  %v3015_v60 = vsel %vm1774_vm12, %v3010_v43, %v3012_v8  ;;  %v7325_v8 = vpop.permute.xlu0 %3735 }
 0x6f1   : > { %3020 = vst [vmem:[#allocation2 + $0x10] sm:$0xf] %v3014_v55  ;;  %3021 = vst.msk [vmem:[#allocation2 + $0x18] sm:$0xf] %vm326_vm0, %v3015_v60 }
 0x6f4   : > { %v7327_v48 = vpop.permute.xlu0 %3846 }
 0x6f8   : > { %v3039_v45 = vld [vmem:[#allocation2 + $0x10] sm:$0xf]  ;;  %v3040_v2 = vld [vmem:[#allocation2 + $0x18] sm:$0xf]  ;;  %v7329_v41 = vpop.permute.xlu0 %3924 }
 0x6f9   : > { %v3042_v19 = vmul.f32 %v3039_v45, %v8595_v3  ;;  %v3043_v6 = vmul.f32 %v3040_v2, %v8596_v51  ;;  %v3083_v11 = vmul.f32 %v3039_v45, %v8598_v62  ;;  %v3084_v16 = vmul.f32 %v3040_v2, %v8600_v22 }
 0x6fa   : > { %v3037_v51 = vmul.f32 %v7154_v18, %v7201_v5  ;;  %v3035_v62 = vmul.f32 %v3028_v46, %v7208_v24  ;;  %v8606_v46 = vld [vmem:[#allocation5_spill] sm:$0xff] }
 0x6fb   : > { %3049 = vrot.lane.b32.xlu1 %v3042_v19, %s4550_s15  ;;  %3051 = vrot.lane.b32.xlu0 %v3043_v6, %s4550_s15 }
 0x6fc   : > { %v7331_v30 = vpop.permute.xlu0 %4002 }
 0x6fd   : > { %8601 = vst [vmem:[#allocation77_spill] sm:$0xff] %v7331_v30 }
 0x6ff   : > { %3091 = vrot.lane.b32.xlu1 %v3082_v1, %s4548_s26  ;;  %3093 = vrot.lane.b32.xlu0 %v3083_v11, %s4548_s26 }
 0x700   : > { %v7333_v29 = vpop.permute.xlu0 %4080 }
 0x701   : > { %8602 = vst [vmem:[#allocation79_spill] sm:$0xff] %v7333_v29 }
 0x703   : > { %4184 = vperm.xlu1 %4486, %v7104_v7   ;;  %4158 = vperm.xlu0 %4485, %v7104_v7  }
 0x707   : > { %4487 = vset.pattern.permute.xlu1 %v8599_v57  ;;  %4488 = vset.pattern.permute.xlu0 %v8599_v57 }
 0x708   : > { %4210 = vperm.xlu1 %4487, %v7104_v7   ;;  %v3034_v7 = vmul.f32 %v7152_v42, %v7186_v15  ;;  %v3029_v15 = vsel %vm1167_vm8, %v7160_v21, %v7154_v18  ;;  %v3070_v42 = vsel %vm1167_vm8, %v7158_v33, %v7166_v47 }
 0x709   : > { %v3036_v1 = vmul.f32 %v3029_v15, %v7258_v25 }
 0x70c   : > { %3095 = vrot.lane.b32.xlu1 %v3084_v16, %s4548_s26 }
 0x729   : > { %v3048_v59 = vpop.permute.xlu0 %3047 }
 0x72a   : > { %v3060_v63 = vadd.f32 %v3048_v59, %v3034_v7  ;;  %v3071_v7 = vsel %vm1167_vm8, %v7166_v47, %v7162_v39 }
 0x72c   : > { %v3076_v55 = vmul.f32 %v7158_v33, %v3060_v63 }
 0x76d   : > { %v3050_v43 = vpop.permute.xlu1 %3049  ;;  %v3052_v3 = vpop.permute.xlu0 %3051 }
 0x76e   : > { %v3055_v6 = vsel %vm3053_vm1, %v3050_v43, %v3052_v3  ;;  %v3063_v11 = vadd.f32 %v3052_v3, %v3037_v51 }
 0x76f   : > { %v3062_v57 = vadd.f32 %v3055_v6, %v3036_v1  ;;  %v8607_v1 = vld [vmem:[#allocation4_spill] sm:$0xff] }
 0x770   : > { %v3079_v5 = vmul.f32 %v7162_v39, %v3063_v11 }
 0x771   : > { %v3092_v60 = vpop.permute.xlu1 %3091  ;;  %v3094_v18 = vpop.permute.xlu0 %3093  ;;  %v3078_v25 = vmul.f32 %v3071_v7, %v3062_v57 }
 0x772   : > { %v3098_v45 = vsel %vm3097_vm15, %v7170_v37, %v3092_v60  ;;  %v3054_v37 = vsel %vm3053_vm1, %v3048_v59, %v3050_v43  ;;  %v3099_v43 = vsel %vm3097_vm15, %v3092_v60, %v3094_v18 }
 0x773   : > { %v3105_v2 = vadd.f32 %v3098_v45, %v3076_v55  ;;  %v3061_v16 = vadd.f32 %v3054_v37, %v3035_v62 }
 0x775   : > { %3113 = vrot.lane.b32.xlu0 %v3105_v2, %s4546_s24  ;;  %v3077_v59 = vmul.f32 %v3070_v42, %v3061_v16  ;;  %v8608_v16 = vld [vmem:[#allocation53_spill] sm:$0xff] }
 0x777   : > { %v3106_v45 = vadd.f32 %v3099_v43, %v3077_v59 }
 0x782   : > { %v7341_v19 = vpop.permute.xlu1 %4184  ;;  %v7367_v39 = vpop.permute.xlu0 %4158 }
 0x783   : > { %8603 = vst [vmem:[#allocation27_spill] sm:$0xff] %v7341_v19  ;;  %8605 = vst [vmem:[#allocation45_spill] sm:$0xff] %v7367_v39 }
 0x787   : > { %v7353_v22 = vpop.permute.xlu1 %4210 }
 0x788   : > { %8604 = vst [vmem:[#allocation25_spill] sm:$0xff] %v7353_v22 }
 0x78b   : > { %v3096_v21 = vpop.permute.xlu1 %3095 }
 0x78c   : > { %v3100_v24 = vsel %vm3097_vm15, %v3094_v18, %v3096_v21  ;;  %v3108_v63 = vadd.f32 %v3096_v21, %v3079_v5  ;;  %v8609_v18 = vld [vmem:[#allocation3_spill] sm:$0xff] }
 0x78d   : > { %v3107_v55 = vadd.f32 %v3100_v24, %v3078_v25 }
 0x78e   : > { %3119 = vrot.lane.b32.xlu1 %v3108_v63, %s4546_s24 }
 0x78f   : > { %3117 = vrot.lane.b32.xlu0 %v3107_v55, %s4546_s24 }
 0x792   : > { %3115 = vrot.lane.b32.xlu1 %v3106_v45, %s4546_s24 }
 0x7e7   : > { %v3114_v2 = vpop.permute.xlu0 %3113 }
 0x800   : > { %v3120_v33 = vpop.permute.xlu1 %3119 }
 0x801   : > { %v3118_v47 = vpop.permute.xlu0 %3117 }
 0x802   : > { %v3123_v3 = vsel %vm1774_vm12, %v3118_v47, %v3120_v33 }
 0x803   : > { %3129 = vst.msk [vmem:[#allocation2 + $0x18] sm:$0xf] %vm326_vm0, %v3123_v3 }
 0x804   : > { %v3116_v15 = vpop.permute.xlu1 %3115 }
 0x805   : > { %v3121_v60 = vsel %vm1774_vm12, %v3114_v2, %v3116_v15  ;;  %v3122_v51 = vsel %vm1774_vm12, %v3116_v15, %v3118_v47 }
 0x806   : > { %3127 = vst [vmem:[#allocation2 + $0x8] sm:$0xf] %v3121_v60  ;;  %3128 = vst [vmem:[#allocation2 + $0x10] sm:$0xf] %v3122_v51 }
 0x80d   : > { %v3138_v6 = vld [vmem:[#allocation2] ss:$8 sm:$0xf]  ;;  %v3173_v42 = vld [vmem:[#allocation2 + $0x1] ss:$8 sm:$0xf] }
 0x80e   : > { %v7374_v37 = vrot.slane %v3138_v6, %v8606_v46  ;;  %v7377_v62 = vrot.slane %v3138_v6, %v8607_v1  ;;  %v7384_v7 = vrot.slane %v3138_v6, %v8608_v16  ;;  %v7387_v5 = vrot.slane %v3138_v6, %v8609_v18  ;;  %v3207_v63 = vld [vmem:[#allocation2 + $0x2] ss:$8 sm:$0xf]  ;;  %v3241_v2 = vld [vmem:[#allocation2 + $0x3] ss:$8 sm:$0xf] }
 0x80f   : > { %v7396_v59 = vrot.slane %v3173_v42, %v8607_v1  ;;  %v7399_v24 = vrot.slane %v3173_v42, %v8609_v18  ;;  %v7408_v45 = vrot.slane %v3173_v42, %v8606_v46  ;;  %v7420_v3 = vrot.slane %v3173_v42, %v8608_v16 }
 0x810   : > { %v3280_v11 = vmul.f32 %v7178_v40, %v7374_v37  ;;  %v3279_v57 = vmul.f32 %v7178_v40, %v7377_v62  ;;  %v3282_v21 = vmul.f32 %v7178_v40, %v7384_v7  ;;  %v3281_v25 = vmul.f32 %v7178_v40, %v7387_v5 }
 0x811   : > { %v3310_v43 = vmul.f32 %v7180_v17, %v7396_v59  ;;  %v3312_v55 = vmul.f32 %v7180_v17, %v7399_v24  ;;  %v7411_v40 = vrot.slane %v3207_v63, %v8609_v18  ;;  %v3311_v33 = vmul.f32 %v7180_v17, %v7408_v45 }
 0x812   : > { %3289 = vrot.lane.b32.xlu1 %v3280_v11, %s4541_s11  ;;  %3287 = vrot.lane.b32.xlu0 %v3279_v57, %s4541_s11  ;;  %v7423_v15 = vrot.slane %v3241_v2, %v8609_v18  ;;  %v7428_v60 = vrot.slane %v3207_v63, %v8607_v1  ;;  %v7431_v51 = vrot.slane %v3207_v63, %v8606_v46 }
 0x813   : > { %v3343_v47 = vmul.f32 %v7263_v14, %v7411_v40  ;;  %v3313_v6 = vmul.f32 %v7180_v17, %v7420_v3  ;;  %v3405_v57 = vmul.f32 %v7267_v38, %v7387_v5  ;;  %v3436_v42 = vmul.f32 %v7269_v26, %v7399_v24 }
 0x814   : > { %v3374_v11 = vmul.f32 %v7265_v23, %v7423_v15  ;;  %v7448_v17 = vrot.slane %v3207_v63, %v8608_v16  ;;  %v3233_v63 = vmul.f32 %v7428_v60, %v7176_v0  ;;  %v3202_v22 = vmul.f32 %v7420_v3, %v7168_v20 }
 0x815   : > { %v3166_v19 = vmul.f32 %v7374_v37, %v7164_v56  ;;  %v3167_v39 = vmul.f32 %v7387_v5, %v7164_v56  ;;  %v3234_v30 = vmul.f32 %v7431_v51, %v7176_v0 }
 0x816   : > { %3293 = vrot.lane.b32.xlu1 %v3282_v21, %s4541_s11  ;;  %3291 = vrot.lane.b32.xlu0 %v3281_v25, %s4541_s11  ;;  %v3341_v21 = vmul.f32 %v7263_v14, %v7428_v60  ;;  %v3342_v25 = vmul.f32 %v7263_v14, %v7431_v51  ;;  %v3236_v31 = vmul.f32 %v7448_v17, %v7176_v0 }
 0x817   : > { %v3170_v29 = vadd.f32 %v3166_v19, %v7172_v58  ;;  %v3235_v19 = vmul.f32 %v7411_v40, %v7176_v0 }
 0x81a   : > { %3318 = vrot.lane.b32.xlu1 %v3310_v43, %s4541_s11  ;;  %3322 = vrot.lane.b32.xlu0 %v3312_v55, %s4541_s11  ;;  %v7451_v43 = vrot.slane %v3241_v2, %v8607_v1  ;;  %v7454_v55 = vrot.slane %v3241_v2, %v8606_v46 }
 0x81c   : > { %v3267_v4 = vmul.f32 %v7451_v43, %v7174_v27 }
 0x81e   : > { %3320 = vrot.lane.b32.xlu1 %v3311_v33, %s4541_s11  ;;  %3353 = vrot.lane.b32.xlu0 %v3343_v47, %s4541_s11  ;;  %v7457_v33 = vrot.slane %v3241_v2, %v8608_v16  ;;  %v3165_v47 = vmul.f32 %v7377_v62, %v7164_v56 }
 0x820   : > { %v3169_v16 = vadd.f32 %v3165_v47, %v7172_v58  ;;  %v3171_v47 = vadd.f32 %v3167_v39, %v7172_v58  ;;  %v3467_v39 = vmul.f32 %v7271_v12, %v7411_v40 }
 0x822   : > { %3324 = vrot.lane.b32.xlu1 %v3313_v6, %s4541_s11  ;;  %3384 = vrot.lane.b32.xlu0 %v3374_v11, %s4541_s11  ;;  %v3168_v6 = vmul.f32 %v7384_v7, %v7164_v56  ;;  %v3199_v11 = vmul.f32 %v7396_v59, %v7168_v20  ;;  %v3270_v56 = vmul.f32 %v7457_v33, %v7174_v27 }
 0x824   : > { %v3172_v2 = vadd.f32 %v3168_v6, %v7172_v58  ;;  %v3203_v13 = vadd.f32 %v3199_v11, %v3169_v16  ;;  %v3201_v6 = vmul.f32 %v7399_v24, %v7168_v20  ;;  %v3268_v16 = vmul.f32 %v7454_v55, %v7174_v27 }
 0x826   : > { %3349 = vrot.lane.b32.xlu1 %v3341_v21, %s4541_s11  ;;  %3415 = vrot.lane.b32.xlu0 %v3405_v57, %s4504_s22  ;;  %v3200_v21 = vmul.f32 %v7408_v45, %v7168_v20  ;;  %v3206_v57 = vadd.f32 %v3202_v22, %v3172_v2  ;;  %v3237_v22 = vadd.f32 %v3233_v63, %v3203_v13 }
 0x827   : > { %v3205_v58 = vadd.f32 %v3201_v6, %v3171_v47  ;;  %v3344_v20 = vmul.f32 %v7263_v14, %v7448_v17  ;;  %v3269_v13 = vmul.f32 %v7423_v15, %v7174_v27  ;;  %v3373_v27 = vmul.f32 %v7265_v23, %v7454_v55 }
 0x828   : > { %v3204_v49 = vadd.f32 %v3200_v21, %v3170_v29  ;;  %v3240_v11 = vadd.f32 %v3236_v31, %v3206_v57  ;;  %v7501_v2 = vadd.f32 %v3267_v4, %v3237_v22  ;;  %v3498_v4 = vmul.f32 %v7273_v34, %v7423_v15  ;;  %v7553_v22 = vld [vmem:[#allocation2 + $0x8] ss:$8 sm:$0x7] }
 0x829   : > { %v3559_v63 = vmul.f32 %v7321_v52, %v7408_v45  ;;  %v3403_v21 = vmul.f32 %v7267_v38, %v7377_v62  ;;  %v3590_v57 = vmul.f32 %v7278_v28, %v7431_v51  ;;  %v3406_v47 = vmul.f32 %v7267_v38, %v7384_v7 }
 0x82a   : > { %3351 = vrot.lane.b32.xlu1 %v3342_v25, %s4541_s11  ;;  %3446 = vrot.lane.b32.xlu0 %v3436_v42, %s4504_s22  ;;  %v3238_v29 = vadd.f32 %v3234_v30, %v3204_v49  ;;  %v7503_v0 = vadd.f32 %v3270_v56, %v3240_v11  ;;  %v3239_v25 = vadd.f32 %v3235_v19, %v3205_v58 }
 0x82b   : > { %v3372_v49 = vmul.f32 %v7265_v23, %v7451_v43  ;;  %v3529_v30 = vmul.f32 %v7275_v9, %v7387_v5  ;;  %v3375_v42 = vmul.f32 %v7265_v23, %v7457_v33  ;;  %v3561_v5 = vmul.f32 %v7321_v52, %v7420_v3 }
 0x82c   : > { %v7507_v31 = vadd.f32 %v3268_v16, %v3238_v29  ;;  %v7511_v14 = vadd.f32 %v3269_v13, %v3239_v25  ;;  %v3404_v23 = vmul.f32 %v7267_v38, %v7374_v37  ;;  %v3592_v6 = vmul.f32 %v7278_v28, %v7448_v17 }
 0x82d   : > { %v3434_v56 = vmul.f32 %v7269_v26, %v7396_v59  ;;  %v3621_v19 = vmul.f32 %v7323_v50, %v7454_v55  ;;  %v3435_v38 = vmul.f32 %v7269_v26, %v7408_v45  ;;  %v3623_v11 = vmul.f32 %v7323_v50, %v7457_v33 }
 0x82e   : > { %3355 = vrot.lane.b32.xlu1 %v3344_v20, %s4541_s11  ;;  %3477 = vrot.lane.b32.xlu0 %v3467_v39, %s4504_s22  ;;  %v7563_v58 = vrot.slane %v7553_v22, %v8606_v46  ;;  %v7565_v20 = vld [vmem:[#allocation2 + $0x9] ss:$8 sm:$0x7]  ;;  %v3437_v39 = vmul.f32 %v7269_v26, %v7420_v3  ;;  %v3465_v16 = vmul.f32 %v7271_v12, %v7428_v60  ;;  %v7587_v3 = vld [vmem:[#allocation2 + $0xa] ss:$8 sm:$0x7] }
 0x82f   : > { %v7575_v45 = vrot.slane %v7565_v20, %v8607_v1  ;;  %v7585_v26 = vrot.slane %v7565_v20, %v8609_v18  ;;  %v3466_v13 = vmul.f32 %v7271_v12, %v7431_v51 }
 0x830   : > { %v3669_v29 = vmul.f32 %v7563_v58, %v7280_v36 }
 0x831   : > { %v3711_v25 = vmul.f32 %v7575_v45, %v7283_v53 }
 0x832   : > { %3380 = vrot.lane.b32.xlu1 %v3372_v49, %s4541_s11  ;;  %3508 = vrot.lane.b32.xlu0 %v3498_v4, %s4504_s22  ;;  %v3713_v49 = vmul.f32 %v7585_v26, %v7283_v53  ;;  %v7597_v4 = vrot.slane %v7587_v3, %v8606_v46 }
 0x836   : > { %3382 = vrot.lane.b32.xlu1 %v3373_v27, %s4541_s11  ;;  %3539 = vrot.lane.b32.xlu0 %v3529_v30, %s4542_s17  ;;  %v7599_v27 = vld [vmem:[#allocation2 + $0xb] ss:$8 sm:$0x7]  ;;  %v3468_v30 = vmul.f32 %v7271_v12, %v7448_v17  ;;  %v3497_v17 = vmul.f32 %v7273_v34, %v7454_v55  ;;  %v3527_v55 = vmul.f32 %v7275_v9, %v7377_v62 }
 0x837   : > { %v7609_v51 = vrot.slane %v7599_v27, %v8607_v1  ;;  %v7619_v12 = vrot.slane %v7599_v27, %v8609_v18  ;;  %v3530_v62 = vmul.f32 %v7275_v9, %v7384_v7 }
 0x839   : > { %v3903_v7 = vmul.f32 %v7291_v32, %v7619_v12 }
 0x83a   : > { %3386 = vrot.lane.b32.xlu1 %v3375_v42, %s4541_s11  ;;  %3568 = vrot.lane.b32.xlu0 %v3559_v63, %s4542_s17  ;;  %v3755_v42 = vmul.f32 %v7597_v4, %v7325_v8  ;;  %v3496_v63 = vmul.f32 %v7273_v34, %v7451_v43 }
 0x83e   : > { %3411 = vrot.lane.b32.xlu1 %v3403_v21, %s4504_s22  ;;  %3572 = vrot.lane.b32.xlu0 %v3561_v5, %s4542_s17  ;;  %v3797_v21 = vmul.f32 %v7609_v51, %v7285_v54  ;;  %v3799_v5 = vmul.f32 %v7619_v12, %v7285_v54 }
 0x842   : > { %3413 = vrot.lane.b32.xlu1 %v3404_v23, %s4504_s22  ;;  %3599 = vrot.lane.b32.xlu0 %v3590_v57, %s4542_s17  ;;  %v3499_v23 = vmul.f32 %v7273_v34, %v7457_v33  ;;  %v3824_v57 = vmul.f32 %v7287_v10, %v7563_v58  ;;  %v3528_v34 = vmul.f32 %v7275_v9, %v7374_v37 }
 0x843   : > { %v3851_v33 = vmul.f32 %v7327_v48, %v7585_v26  ;;  %v3558_v37 = vmul.f32 %v7321_v52, %v7396_v59  ;;  %v3560_v9 = vmul.f32 %v7321_v52, %v7399_v24  ;;  %v3589_v59 = vmul.f32 %v7278_v28, %v7428_v60 }
 0x844   : > { %v3591_v52 = vmul.f32 %v7278_v28, %v7411_v40  ;;  %v3953_v24 = vmul.f32 %v7293_v61, %v7575_v45  ;;  %v3955_v28 = vmul.f32 %v7293_v61, %v7585_v26 }
 0x846   : > { %3417 = vrot.lane.b32.xlu1 %v3406_v47, %s4504_s22  ;;  %3603 = vrot.lane.b32.xlu0 %v3592_v6, %s4542_s17  ;;  %v3849_v47 = vmul.f32 %v7327_v48, %v7575_v45  ;;  %v3876_v6 = vmul.f32 %v7289_v44, %v7597_v4 }
 0x84a   : > { %3442 = vrot.lane.b32.xlu1 %v3434_v56, %s4504_s22  ;;  %3630 = vrot.lane.b32.xlu0 %v3621_v19, %s4542_s17  ;;  %v3901_v56 = vmul.f32 %v7291_v32, %v7609_v51  ;;  %v3928_v19 = vmul.f32 %v7329_v41, %v7563_v58 }
 0x84e   : > { %3444 = vrot.lane.b32.xlu1 %v3435_v38, %s4504_s22  ;;  %3634 = vrot.lane.b32.xlu0 %v3623_v11, %s4542_s17 }
 0x852   : > { %3448 = vrot.lane.b32.xlu1 %v3437_v39, %s4504_s22  ;;  %3676 = vrot.lane.b32.xlu0 %v3669_v29, %s4524_s9 }
 0x856   : > { %3473 = vrot.lane.b32.xlu1 %v3465_v16, %s4504_s22  ;;  %3717 = vrot.lane.b32.xlu0 %v3711_v25, %s4524_s9  ;;  %v3620_v25 = vmul.f32 %v7323_v50, %v7451_v43  ;;  %v3622_v43 = vmul.f32 %v7323_v50, %v7423_v15  ;;  %v7714_v15 = vrot.slane %v7553_v22, %v8609_v18 }
 0x85a   : > { %3475 = vrot.lane.b32.xlu1 %v3466_v13, %s4504_s22  ;;  %3721 = vrot.lane.b32.xlu0 %v3713_v49, %s4524_s9 }
 0x85e   : > { %3479 = vrot.lane.b32.xlu1 %v3468_v30, %s4504_s22  ;;  %3762 = vrot.lane.b32.xlu0 %v3755_v42, %s4524_s9 }
 0x862   : > { %3504 = vrot.lane.b32.xlu1 %v3496_v63, %s4504_s22  ;;  %3803 = vrot.lane.b32.xlu0 %v3797_v21, %s4524_s9  ;;  %v3980_v63 = vmul.f32 %v7295_v35, %v7597_v4  ;;  %v7702_v21 = vrot.slane %v7553_v22, %v8607_v1  ;;  %v7728_v22 = vrot.slane %v7565_v20, %v8606_v46 }
 0x863   : > { %v7744_v20 = vrot.slane %v7587_v3, %v8607_v1 }
 0x866   : > { %3506 = vrot.lane.b32.xlu1 %v3497_v17, %s4504_s22  ;;  %3807 = vrot.lane.b32.xlu0 %v3799_v5, %s4524_s9  ;;  %v3668_v17 = vmul.f32 %v7702_v21, %v7280_v36  ;;  %v8610_v5 = vld [vmem:[#allocation77_spill] sm:$0xff] }
 0x867   : > { %v4005_v50 = vmul.f32 %v8610_v5, %v7609_v51 }
 0x86a   : > { %3510 = vrot.lane.b32.xlu1 %v3499_v23, %s4504_s22  ;;  %3831 = vrot.lane.b32.xlu0 %v3824_v57, %s4543_s18 }
 0x86e   : > { %3535 = vrot.lane.b32.xlu1 %v3527_v55, %s4542_s17  ;;  %3855 = vrot.lane.b32.xlu0 %v3849_v47, %s4543_s18 }
 0x872   : > { %3537 = vrot.lane.b32.xlu1 %v3528_v34, %s4542_s17  ;;  %3859 = vrot.lane.b32.xlu0 %v3851_v33, %s4543_s18  ;;  %v3670_v34 = vmul.f32 %v7714_v15, %v7280_v36  ;;  %v4007_v33 = vmul.f32 %v8610_v5, %v7619_v12  ;;  %v3712_v36 = vmul.f32 %v7728_v22, %v7283_v53 }
 0x876   : > { %3541 = vrot.lane.b32.xlu1 %v3530_v62, %s4542_s17  ;;  %3883 = vrot.lane.b32.xlu0 %v3876_v6, %s4543_s18 }
 0x87a   : > { %3566 = vrot.lane.b32.xlu1 %v3558_v37, %s4542_s17  ;;  %3907 = vrot.lane.b32.xlu0 %v3901_v56, %s4543_s18 }
 0x87e   : > { %3570 = vrot.lane.b32.xlu1 %v3560_v9, %s4542_s17  ;;  %3911 = vrot.lane.b32.xlu0 %v3903_v7, %s4543_s18  ;;  %v8611_v9 = vld [vmem:[#allocation76_spill] sm:$0xff] }
 0x87f   : > { %v4032_v7 = vmul.f32 %v8611_v9, %v7563_v58 }
 0x882   : > { %3597 = vrot.lane.b32.xlu1 %v3589_v59, %s4542_s17  ;;  %3935 = vrot.lane.b32.xlu0 %v3928_v19, %s4501_s16 }
 0x884   : > { %v3290_v38 = vpop.permute.xlu1 %3289  ;;  %v3288_v11 = vpop.permute.xlu0 %3287 }
 0x885   : > { %v3295_v39 = vsel %vm779_vm6, %v3288_v11, %v3290_v38  ;;  %v8612_v11 = vld [vmem:[#allocation70_spill] sm:$0xff] }
 0x886   : > { %v7677_v29 = vadd.f32 %v3295_v39, %v7501_v2  ;;  %3601 = vrot.lane.b32.xlu1 %v3591_v52, %s4542_s17  ;;  %3959 = vrot.lane.b32.xlu0 %v3953_v24, %s4501_s16  ;;  %v4057_v53 = vmul.f32 %v8612_v11, %v7575_v45  ;;  %v7756_v52 = vrot.slane %v7587_v3, %v8609_v18 }
 0x887   : > { %v7771_v18 = vrot.slane %v7599_v27, %v8606_v46 }
 0x888   : > { %v7681_v60 = vpop.permute.xlu1 %3293  ;;  %v3292_v16 = vpop.permute.xlu0 %3291 }
 0x889   : > { %v3296_v40 = vsel %vm779_vm6, %v3290_v38, %v3292_v16  ;;  %v3297_v13 = vsel %vm779_vm6, %v3292_v16, %v7681_v60  ;;  %v3754_v38 = vmul.f32 %v7744_v20, %v7325_v8 }
 0x88a   : > { %v3303_v2 = vadd.f32 %v3296_v40, %v7507_v31  ;;  %v3304_v49 = vadd.f32 %v3297_v13, %v7511_v14  ;;  %3628 = vrot.lane.b32.xlu1 %v3620_v25, %s4542_s17  ;;  %3963 = vrot.lane.b32.xlu0 %v3955_v28, %s4501_s16  ;;  %v3756_v25 = vmul.f32 %v7756_v52, %v7325_v8 }
 0x88b   : > { %v4059_v28 = vmul.f32 %v8612_v11, %v7585_v26  ;;  %v3798_v8 = vmul.f32 %v7771_v18, %v7285_v54 }
 0x88c   : > { %v7694_v30 = vpop.permute.xlu1 %3318  ;;  %v3323_v42 = vpop.permute.xlu0 %3322 }
 0x88e   : > { %3632 = vrot.lane.b32.xlu1 %v3622_v43, %s4542_s17  ;;  %3987 = vrot.lane.b32.xlu0 %v3980_v63, %s4501_s16  ;;  %v3823_v43 = vmul.f32 %v7287_v10, %v7702_v21  ;;  %v8614_v63 = vld [vmem:[#allocation74_spill] sm:$0xff] }
 0x890   : > { %v7706_v31 = vpop.permute.xlu1 %3320  ;;  %v3354_v14 = vpop.permute.xlu0 %3353 }
 0x891   : > { %v3327_v23 = vsel %vm779_vm6, %v7706_v31, %v3323_v42 }
 0x892   : > { %v3334_v57 = vadd.f32 %v3327_v23, %v3303_v2  ;;  %3674 = vrot.lane.b32.xlu1 %v3668_v17, %s4524_s9  ;;  %4011 = vrot.lane.b32.xlu0 %v4005_v50, %s4501_s16 }
 0x894   : > { %v7720_v55 = vpop.permute.xlu1 %3324  ;;  %v3385_v47 = vpop.permute.xlu0 %3384 }
 0x895   : > { %v3328_v62 = vsel %vm779_vm6, %v3323_v42, %v7720_v55 }
 0x896   : > { %v3335_v6 = vadd.f32 %v3328_v62, %v3304_v49  ;;  %3678 = vrot.lane.b32.xlu1 %v3670_v34, %s4524_s9  ;;  %4015 = vrot.lane.b32.xlu0 %v4007_v33, %s4501_s16  ;;  %v8613_v49 = vld [vmem:[#allocation79_spill] sm:$0xff]  ;;  %v4111_v34 = vmul.f32 %v8614_v63, %v7619_v12 }
 0x897   : > { %v4084_v42 = vmul.f32 %v8613_v49, %v7597_v4 }
 0x898   : > { %v7734_v37 = vpop.permute.xlu1 %3349  ;;  %v7736_v56 = vpop.permute.xlu0 %3415 }
 0x89a   : > { %3719 = vrot.lane.b32.xlu1 %v3712_v36, %s4524_s9  ;;  %4039 = vrot.lane.b32.xlu0 %v4032_v7, %s4544_s19  ;;  %v3850_v7 = vmul.f32 %v7327_v48, %v7728_v22 }
 0x89c   : > { %v3352_v59 = vpop.permute.xlu1 %3351  ;;  %v7748_v19 = vpop.permute.xlu0 %3446 }
 0x89d   : > { %v3358_v1 = vsel %vm779_vm6, %v3352_v59, %v3354_v14 }
 0x89e   : > { %v3365_v24 = vadd.f32 %v3358_v1, %v3334_v57  ;;  %3760 = vrot.lane.b32.xlu1 %v3754_v38, %s4524_s9  ;;  %4063 = vrot.lane.b32.xlu0 %v4057_v53, %s4544_s19  ;;  %v3825_v57 = vmul.f32 %v7287_v10, %v7714_v15  ;;  %v8615_v38 = vld [vmem:[#allocation78_spill] sm:$0xff]  ;;  %v3875_v1 = vmul.f32 %v7289_v44, %v7744_v20 }
 0x89f   : > { %v4136_v53 = vmul.f32 %v8615_v38, %v7563_v58  ;;  %v3326_v58 = vsel %vm779_vm6, %v7694_v30, %v7706_v31  ;;  %v3305_v30 = vadd.f32 %v7681_v60, %v7503_v0 }
 0x8a0   : > { %v7761_v39 = vpop.permute.xlu1 %3355  ;;  %v7763_v16 = vpop.permute.xlu0 %3477 }
 0x8a1   : > { %v3359_v3 = vsel %vm779_vm6, %v3354_v14, %v7761_v39  ;;  %v4109_v14 = vmul.f32 %v8614_v63, %v7609_v51 }
 0x8a2   : > { %v3366_v40 = vadd.f32 %v3359_v3, %v3335_v6  ;;  %3764 = vrot.lane.b32.xlu1 %v3756_v25, %s4524_s9  ;;  %4067 = vrot.lane.b32.xlu0 %v4059_v28, %s4544_s19 }
 0x8a4   : > { %v3381_v13 = vpop.permute.xlu1 %3380  ;;  %v7777_v2 = vpop.permute.xlu0 %3508 }
 0x8a6   : > { %3805 = vrot.lane.b32.xlu1 %v3798_v8, %s4524_s9  ;;  %4091 = vrot.lane.b32.xlu0 %v4084_v42, %s4544_s19  ;;  %v3877_v8 = vmul.f32 %v7289_v44, %v7756_v52  ;;  %v3357_v42 = vsel %vm779_vm6, %v7734_v37, %v3352_v59  ;;  %v3902_v37 = vmul.f32 %v7291_v32, %v7771_v18  ;;  %v8617_v59 = vld [vmem:[#allocation27_spill] sm:$0xff]  ;;  %s305_s9 = scalar_lea.vmem %s8116_s8, %s4322_s12 }
 0x8a7   : > { %v3927_v32 = vmul.f32 %v7329_v41, %v7702_v21 }
 0x8a8   : > { %v3383_v46 = vpop.permute.xlu1 %3382  ;;  %v7785_v27 = vpop.permute.xlu0 %3539 }
 0x8a9   : > { %v3389_v17 = vsel %vm779_vm6, %v3383_v46, %v3385_v47  ;;  %v3388_v44 = vsel %vm779_vm6, %v3381_v13, %v3383_v46 }
 0x8aa   : > { %v3396_v50 = vadd.f32 %v3389_v17, %v3365_v24  ;;  %3829 = vrot.lane.b32.xlu1 %v3823_v43, %s4543_s18  ;;  %4115 = vrot.lane.b32.xlu0 %v4109_v14, %s4544_s19  ;;  %v8616_v24 = vld [vmem:[#allocation45_spill] sm:$0xff]  ;;  %v3333_v14 = vadd.f32 %v3326_v58, %v7677_v29  ;;  %v3336_v29 = vadd.f32 %v7720_v55, %v3305_v30 }
 0x8ab   : > { %v4161_v25 = vmul.f32 %v8616_v24, %v7575_v45  ;;  %v4163_v45 = vmul.f32 %v8616_v24, %v7585_v26  ;;  %v3954_v58 = vmul.f32 %v7293_v61, %v7728_v22 }
 0x8ac   : > { %v3387_v54 = vpop.permute.xlu1 %3386  ;;  %v7794_v23 = vpop.permute.xlu0 %3568  ;;  %v3364_v31 = vadd.f32 %v3357_v42, %v3333_v14  ;;  %v3367_v0 = vadd.f32 %v7761_v39, %v3336_v29  ;;  %v3981_v14 = vmul.f32 %v7295_v35, %v7756_v52  ;;  %v4031_v29 = vmul.f32 %v8611_v9, %v7702_v21 }
 0x8ad   : > { %v3390_v33 = vsel %vm779_vm6, %v3385_v47, %v3387_v54 }
 0x8ae   : > { %v3397_v62 = vadd.f32 %v3390_v33, %v3366_v40  ;;  %3833 = vrot.lane.b32.xlu1 %v3825_v57, %s4543_s18  ;;  %4119 = vrot.lane.b32.xlu0 %v4111_v34, %s4544_s19  ;;  %v3395_v57 = vadd.f32 %v3388_v44, %v3364_v31  ;;  %v3398_v55 = vadd.f32 %v3387_v54, %v3367_v0 }
 0x8b0   : > { %v3412_v6 = vpop.permute.xlu1 %3411  ;;  %v7803_v36 = vpop.permute.xlu0 %3572 }
 0x8b2   : > { %3857 = vrot.lane.b32.xlu1 %v3850_v7, %s4543_s18  ;;  %4143 = vrot.lane.b32.xlu0 %v4136_v53, %s4545_s20 }
 0x8b4   : > { %v3414_v10 = vpop.permute.xlu1 %3413  ;;  %v7811_v47 = vpop.permute.xlu0 %3599 }
 0x8b5   : > { %v3420_v28 = vsel %vm531_vm4, %v3414_v10, %v7736_v56 }
 0x8b6   : > { %v3427_v48 = vadd.f32 %v3420_v28, %v3396_v50  ;;  %3881 = vrot.lane.b32.xlu1 %v3875_v1, %s4543_s18  ;;  %4167 = vrot.lane.b32.xlu0 %v4161_v25, %s4545_s20  ;;  %v3419_v50 = vsel %vm531_vm4, %v3412_v6, %v3414_v10  ;;  %v3929_v1 = vmul.f32 %v7329_v41, %v7714_v15 }
 0x8b7   : > { %v3426_v60 = vadd.f32 %v3419_v50, %v3395_v57 }
 0x8b8   : > { %v3418_v3 = vpop.permute.xlu1 %3417  ;;  %v7824_v40 = vpop.permute.xlu0 %3603 }
 0x8b9   : > { %v3421_v43 = vsel %vm531_vm4, %v7736_v56, %v3418_v3  ;;  %v4188_v56 = vmul.f32 %v8617_v59, %v7597_v4  ;;  %v8618_v4 = vld [vmem:[#allocation25_spill] sm:$0xff]  ;;  %v3429_v39 = vadd.f32 %v3418_v3, %v3398_v55 }
 0x8ba   : > { %v3428_v17 = vadd.f32 %v3421_v43, %v3397_v62  ;;  %3885 = vrot.lane.b32.xlu1 %v3877_v8, %s4543_s18  ;;  %4171 = vrot.lane.b32.xlu0 %v4163_v45, %s4545_s20  ;;  %v4213_v46 = vmul.f32 %v8618_v4, %v7609_v51  ;;  %v4215_v51 = vmul.f32 %v8618_v4, %v7619_v12 }
 0x8bb   : > { %v3979_v12 = vmul.f32 %v7295_v35, %v7744_v20 }
 0x8bc   : > { %v3443_v26 = vpop.permute.xlu1 %3442  ;;  %v7846_v34 = vpop.permute.xlu0 %3630 }
 0x8be   : > { %3909 = vrot.lane.b32.xlu1 %v3902_v37, %s4543_s18  ;;  %4195 = vrot.lane.b32.xlu0 %v4188_v56, %s4545_s20 }
 0x8c0   : > { %v3445_v13 = vpop.permute.xlu1 %3444  ;;  %v7860_v53 = vpop.permute.xlu0 %3634 }
 0x8c1   : > { %v3450_v33 = vsel %vm531_vm4, %v3443_v26, %v3445_v13  ;;  %v3451_v62 = vsel %vm531_vm4, %v3445_v13, %v7748_v19  ;;  %v4006_v26 = vmul.f32 %v8610_v5, %v7771_v18 }
 0x8c2   : > { %v3457_v6 = vadd.f32 %v3450_v33, %v3426_v60  ;;  %v3458_v7 = vadd.f32 %v3451_v62, %v3427_v48  ;;  %3933 = vrot.lane.b32.xlu1 %v3927_v32, %s4501_s16  ;;  %4219 = vrot.lane.b32.xlu0 %v4213_v46, %s4545_s20  ;;  %v4033_v60 = vmul.f32 %v8611_v9, %v7714_v15 }
 0x8c3   : > { %v4058_v33 = vmul.f32 %v8612_v11, %v7728_v22 }
 0x8c4   : > { %v3449_v10 = vpop.permute.xlu1 %3448  ;;  %v7872_v3 = vpop.permute.xlu0 %3676 }
 0x8c5   : > { %v3452_v54 = vsel %vm531_vm4, %v7748_v19, %v3449_v10  ;;  %v3460_v25 = vadd.f32 %v3449_v10, %v3429_v39 }
 0x8c6   : > { %v3459_v28 = vadd.f32 %v3452_v54, %v3428_v17  ;;  %3937 = vrot.lane.b32.xlu1 %v3929_v1, %s4501_s16  ;;  %4223 = vrot.lane.b32.xlu0 %v4215_v51, %s4545_s20  ;;  %v4085_v51 = vmul.f32 %v8613_v49, %v7756_v52 }
 0x8c8   : > { %v3474_v48 = vpop.permute.xlu1 %3473  ;;  %v7881_v43 = vpop.permute.xlu0 %3717 }
 0x8ca   : > { %3961 = vrot.lane.b32.xlu1 %v3954_v58, %s4501_s16 }
 0x8cc   : > { %v3476_v41 = vpop.permute.xlu1 %3475  ;;  %v7890_v37 = vpop.permute.xlu0 %3721 }
 0x8cd   : > { %v3481_v19 = vsel %vm531_vm4, %v3474_v48, %v3476_v41  ;;  %v3482_v8 = vsel %vm531_vm4, %v3476_v41, %v7763_v16  ;;  %v4110_v41 = vmul.f32 %v8614_v63, %v7771_v18 }
 0x8ce   : > { %v3488_v45 = vadd.f32 %v3481_v19, %v3457_v6  ;;  %v3489_v42 = vadd.f32 %v3482_v8, %v3458_v7  ;;  %3985 = vrot.lane.b32.xlu1 %v3979_v12, %s4501_s16  ;;  %v4083_v7 = vmul.f32 %v8613_v49, %v7744_v20 }
 0x8d0   : > { %v3480_v61 = vpop.permute.xlu1 %3479  ;;  %v7899_v0 = vpop.permute.xlu0 %3762 }
 0x8d1   : > { %v3483_v17 = vsel %vm531_vm4, %v7763_v16, %v3480_v61  ;;  %v3491_v30 = vadd.f32 %v3480_v61, %v3460_v25 }
 0x8d2   : > { %v3490_v44 = vadd.f32 %v3483_v17, %v3459_v28  ;;  %3989 = vrot.lane.b32.xlu1 %v3981_v14, %s4501_s16 }
 0x8d4   : > { %v3505_v31 = vpop.permute.xlu1 %3504  ;;  %v7908_v62 = vpop.permute.xlu0 %3803 }
 0x8d6   : > { %4013 = vrot.lane.b32.xlu1 %v4006_v26, %s4501_s16 }
 0x8d8   : > { %v3507_v56 = vpop.permute.xlu1 %3506  ;;  %v7917_v1 = vpop.permute.xlu0 %3807 }
 0x8d9   : > { %v3512_v35 = vsel %vm531_vm4, %v3505_v31, %v3507_v56  ;;  %v3513_v16 = vsel %vm531_vm4, %v3507_v56, %v7777_v2  ;;  %v4137_v31 = vmul.f32 %v8615_v38, %v7714_v15 }
 0x8da   : > { %v3519_v50 = vadd.f32 %v3512_v35, %v3488_v45  ;;  %v3520_v57 = vadd.f32 %v3513_v16, %v3489_v42  ;;  %4037 = vrot.lane.b32.xlu1 %v4031_v29, %s4544_s19  ;;  %v4135_v42 = vmul.f32 %v8615_v38, %v7702_v21 }
 0x8dc   : > { %v3511_v5 = vpop.permute.xlu1 %3510  ;;  %v7930_v8 = vpop.permute.xlu0 %3831 }
 0x8dd   : > { %v3514_v13 = vsel %vm531_vm4, %v7777_v2, %v3511_v5  ;;  %v3522_v32 = vadd.f32 %v3511_v5, %v3491_v30 }
 0x8de   : > { %v3521_v46 = vadd.f32 %v3514_v13, %v3490_v44  ;;  %4041 = vrot.lane.b32.xlu1 %v4033_v60, %s4544_s19 }
 0x8e0   : > { %v3536_v55 = vpop.permute.xlu1 %3535  ;;  %v7941_v30 = vpop.permute.xlu0 %3855 }
 0x8e2   : > { %4065 = vrot.lane.b32.xlu1 %v4058_v33, %s4544_s19 }
 0x8e4   : > { %v3538_v6 = vpop.permute.xlu1 %3537  ;;  %v7954_v35 = vpop.permute.xlu0 %3859 }
 0x8e5   : > { %v3543_v9 = vsel %vm1028_vm7, %v3536_v55, %v3538_v6  ;;  %v3544_v2 = vsel %vm1028_vm7, %v3538_v6, %v7785_v27 }
 0x8e6   : > { %v3550_v39 = vadd.f32 %v3543_v9, %v3519_v50  ;;  %v3551_v10 = vadd.f32 %v3544_v2, %v3520_v57  ;;  %4089 = vrot.lane.b32.xlu1 %v4083_v7, %s4544_s19  ;;  %v4187_v50 = vmul.f32 %v8617_v59, %v7744_v20 }
 0x8e8   : > { %v3542_v11 = vpop.permute.xlu1 %3541 }
 0x8e9   : > { %v3545_v54 = vsel %vm1028_vm7, %v7785_v27, %v3542_v11  ;;  %v3553_v25 = vadd.f32 %v3542_v11, %v3522_v32 }
 0x8ea   : > { %v3552_v28 = vadd.f32 %v3545_v54, %v3521_v46  ;;  %4093 = vrot.lane.b32.xlu1 %v4085_v51, %s4544_s19  ;;  %v4214_v46 = vmul.f32 %v8618_v4, %v7771_v18 }
 0x8eb   : > { %v3584_v48 = vadd.f32 %v7803_v36, %v3553_v25 }
 0x8ec   : > { %v3567_v58 = vpop.permute.xlu1 %3566 }
 0x8ed   : > { %v3574_v12 = vsel %vm1028_vm7, %v3567_v58, %v7794_v23  ;;  %v3615_v19 = vadd.f32 %v7824_v40, %v3584_v48 }
 0x8ee   : > { %v3581_v49 = vadd.f32 %v3574_v12, %v3550_v39  ;;  %4117 = vrot.lane.b32.xlu1 %v4110_v41, %s4544_s19 }
 0x8ef   : > { %v3646_v27 = vadd.f32 %v7860_v53, %v3615_v19 }
 0x8f0   : > { %v3571_v45 = vpop.permute.xlu1 %3570 }
 0x8f1   : > { %v3575_v61 = vsel %vm1028_vm7, %v7794_v23, %v3571_v45  ;;  %v3576_v63 = vsel %vm1028_vm7, %v3571_v45, %v7803_v36  ;;  %v4162_v36 = vmul.f32 %v8616_v24, %v7728_v22 }
 0x8f2   : > { %v3582_v14 = vadd.f32 %v3575_v61, %v3551_v10  ;;  %v3583_v17 = vadd.f32 %v3576_v63, %v3552_v28  ;;  %4141 = vrot.lane.b32.xlu1 %v4135_v42, %s4545_s20 }
 0x8f4   : > { %v3598_v44 = vpop.permute.xlu1 %3597 }
 0x8f5   : > { %v3605_v26 = vsel %vm1028_vm7, %v3598_v44, %v7811_v47 }
 0x8f6   : > { %v3612_v21 = vadd.f32 %v3605_v26, %v3581_v49  ;;  %4145 = vrot.lane.b32.xlu1 %v4137_v31, %s4545_s20 }
 0x8f8   : > { %v3602_v23 = vpop.permute.xlu1 %3601 }
 0x8f9   : > { %v3606_v56 = vsel %vm1028_vm7, %v7811_v47, %v3602_v23  ;;  %v3607_v29 = vsel %vm1028_vm7, %v3602_v23, %v7824_v40  ;;  %v7962_v47 = vpop.permute.xlu0 %3883  ;;  %v4189_v40 = vmul.f32 %v8617_v59, %v7756_v52 }
 0x8fa   : > { %v3613_v16 = vadd.f32 %v3606_v56, %v3582_v14  ;;  %v3614_v15 = vadd.f32 %v3607_v29, %v3583_v17  ;;  %4169 = vrot.lane.b32.xlu1 %v4162_v36, %s4545_s20 }
 0x8fc   : > { %v3629_v38 = vpop.permute.xlu1 %3628 }
 0x8fd   : > { %v3636_v57 = vsel %vm1028_vm7, %v3629_v38, %v7846_v34  ;;  %v7975_v6 = vpop.permute.xlu0 %3907 }
 0x8fe   : > { %v3643_v22 = vadd.f32 %v3636_v57, %v3612_v21  ;;  %4193 = vrot.lane.b32.xlu1 %v4187_v50, %s4545_s20 }
 0x900   : > { %v3633_v24 = vpop.permute.xlu1 %3632 }
 0x901   : > { %v3637_v5 = vsel %vm1028_vm7, %v7846_v34, %v3633_v24  ;;  %v3638_v60 = vsel %vm1028_vm7, %v3633_v24, %v7860_v53  ;;  %v7981_v2 = vpop.permute.xlu0 %3911 }
 0x902   : > { %v3644_v13 = vadd.f32 %v3637_v5, %v3613_v16  ;;  %v3645_v20 = vadd.f32 %v3638_v60, %v3614_v15  ;;  %4197 = vrot.lane.b32.xlu1 %v4189_v40, %s4545_s20 }
 0x904   : > { %v3675_v32 = vpop.permute.xlu1 %3674 }
 0x905   : > { %v3680_v55 = vsel %vm1167_vm8, %v3675_v32, %v7872_v3  ;;  %v3686_v33 = vadd.f32 %v3675_v32, %v3643_v22  ;;  %v7990_v28 = vpop.permute.xlu0 %3935 }
 0x906   : > { %v3687_v52 = vadd.f32 %v3680_v55, %v3644_v13  ;;  %4221 = vrot.lane.b32.xlu1 %v4214_v46, %s4545_s20 }
 0x907   : > { %v3729_v51 = vadd.f32 %v7881_v43, %v3686_v33 }
 0x908   : > { %v3679_v59 = vpop.permute.xlu1 %3678 }
 0x909   : > { %v3681_v34 = vsel %vm1167_vm8, %v7872_v3, %v3679_v59  ;;  %v3689_v53 = vadd.f32 %v3679_v59, %v3646_v27  ;;  %v7995_v49 = vpop.permute.xlu0 %3959 }
 0x90a   : > { %v3688_v7 = vadd.f32 %v3681_v34, %v3645_v20 }
 0x90b   : > { %v3732_v9 = vadd.f32 %v7890_v37, %v3689_v53 }
 0x90c   : > { %v3720_v18 = vpop.permute.xlu1 %3719 }
 0x90d   : > { %v3723_v4 = vsel %vm1167_vm8, %v7881_v43, %v3720_v18  ;;  %v3724_v39 = vsel %vm1167_vm8, %v3720_v18, %v7890_v37  ;;  %v8001_v14 = vpop.permute.xlu0 %3963 }
 0x90e   : > { %v3730_v10 = vadd.f32 %v3723_v4, %v3687_v52  ;;  %v3731_v11 = vadd.f32 %v3724_v39, %v3688_v7 }
 0x910   : > { %v3761_v54 = vpop.permute.xlu1 %3760 }
 0x911   : > { %v3766_v3 = vsel %vm1167_vm8, %v3761_v54, %v7899_v0  ;;  %v3772_v25 = vadd.f32 %v3761_v54, %v3729_v51 }
 0x912   : > { %v3773_v48 = vadd.f32 %v3766_v3, %v3730_v10 }
 0x913   : > { %v3815_v40 = vadd.f32 %v7908_v62, %v3772_v25 }
 0x914   : > { %v3765_v58 = vpop.permute.xlu1 %3764 }
 0x915   : > { %v3767_v41 = vsel %vm1167_vm8, %v7899_v0, %v3765_v58  ;;  %v3775_v12 = vadd.f32 %v3765_v58, %v3732_v9  ;;  %v8003_v0 = vpop.permute.xlu0 %3987 }
 0x916   : > { %v3774_v19 = vadd.f32 %v3767_v41, %v3731_v11 }
 0x917   : > { %v3818_v37 = vadd.f32 %v7917_v1, %v3775_v12 }
 0x918   : > { %v3806_v27 = vpop.permute.xlu1 %3805 }
 0x919   : > { %v3809_v43 = vsel %vm1167_vm8, %v7908_v62, %v3806_v27  ;;  %v3810_v45 = vsel %vm1167_vm8, %v3806_v27, %v7917_v1  ;;  %v8005_v26 = vpop.permute.xlu0 %4011 }
 0x91a   : > { %v3816_v42 = vadd.f32 %v3809_v43, %v3773_v48  ;;  %v3817_v61 = vadd.f32 %v3810_v45, %v3774_v19 }
 0x91c   : > { %v3830_v63 = vpop.permute.xlu1 %3829 }
 0x91d   : > { %v8007_v23 = vpop.permute.xlu0 %4015  ;;  %v3841_v5 = vadd.f32 %v3830_v63, %v3815_v40  ;;  %v3835_v4 = vsel %vm1326_vm9, %v3830_v63, %v7930_v8 }
 0x91e   : > { %v3842_v54 = vadd.f32 %v3835_v4, %v3816_v42 }
 0x91f   : > { %v3867_v32 = vadd.f32 %v7941_v30, %v3841_v5 }
 0x920   : > { %v3834_v17 = vpop.permute.xlu1 %3833 }
 0x921   : > { %v8009_v29 = vpop.permute.xlu0 %4039  ;;  %v3844_v60 = vadd.f32 %v3834_v17, %v3818_v37  ;;  %v3836_v39 = vsel %vm1326_vm9, %v7930_v8, %v3834_v17 }
 0x922   : > { %v3843_v3 = vadd.f32 %v3836_v39, %v3817_v61 }
 0x923   : > { %v3870_v46 = vadd.f32 %v7954_v35, %v3844_v60 }
 0x924   : > { %v3858_v44 = vpop.permute.xlu1 %3857 }
 0x925   : > { %v8011_v16 = vpop.permute.xlu0 %4063  ;;  %v3861_v11 = vsel %vm1326_vm9, %v7941_v30, %v3858_v44  ;;  %v3862_v51 = vsel %vm1326_vm9, %v3858_v44, %v7954_v35 }
 0x926   : > { %v3868_v12 = vadd.f32 %v3861_v11, %v3842_v54  ;;  %v3869_v19 = vadd.f32 %v3862_v51, %v3843_v3 }
 0x928   : > { %v3882_v31 = vpop.permute.xlu1 %3881 }
 0x929   : > { %v8013_v50 = vpop.permute.xlu0 %4067  ;;  %v3893_v33 = vadd.f32 %v3882_v31, %v3867_v32  ;;  %v3887_v41 = vsel %vm1326_vm9, %v3882_v31, %v7962_v47 }
 0x92a   : > { %v3894_v43 = vadd.f32 %v3887_v41, %v3868_v12 }
 0x92b   : > { %v3919_v53 = vadd.f32 %v7975_v6, %v3893_v33 }
 0x92c   : > { %v3886_v21 = vpop.permute.xlu1 %3885 }
 0x92d   : > { %v8015_v22 = vpop.permute.xlu0 %4091  ;;  %v3896_v52 = vadd.f32 %v3886_v21, %v3870_v46  ;;  %v3888_v8 = vsel %vm1326_vm9, %v7962_v47, %v3886_v21 }
 0x92e   : > { %v3895_v42 = vadd.f32 %v3888_v8, %v3869_v19 }
 0x92f   : > { %v3922_v7 = vadd.f32 %v7981_v2, %v3896_v52 }
 0x930   : > { %v3910_v36 = vpop.permute.xlu1 %3909 }
 0x931   : > { %v8018_v20 = vpop.permute.xlu0 %4115  ;;  %v3913_v35 = vsel %vm1326_vm9, %v7975_v6, %v3910_v36  ;;  %v3914_v27 = vsel %vm1326_vm9, %v3910_v36, %v7981_v2 }
 0x932   : > { %v3920_v17 = vadd.f32 %v3913_v35, %v3894_v43  ;;  %v3921_v44 = vadd.f32 %v3914_v27, %v3895_v42 }
 0x934   : > { %v3934_v56 = vpop.permute.xlu1 %3933 }
 0x935   : > { %v8022_v59 = vpop.permute.xlu0 %4119  ;;  %v3945_v62 = vadd.f32 %v3934_v56, %v3919_v53  ;;  %v3939_v63 = vsel %vm390_vm2, %v3934_v56, %v7990_v28 }
 0x936   : > { %v3946_v36 = vadd.f32 %v3939_v63, %v3920_v17 }
 0x937   : > { %v3971_v25 = vadd.f32 %v7995_v49, %v3945_v62 }
 0x938   : > { %v3938_v1 = vpop.permute.xlu1 %3937 }
 0x939   : > { %v3948_v9 = vadd.f32 %v3938_v1, %v3922_v7  ;;  %v8030_v10 = vpop.permute.xlu0 %4143  ;;  %v3940_v47 = vsel %vm390_vm2, %v7990_v28, %v3938_v1 }
 0x93a   : > { %v3947_v40 = vadd.f32 %v3940_v47, %v3921_v44 }
 0x93b   : > { %v3974_v48 = vadd.f32 %v8001_v14, %v3948_v9 }
 0x93c   : > { %v3962_v15 = vpop.permute.xlu1 %3961 }
 0x93d   : > { %v4168_v45 = vpop.permute.xlu0 %4167  ;;  %v3965_v6 = vsel %vm390_vm2, %v7995_v49, %v3962_v15  ;;  %v3966_v2 = vsel %vm390_vm2, %v3962_v15, %v8001_v14 }
 0x93e   : > { %v3972_v46 = vadd.f32 %v3965_v6, %v3946_v36  ;;  %v3973_v33 = vadd.f32 %v3966_v2, %v3947_v40 }
 0x940   : > { %v3986_v38 = vpop.permute.xlu1 %3985 }
 0x941   : > { %v3997_v37 = vadd.f32 %v3986_v38, %v3971_v25  ;;  %v3991_v28 = vsel %vm390_vm2, %v3986_v38, %v8003_v0  ;;  %v4172_v32 = vpop.permute.xlu0 %4171 }
 0x942   : > { %v3998_v15 = vadd.f32 %v3991_v28, %v3972_v46 }
 0x943   : > { %v4023_v31 = vadd.f32 %v8005_v26, %v3997_v37 }
 0x944   : > { %v3990_v57 = vpop.permute.xlu1 %3989 }
 0x945   : > { %v4000_v30 = vadd.f32 %v3990_v57, %v3974_v48  ;;  %v3992_v1 = vsel %vm390_vm2, %v8003_v0, %v3990_v57  ;;  %v4196_v39 = vpop.permute.xlu0 %4195 }
 0x946   : > { %v3999_v52 = vadd.f32 %v3992_v1, %v3973_v33 }
 0x947   : > { %v4026_v21 = vadd.f32 %v8007_v23, %v4000_v30 }
 0x948   : > { %v4014_v24 = vpop.permute.xlu1 %4013 }
 0x949   : > { %v4017_v49 = vsel %vm390_vm2, %v8005_v26, %v4014_v24  ;;  %v4018_v14 = vsel %vm390_vm2, %v4014_v24, %v8007_v23  ;;  %v4220_v19 = vpop.permute.xlu0 %4219 }
 0x94a   : > { %v4024_v57 = vadd.f32 %v4017_v49, %v3998_v15  ;;  %v4025_v9 = vadd.f32 %v4018_v14, %v3999_v52 }
 0x94c   : > { %v4038_v13 = vpop.permute.xlu1 %4037 }
 0x94d   : > { %v4049_v5 = vadd.f32 %v4038_v13, %v4023_v31  ;;  %v4043_v38 = vsel %vm1535_vm10, %v4038_v13, %v8009_v29 }
 0x94e   : > { %v4050_v11 = vadd.f32 %v4043_v38, %v4024_v57 }
 0x94f   : > { %v4075_v53 = vadd.f32 %v8011_v16, %v4049_v5 }
 0x950   : > { %v4042_v55 = vpop.permute.xlu1 %4041 }
 0x951   : > { %v4052_v60 = vadd.f32 %v4042_v55, %v4026_v21  ;;  %v4044_v0 = vsel %vm1535_vm10, %v8009_v29, %v4042_v55  ;;  %v4224_v21 = vpop.permute.xlu0 %4223 }
 0x952   : > { %v4051_v51 = vadd.f32 %v4044_v0, %v4025_v9 }
 0x953   : > { %v4078_v7 = vadd.f32 %v8013_v50, %v4052_v60 }
 0x954   : > { %v4066_v34 = vpop.permute.xlu1 %4065 }
 0x955   : > { %v4069_v23 = vsel %vm1535_vm10, %v8011_v16, %v4066_v34  ;;  %v4070_v24 = vsel %vm1535_vm10, %v4066_v34, %v8013_v50 }
 0x956   : > { %v4076_v55 = vadd.f32 %v4069_v23, %v4050_v11  ;;  %v4077_v3 = vadd.f32 %v4070_v24, %v4051_v51 }
 0x958   : > { %v4090_v18 = vpop.permute.xlu1 %4089 }
 0x959   : > { %v4101_v4 = vadd.f32 %v4090_v18, %v4075_v53  ;;  %v4095_v13 = vsel %vm1535_vm10, %v4090_v18, %v8015_v22 }
 0x95a   : > { %v4102_v34 = vadd.f32 %v4095_v13, %v4076_v55 }
 0x95b   : > { %v4127_v25 = vadd.f32 %v8018_v20, %v4101_v4 }
 0x95c   : > { %v4094_v58 = vpop.permute.xlu1 %4093 }
 0x95d   : > { %v4104_v26 = vadd.f32 %v4094_v58, %v4078_v7  ;;  %v4096_v29 = vsel %vm1535_vm10, %v8015_v22, %v4094_v58 }
 0x95e   : > { %v4103_v41 = vadd.f32 %v4096_v29, %v4077_v3 }
 0x95f   : > { %v4130_v48 = vadd.f32 %v8022_v59, %v4104_v26 }
 0x960   : > { %v4118_v61 = vpop.permute.xlu1 %4117 }
 0x961   : > { %v4121_v16 = vsel %vm1535_vm10, %v8018_v20, %v4118_v61  ;;  %v4122_v50 = vsel %vm1535_vm10, %v4118_v61, %v8022_v59 }
 0x962   : > { %v4128_v37 = vadd.f32 %v4121_v16, %v4102_v34  ;;  %v4129_v30 = vadd.f32 %v4122_v50, %v4103_v41 }
 0x964   : > { %v4142_v56 = vpop.permute.xlu1 %4141 }
 0x965   : > { %v4153_v8 = vadd.f32 %v4142_v56, %v4127_v25  ;;  %v4147_v22 = vsel %vm1640_vm11, %v4142_v56, %v8030_v10 }
 0x966   : > { %v4154_v27 = vadd.f32 %v4147_v22, %v4128_v37 }
 0x967   : > { %v4179_v43 = vadd.f32 %v4168_v45, %v4153_v8 }
 0x968   : > { %v4146_v62 = vpop.permute.xlu1 %4145 }
 0x969   : > { %v4156_v12 = vadd.f32 %v4146_v62, %v4130_v48  ;;  %v4148_v58 = vsel %vm1640_vm11, %v8030_v10, %v4146_v62 }
 0x96a   : > { %v4155_v59 = vadd.f32 %v4148_v58, %v4129_v30 }
 0x96b   : > { %v4182_v61 = vadd.f32 %v4172_v32, %v4156_v12 }
 0x96c   : > { %v4170_v54 = vpop.permute.xlu1 %4169 }
 0x96d   : > { %v4173_v35 = vsel %vm1640_vm11, %v4168_v45, %v4170_v54  ;;  %v4174_v20 = vsel %vm1640_vm11, %v4170_v54, %v4172_v32 }
 0x96e   : > { %v4180_v17 = vadd.f32 %v4173_v35, %v4154_v27  ;;  %v4181_v44 = vadd.f32 %v4174_v20, %v4155_v59 }
 0x970   : > { %v4194_v18 = vpop.permute.xlu1 %4193 }
 0x971   : > { %v4199_v63 = vsel %vm1640_vm11, %v4194_v18, %v4196_v39  ;;  %v4205_v31 = vadd.f32 %v4194_v18, %v4179_v43 }
 0x972   : > { %v4206_v6 = vadd.f32 %v4199_v63, %v4180_v17 }
 0x973   : > { %v4231_v45 = vadd.f32 %v4220_v19, %v4205_v31 }
 0x974   : > { %v4198_v42 = vpop.permute.xlu1 %4197 }
 0x975   : > { %v4200_v47 = vsel %vm1640_vm11, %v4196_v39, %v4198_v42  ;;  %v4208_v10 = vadd.f32 %v4198_v42, %v4182_v61 }
 0x976   : > { %v4207_v2 = vadd.f32 %v4200_v47, %v4181_v44 }
 0x977   : > { %v4234_v60 = vadd.f32 %v4224_v21, %v4208_v10 }
 0x978   : > { %v4222_v36 = vpop.permute.xlu1 %4221 }
 0x979   : > { %v4225_v40 = vsel %vm1640_vm11, %v4220_v19, %v4222_v36  ;;  %v4226_v5 = vsel %vm1640_vm11, %v4222_v36, %v4224_v21 }
 0x97a   : > { %v4232_v56 = vadd.f32 %v4225_v40, %v4206_v6  ;;  %v4233_v28 = vadd.f32 %v4226_v5, %v4207_v2 }
 0x97c   : > { %v4239_v1 = vcombine.low %v4231_v45, %v4232_v56  ;;  %v4240_v32 = vcombine.low %v4233_v28, %v4234_v60 }
 0x97e   : > { %4243 = vrot.lane.b32.xlu0 %v4240_v32, %s4546_s24  ;;  %4241 = vrot.lane.b32.xlu1 %v4239_v1, %s4546_s24 }
 0x9f0   : > { %v4244_v46 = vpop.permute.xlu0 %4243  ;;  %v4242_v33 = vpop.permute.xlu1 %4241 }
 0x9f1   : > { %v4246_v49 = vrot.slane %v4244_v46, 4  ;;  %v4245_v14 = vrot.slane %v4242_v33, 4 }
 0x9f3   : > { %v4249_v15 = vsel %vm1774_vm12, %v4244_v46, %v4246_v49  ;;  %v4247_v52 = vsel %vm388_vm3, %v4245_v14, %v4246_v49 }
 0x9f4   : > { %4253 = vst.msk [vmem:[%s305_s9 + $0x8] sm:$0xf] %vm326_vm0, %v4249_v15  ;;  %v4248_v53 = vsel %vm1774_vm12, %v4242_v33, %v4247_v52 }
 0x9f5   : > { %4252 = vst [vmem:[%s305_s9] sm:$0xff] %v4248_v53 }
 0x9f6 PF: > { %s18_s27 = sadd.s32 1, %s4497_s27  }
 0x9f7   : > { %p15_p4 = scmp.ge.s32.totalorder %s18_s27, 4  }
 0x9f9   :  { %17 = sbr.rel (!%p15_p4) target bundleno = 1 (0x1), region = 93 }

</bundles_post_ra>
